<compile_context>
chip_gen: v7x
topology: tpu7x:2x2x1
jax: 0.10.0
libtpu: 0.0.40
codegen_flags: <defaults>
</compile_context>

<pallas_src>
import functools

import jax
import jax.numpy as jnp
from jax import lax
from jax.experimental import pallas as pl
from jax.experimental.pallas import tpu as pltpu

EPS = 1e-5      # nn.InstanceNorm2d default eps (affine=False, no running stats)
LANE = 128
SUBLANE = 8


def _round_up(x, m):
    return (x + m - 1) // m * m


# ---------------------------------------------------------------------------
# Fused kernel: im2col build -> single K-deep matmul -> InstanceNorm(+ReLU).
# Grid: (batch, row_tiles).  Input image & output image blocks are resident
# across the row-tile axis; the im2col scratch is rebuilt every tile.
# ---------------------------------------------------------------------------
def _conv_block_kernel(x_ref, w_ref, b_ref, o_ref, im2col_ref, *,
                       kh, kw, th, w_out, cin_p, cout, num_tiles,
                       use_norm, use_activation, eps):
    t = pl.program_id(1)
    row0 = pl.multiple_of(t * th, th)
    m = th * w_out

    # ---- Build the per-tile im2col LHS (taps folded into the matmul K dim).
    # Every (dy, dx) tap writes a 128-aligned, 128-multiple column range, so the
    # whole scratch is fully overwritten each step (no stale data is ever read).
    for dy in range(kh):
        slab = x_ref[0, pl.ds(row0 + dy, th), :, :]            # (th, wp, cin_p)
        for dx in range(kw):
            tap = slab[:, dx:dx + w_out, :]                    # (th, w_out, cin_p)
            col0 = (dy * kw + dx) * cin_p                      # lane aligned
            im2col_ref[:, col0:col0 + cin_p] = tap.reshape(m, cin_p)

    # ---- One K-deep MXU matmul for all kh*kw taps (f32 accumulation). -------
    acc = jnp.dot(im2col_ref[...], w_ref[...],
                  preferred_element_type=jnp.float32)          # (m, cout_p)

    def _to_tile(v):                                           # -> (th, w_out, cout)
        return v[:, :cout].reshape(th, w_out, cout)

    if not use_norm:
        # No InstanceNorm: the conv bias does not cancel, apply it (+ ReLU).
        acc = acc + b_ref[...]
        if use_activation:
            acc = jnp.maximum(acc, 0.0)
        o_ref[0, pl.ds(row0, th)] = _to_tile(acc).astype(o_ref.dtype)

    elif num_tiles == 1:
        # Whole image in one tile: exact stats straight from the live value.
        mean = jnp.sum(acc, axis=0, keepdims=True) * (1.0 / m)
        cen = acc - mean
        var = jnp.sum(cen * cen, axis=0, keepdims=True) * (1.0 / m)
        out = cen * lax.rsqrt(var + eps)
        if use_activation:
            out = jnp.maximum(out, 0.0)
        o_ref[0] = _to_tile(out).astype(o_ref.dtype)

    else:
        # Multi-tile image: stage raw conv rows in the VMEM-resident output
        # block; normalize everything in place on the last tile.  (Conv bias is
        # skipped either way -- InstanceNorm cancels it exactly.)
        o_ref[0, pl.ds(row0, th)] = _to_tile(acc).astype(o_ref.dtype)

        @pl.when(t == num_tiles - 1)
        def _finalize():
            img = o_ref[0].astype(jnp.float32)                 # (h_out, w_out, cout)
            inv_n = 1.0 / float(img.shape[0] * img.shape[1])
            s = jnp.sum(jnp.sum(img, axis=0, keepdims=True), axis=1, keepdims=True)
            mean = s * inv_n
            cen = img - mean
            sq = jnp.sum(jnp.sum(cen * cen, axis=0, keepdims=True), axis=1,
                         keepdims=True)
            out = cen * lax.rsqrt(sq * inv_n + eps)
            if use_activation:
                out = jnp.maximum(out, 0.0)
            o_ref[0] = out.astype(o_ref.dtype)


# ---------------------------------------------------------------------------
# Wrapper: ConvBlock forward (NCHW public API, PyTorch weight layout).
# ---------------------------------------------------------------------------
def conv_block_forward(x_nchw, weight, bias, *, stride=1, padding=0,
                       use_activation=True, use_norm=True, tile_rows=None):
    """ConvBlock: reflect-pad conv -> InstanceNorm2d(affine=False) -> [ReLU]."""
    if stride != 1:
        # TODO(synk): stride>1 (downsampling ConvBlock) is not lowered to Pallas here.
        raise NotImplementedError("Pallas ConvBlock kernel supports stride=1 only")
    # TODO(synk): norm_type other than nn.InstanceNorm2d(affine=False) is not lowered.

    n, cin, h, w = x_nchw.shape
    cout, cin_w, kh, kw = weight.shape
    assert cin_w == cin
    out_dtype = x_nchw.dtype

    h_out = h + 2 * padding - kh + 1
    w_out = w + 2 * padding - kw + 1
    assert h_out > 0 and w_out > 0

    # Channels padded to a full lane tile: every in-kernel slice / scratch store
    # is 128-lane aligned and K = kh*kw*cin_p is a multiple of 128.  The padded
    # channels are zero in both input and weights, so they contribute nothing.
    cin_p = _round_up(cin, LANE)
    cout_p = _round_up(cout, LANE)
    K = kh * kw * cin_p

    # NCHW -> NHWC, reflect-pad spatial dims, zero-pad channels, cast to bf16.
    x_nhwc = jnp.transpose(x_nchw, (0, 2, 3, 1))
    x_pad = jnp.pad(x_nhwc,
                    ((0, 0), (padding, padding), (padding, padding), (0, 0)),
                    mode="reflect")
    x_pad = jnp.pad(x_pad, ((0, 0), (0, 0), (0, 0), (0, cin_p - cin)))
    x_pad = x_pad.astype(jnp.bfloat16)
    hp, wp = x_pad.shape[1], x_pad.shape[2]

    # (Cout, Cin, kh, kw) -> (kh*kw*Cin_p, Cout_p): rows match the im2col column
    # order ((dy*kw + dx)*cin_p + c) used inside the kernel.
    w_taps = jnp.transpose(weight, (2, 3, 1, 0))
    w_taps = jnp.pad(w_taps,
                     ((0, 0), (0, 0), (0, cin_p - cin), (0, cout_p - cout)))
    w2 = w_taps.reshape(K, cout_p).astype(jnp.bfloat16)

    b_row = jnp.pad(bias.astype(jnp.float32), (0, cout_p - cout)).reshape(1, cout_p)

    # ---- Row-tile size from an explicit per-tile VMEM budget. ----------------
    out_isz = jnp.dtype(out_dtype).itemsize
    if tile_rows is not None:
        cap = max(1, min(int(tile_rows), h_out))
    else:
        per_row = w_out * (K * 2 + cout_p * 4 + cout_p * out_isz)   # im2col + acc + out rows
        cap = max(1, (12 << 20) // max(per_row, 1))
    if h_out <= cap:
        th = h_out
    else:
        th = 1
        for d in range(1, cap + 1):
            if h_out % d == 0:
                th = d
    num_tiles = h_out // th

    # ---- VMEM accounting (resident blocks double-buffered by the pipeline). --
    in_vmem = 2 * hp * _round_up(wp, SUBLANE) * cin_p * 2
    w_vmem = 2 * K * cout_p * 2
    out_vmem = 2 * h_out * _round_up(w_out, SUBLANE) * _round_up(cout, LANE) * out_isz
    tmp_vmem = th * w_out * (K * 2 + 2 * cout_p * 4)
    need = in_vmem + w_vmem + out_vmem + tmp_vmem + (4 << 20)
    if need > (112 << 20):
        # TODO(synk): row-tiled two-pass (conv+stats, then normalize) fallback for
        # images / weights too large to keep VMEM-resident (budget is 64 MiB on v7x).
        raise NotImplementedError(
            "image/weights too large for the fused VMEM-resident ConvBlock kernel")
    vmem_limit = int(min(max(need, 32 << 20), 120 << 20))

    kernel = functools.partial(
        _conv_block_kernel, kh=kh, kw=kw, th=th, w_out=w_out, cin_p=cin_p,
        cout=cout, num_tiles=num_tiles, use_norm=use_norm,
        use_activation=use_activation, eps=EPS)

    out_nhwc = pl.pallas_call(
        kernel,
        grid=(n, num_tiles),
        in_specs=[
            # Whole padded image, resident across the row-tile axis; the pipeline
            # prefetches image n+1 while image n is being computed.
            pl.BlockSpec((1, hp, wp, cin_p), lambda i, j: (i, 0, 0, 0)),
            # Folded weights: constant index map -> stays resident in VMEM.
            # TODO(synk): single-buffer / K-tile very large (e.g. 7x7x512x512) weights.
            pl.BlockSpec((K, cout_p), lambda i, j: (0, 0)),
            pl.BlockSpec((1, cout_p), lambda i, j: (0, 0)),
        ],
        out_specs=pl.BlockSpec((1, h_out, w_out, cout), lambda i, j: (i, 0, 0, 0)),
        out_shape=jax.ShapeDtypeStruct((n, h_out, w_out, cout), out_dtype),
        scratch_shapes=[pltpu.VMEM((th * w_out, K), jnp.bfloat16)],   # im2col LHS
        compiler_params=pltpu.CompilerParams(
            dimension_semantics=("parallel", "arbitrary"),
            vmem_limit_bytes=vmem_limit),
    )(x_pad, w2, b_row)

    return jnp.transpose(out_nhwc, (0, 3, 1, 2))   # NHWC -> NCHW


# ---------------------------------------------------------------------------
# Parameter init (PyTorch Conv2d default init) and pure-JAX reference.
# ---------------------------------------------------------------------------
def init_conv_block_params(key, in_channels, out_channels, kernel_size):
    k_w, k_b = jax.random.split(key)
    fan_in = in_channels * kernel_size * kernel_size
    bound = 1.0 / float(fan_in) ** 0.5
    wgt = jax.random.uniform(k_w, (out_channels, in_channels, kernel_size, kernel_size),
                             jnp.float32, -bound, bound)
    b = jax.random.uniform(k_b, (out_channels,), jnp.float32, -bound, bound)
    return wgt, b


def conv_block_reference(x, weight, bias, *, stride=1, padding=0, use_activation=True):
    xp = jnp.pad(x, ((0, 0), (0, 0), (padding, padding), (padding, padding)),
                 mode="reflect")
    y = lax.conv_general_dilated(xp, weight, (stride, stride), "VALID",
                                 dimension_numbers=("NCHW", "OIHW", "NCHW"))
    y = y + bias.reshape(1, -1, 1, 1)
    mean = jnp.mean(y, axis=(2, 3), keepdims=True)
    var = jnp.var(y, axis=(2, 3), keepdims=True)
    y = (y - mean) * lax.rsqrt(var + EPS)
    if use_activation:
        y = jnp.maximum(y, 0.0)
    return y


if __name__ == "__main__":
    key = jax.random.PRNGKey(0)
    k_x, k_p1, k_p2 = jax.random.split(key, 3)

    batch, in_ch, out_ch, spatial = 2, 4, 8, 16
    x = jax.random.normal(k_x, (batch, in_ch, spatial, spatial), jnp.float32)

    # Config 1: 3x3 ConvBlock (reflect pad 1), InstanceNorm + ReLU (fused, 1 tile).
    w1, b1 = init_conv_block_params(k_p1, in_ch, out_ch, 3)
    fwd1 = jax.jit(functools.partial(conv_block_forward, padding=1,
                                     use_activation=True))
    out1 = fwd1(x, w1, b1)
    jax.block_until_ready(out1)
    ref1 = conv_block_reference(x, w1, b1, padding=1, use_activation=True)
    assert out1.shape == (batch, out_ch, spatial, spatial), out1.shape
    assert bool(jnp.all(jnp.isfinite(out1)))
    assert float(jnp.max(jnp.abs(out1 - ref1))) < 1e-1

    # Config 2: 7x7 ConvBlock (reflect pad 3), InstanceNorm, no ReLU.
    w2, b2 = init_conv_block_params(k_p2, in_ch, in_ch, 7)
    fwd2 = jax.jit(functools.partial(conv_block_forward, padding=3,
                                     use_activation=False))
    out2 = fwd2(x, w2, b2)
    jax.block_until_ready(out2)
    ref2 = conv_block_reference(x, w2, b2, padding=3, use_activation=False)
    assert out2.shape == (batch, in_ch, spatial, spatial), out2.shape
    assert bool(jnp.all(jnp.isfinite(out2)))
    assert float(jnp.max(jnp.abs(out2 - ref2))) < 1e-1

    # Config 3: force row tiling (2 tiles) to exercise the resident-output
    # multi-tile finalize path of the same kernel.
    fwd3 = jax.jit(functools.partial(conv_block_forward, padding=1,
                                     use_activation=True, tile_rows=8))
    out3 = fwd3(x, w1, b1)
    jax.block_until_ready(out3)
    assert out3.shape == (batch, out_ch, spatial, spatial), out3.shape
    assert bool(jnp.all(jnp.isfinite(out3)))
    assert float(jnp.max(jnp.abs(out3 - ref1))) < 1e-1

    print("KERNEL_OK")
</pallas_src>

<mosaic_0001>
module attributes {stable_mosaic.version = 11 : i64} {
  func.func @_conv_block_kernel(%arg0: i32, %arg1: i32, %arg2: memref<1x18x18x128xbf16, #tpu.memory_space<vmem>>, %arg3: memref<1152x128xbf16, #tpu.memory_space<vmem>>, %arg4: memref<1x128xf32, #tpu.memory_space<vmem>>, %arg5: memref<1x16x16x8xf32, #tpu.memory_space<vmem>>, %arg6: memref<256x1152xbf16, #tpu.memory_space<vmem>>) attributes {dimension_semantics = [#tpu.dimension_semantics<parallel>, #tpu.dimension_semantics<arbitrary>], iteration_bounds = array<i64: 2, 1>, scalar_prefetch = 0 : i64, scratch_operands = 1 : i64, tpu.core_type = #tpu.core_type<tc>, window_params = [{transform_indices = @transform_0, window_bounds = array<i64: 1, 18, 18, 128>}, {pipeline_mode = #tpu.pipeline_mode<synchronous>, transform_indices = @transform_1, window_bounds = array<i64: 1152, 128>}, {pipeline_mode = #tpu.pipeline_mode<synchronous>, transform_indices = @transform_2, window_bounds = array<i64: 1, 128>}, {transform_indices = @transform_3, window_bounds = array<i64: 1, 16, 16, 8>}]} {
    %c16_i32 = arith.constant 16 : i32
    %0 = arith.muli %arg1, %c16_i32 : i32
    %1 = tpu.assume_multiple %0, 16 : i32
    %c0_i32 = arith.constant 0 : i32
    %2 = arith.addi %1, %c0_i32 : i32
    %c0 = arith.constant 0 : index
    %3 = arith.index_cast %2 : i32 to index
    %c0_0 = arith.constant 0 : index
    %c0_1 = arith.constant 0 : index
    %4 = vector.load %arg2[%c0, %3, %c0_0, %c0_1] : memref<1x18x18x128xbf16, #tpu.memory_space<vmem>>, vector<1x16x18x128xbf16>
    %5 = vector.shape_cast %4 : vector<1x16x18x128xbf16> to vector<16x18x128xbf16>
    %6 = vector.extract_strided_slice %5 {offsets = [0, 0, 0], sizes = [16, 16, 128], strides = [1, 1, 1]} : vector<16x18x128xbf16> to vector<16x16x128xbf16>
    %7 = vector.shape_cast %6 : vector<16x16x128xbf16> to vector<256x128xbf16>
    %c0_2 = arith.constant 0 : index
    %c0_3 = arith.constant 0 : index
    %8 = vector.load %arg6[%c0_2, %c0_3] : memref<256x1152xbf16, #tpu.memory_space<vmem>>, vector<256x128xbf16>
    tpu.vector_store %arg6[%c0_2, %c0_3], %7 {strides = array<i32>} : memref<256x1152xbf16, #tpu.memory_space<vmem>>, vector<256x128xbf16>,
    %9 = vector.extract_strided_slice %5 {offsets = [0, 1, 0], sizes = [16, 16, 128], strides = [1, 1, 1]} : vector<16x18x128xbf16> to vector<16x16x128xbf16>
    %10 = vector.shape_cast %9 : vector<16x16x128xbf16> to vector<256x128xbf16>
    %c0_4 = arith.constant 0 : index
    %c128 = arith.constant 128 : index
    %11 = vector.load %arg6[%c0_4, %c128] : memref<256x1152xbf16, #tpu.memory_space<vmem>>, vector<256x128xbf16>
    tpu.vector_store %arg6[%c0_4, %c128], %10 {strides = array<i32>} : memref<256x1152xbf16, #tpu.memory_space<vmem>>, vector<256x128xbf16>,
    %12 = vector.extract_strided_slice %5 {offsets = [0, 2, 0], sizes = [16, 16, 128], strides = [1, 1, 1]} : vector<16x18x128xbf16> to vector<16x16x128xbf16>
    %13 = vector.shape_cast %12 : vector<16x16x128xbf16> to vector<256x128xbf16>
    %c0_5 = arith.constant 0 : index
    %c256 = arith.constant 256 : index
    %14 = vector.load %arg6[%c0_5, %c256] : memref<256x1152xbf16, #tpu.memory_space<vmem>>, vector<256x128xbf16>
    tpu.vector_store %arg6[%c0_5, %c256], %13 {strides = array<i32>} : memref<256x1152xbf16, #tpu.memory_space<vmem>>, vector<256x128xbf16>,
    %c1_i32 = arith.constant 1 : i32
    %15 = arith.addi %1, %c1_i32 : i32
    %c0_6 = arith.constant 0 : index
    %16 = arith.index_cast %15 : i32 to index
    %c0_7 = arith.constant 0 : index
    %c0_8 = arith.constant 0 : index
    %17 = vector.load %arg2[%c0_6, %16, %c0_7, %c0_8] : memref<1x18x18x128xbf16, #tpu.memory_space<vmem>>, vector<1x16x18x128xbf16>
    %18 = vector.shape_cast %17 : vector<1x16x18x128xbf16> to vector<16x18x128xbf16>
    %19 = vector.extract_strided_slice %18 {offsets = [0, 0, 0], sizes = [16, 16, 128], strides = [1, 1, 1]} : vector<16x18x128xbf16> to vector<16x16x128xbf16>
    %20 = vector.shape_cast %19 : vector<16x16x128xbf16> to vector<256x128xbf16>
    %c0_9 = arith.constant 0 : index
    %c384 = arith.constant 384 : index
    %21 = vector.load %arg6[%c0_9, %c384] : memref<256x1152xbf16, #tpu.memory_space<vmem>>, vector<256x128xbf16>
    tpu.vector_store %arg6[%c0_9, %c384], %20 {strides = array<i32>} : memref<256x1152xbf16, #tpu.memory_space<vmem>>, vector<256x128xbf16>,
    %22 = vector.extract_strided_slice %18 {offsets = [0, 1, 0], sizes = [16, 16, 128], strides = [1, 1, 1]} : vector<16x18x128xbf16> to vector<16x16x128xbf16>
    %23 = vector.shape_cast %22 : vector<16x16x128xbf16> to vector<256x128xbf16>
    %c0_10 = arith.constant 0 : index
    %c512 = arith.constant 512 : index
    %24 = vector.load %arg6[%c0_10, %c512] : memref<256x1152xbf16, #tpu.memory_space<vmem>>, vector<256x128xbf16>
    tpu.vector_store %arg6[%c0_10, %c512], %23 {strides = array<i32>} : memref<256x1152xbf16, #tpu.memory_space<vmem>>, vector<256x128xbf16>,
    %25 = vector.extract_strided_slice %18 {offsets = [0, 2, 0], sizes = [16, 16, 128], strides = [1, 1, 1]} : vector<16x18x128xbf16> to vector<16x16x128xbf16>
    %26 = vector.shape_cast %25 : vector<16x16x128xbf16> to vector<256x128xbf16>
    %c0_11 = arith.constant 0 : index
    %c640 = arith.constant 640 : index
    %27 = vector.load %arg6[%c0_11, %c640] : memref<256x1152xbf16, #tpu.memory_space<vmem>>, vector<256x128xbf16>
    tpu.vector_store %arg6[%c0_11, %c640], %26 {strides = array<i32>} : memref<256x1152xbf16, #tpu.memory_space<vmem>>, vector<256x128xbf16>,
    %c2_i32 = arith.constant 2 : i32
    %28 = arith.addi %1, %c2_i32 : i32
    %c0_12 = arith.constant 0 : index
    %29 = arith.index_cast %28 : i32 to index
    %c0_13 = arith.constant 0 : index
    %c0_14 = arith.constant 0 : index
    %30 = vector.load %arg2[%c0_12, %29, %c0_13, %c0_14] : memref<1x18x18x128xbf16, #tpu.memory_space<vmem>>, vector<1x16x18x128xbf16>
    %31 = vector.shape_cast %30 : vector<1x16x18x128xbf16> to vector<16x18x128xbf16>
    %32 = vector.extract_strided_slice %31 {offsets = [0, 0, 0], sizes = [16, 16, 128], strides = [1, 1, 1]} : vector<16x18x128xbf16> to vector<16x16x128xbf16>
    %33 = vector.shape_cast %32 : vector<16x16x128xbf16> to vector<256x128xbf16>
    %c0_15 = arith.constant 0 : index
    %c768 = arith.constant 768 : index
    %34 = vector.load %arg6[%c0_15, %c768] : memref<256x1152xbf16, #tpu.memory_space<vmem>>, vector<256x128xbf16>
    tpu.vector_store %arg6[%c0_15, %c768], %33 {strides = array<i32>} : memref<256x1152xbf16, #tpu.memory_space<vmem>>, vector<256x128xbf16>,
    %35 = vector.extract_strided_slice %31 {offsets = [0, 1, 0], sizes = [16, 16, 128], strides = [1, 1, 1]} : vector<16x18x128xbf16> to vector<16x16x128xbf16>
    %36 = vector.shape_cast %35 : vector<16x16x128xbf16> to vector<256x128xbf16>
    %c0_16 = arith.constant 0 : index
    %c896 = arith.constant 896 : index
    %37 = vector.load %arg6[%c0_16, %c896] : memref<256x1152xbf16, #tpu.memory_space<vmem>>, vector<256x128xbf16>
    tpu.vector_store %arg6[%c0_16, %c896], %36 {strides = array<i32>} : memref<256x1152xbf16, #tpu.memory_space<vmem>>, vector<256x128xbf16>,
    %38 = vector.extract_strided_slice %31 {offsets = [0, 2, 0], sizes = [16, 16, 128], strides = [1, 1, 1]} : vector<16x18x128xbf16> to vector<16x16x128xbf16>
    %39 = vector.shape_cast %38 : vector<16x16x128xbf16> to vector<256x128xbf16>
    %c0_17 = arith.constant 0 : index
    %c1024 = arith.constant 1024 : index
    %40 = vector.load %arg6[%c0_17, %c1024] : memref<256x1152xbf16, #tpu.memory_space<vmem>>, vector<256x128xbf16>
    tpu.vector_store %arg6[%c0_17, %c1024], %39 {strides = array<i32>} : memref<256x1152xbf16, #tpu.memory_space<vmem>>, vector<256x128xbf16>,
    %c0_18 = arith.constant 0 : index
    %c0_19 = arith.constant 0 : index
    %41 = vector.load %arg6[%c0_18, %c0_19] : memref<256x1152xbf16, #tpu.memory_space<vmem>>, vector<256x1152xbf16>
    %c0_20 = arith.constant 0 : index
    %c0_21 = arith.constant 0 : index
    %42 = vector.load %arg3[%c0_20, %c0_21] : memref<1152x128xbf16, #tpu.memory_space<vmem>>, vector<1152x128xbf16>
    %cst = arith.constant dense<0.000000e+00> : vector<256x128xf32>
    %43 = tpu.matmul %41, %42, %cst {dimension_numbers = #tpu.dot_dimension_numbers<[1], [0], [0], [1], [0, 0, 1, 1], [], []>} : vector<256x1152xbf16>, vector<1152x128xbf16>, vector<256x128xf32> -> vector<256x128xf32>
    %cst_22 = arith.constant dense<0.000000e+00> : vector<128xf32>
    %44 = vector.multi_reduction <add>, %43, %cst_22 [0] : vector<256x128xf32> to vector<128xf32>
    %45 = vector.shape_cast %44 : vector<128xf32> to vector<1x128xf32>
    %cst_23 = arith.constant 3.906250e-03 : f32
    %46 = vector.broadcast %cst_23 : f32 to vector<1x128xf32>
    %47 = arith.mulf %45, %46 : vector<1x128xf32>
    %48 = vector.broadcast %47 : vector<1x128xf32> to vector<256x128xf32>
    %49 = arith.subf %43, %48 : vector<256x128xf32>
    %50 = arith.mulf %49, %49 : vector<256x128xf32>
    %cst_24 = arith.constant dense<0.000000e+00> : vector<128xf32>
    %51 = vector.multi_reduction <add>, %50, %cst_24 [0] : vector<256x128xf32> to vector<128xf32>
    %52 = vector.shape_cast %51 : vector<128xf32> to vector<1x128xf32>
    %cst_25 = arith.constant 3.906250e-03 : f32
    %53 = vector.broadcast %cst_25 : f32 to vector<1x128xf32>
    %54 = arith.mulf %52, %53 : vector<1x128xf32>
    %cst_26 = arith.constant 9.99999974E-6 : f32
    %55 = vector.broadcast %cst_26 : f32 to vector<1x128xf32>
    %56 = arith.addf %54, %55 : vector<1x128xf32>
    %57 = math.rsqrt %56 : vector<1x128xf32>
    %58 = vector.broadcast %57 : vector<1x128xf32> to vector<256x128xf32>
    %59 = arith.mulf %49, %58 : vector<256x128xf32>
    %cst_27 = arith.constant 0.000000e+00 : f32
    %60 = vector.broadcast %cst_27 : f32 to vector<256x128xf32>
    %61 = arith.maximumf %59, %60 : vector<256x128xf32>
    %62 = vector.extract_strided_slice %61 {offsets = [0, 0], sizes = [256, 8], strides = [1, 1]} : vector<256x128xf32> to vector<256x8xf32>
    %63 = vector.shape_cast %62 : vector<256x8xf32> to vector<16x16x8xf32>
    %c0_28 = arith.constant 0 : index
    %c0_29 = arith.constant 0 : index
    %c0_30 = arith.constant 0 : index
    %c0_31 = arith.constant 0 : index
    %64 = vector.load %arg5[%c0_28, %c0_29, %c0_30, %c0_31] : memref<1x16x16x8xf32, #tpu.memory_space<vmem>>, vector<1x16x16x8xf32>
    %65 = vector.shape_cast %64 : vector<1x16x16x8xf32> to vector<16x16x8xf32>
    %66 = vector.shape_cast %63 : vector<16x16x8xf32> to vector<1x16x16x8xf32>
    tpu.vector_store %arg5[%c0_28, %c0_29, %c0_30, %c0_31], %66 {strides = array<i32>} : memref<1x16x16x8xf32, #tpu.memory_space<vmem>>, vector<1x16x16x8xf32>,
    return
  }
  func.func @transform_0(%arg0: i32, %arg1: i32) -> (i32, i32, i32, i32) {
    %c0_i32 = arith.constant 0 : i32
    %c0_i32_0 = arith.constant 0 : i32
    %c0_i32_1 = arith.constant 0 : i32
    %c0_i32_2 = arith.constant 0 : i32
    return %arg0, %c0_i32, %c0_i32_0, %c0_i32_1 : i32, i32, i32, i32
  }
  func.func @transform_1(%arg0: i32, %arg1: i32) -> (i32, i32) {
    %c0_i32 = arith.constant 0 : i32
    %c0_i32_0 = arith.constant 0 : i32
    %c0_i32_1 = arith.constant 0 : i32
    return %c0_i32, %c0_i32_0 : i32, i32
  }
  func.func @transform_2(%arg0: i32, %arg1: i32) -> (i32, i32) {
    %c0_i32 = arith.constant 0 : i32
    %c0_i32_0 = arith.constant 0 : i32
    %c0_i32_1 = arith.constant 0 : i32
    return %c0_i32, %c0_i32_0 : i32, i32
  }
  func.func @transform_3(%arg0: i32, %arg1: i32) -> (i32, i32, i32, i32) {
    %c0_i32 = arith.constant 0 : i32
    %c0_i32_0 = arith.constant 0 : i32
    %c0_i32_1 = arith.constant 0 : i32
    %c0_i32_2 = arith.constant 0 : i32
    return %arg0, %c0_i32, %c0_i32_0, %c0_i32_1 : i32, i32, i32, i32
  }
}

</mosaic_0001>

<bundles_post_ra>
// kernel: conv_block_forward.1
= control target key start
LH: loop header
LB: loop body
LE: loop exit
PB: predicated region body
PF: predicated region fallthrough
CT: control target
= control target key end

     0   :  { %s5644_s12 = smov 0   ;;  %s5646_s13 = smov 0   ;;  %s8077_s0 = inlined_call_operand.vmem [shape: bf16[2,18,18,128], index: 0, kind: input, shape index: {}]   ;;  %s8078_s1 = inlined_call_operand.vmem [shape: bf16[1152,128], index: 1, kind: input, shape index: {}]   ;;  %s8079_s2 = inlined_call_operand.vmem [shape: f32[1,128], index: 2, kind: input, shape index: {}]   ;;  %s8080_s3 = inlined_call_operand.vmem [shape: f32[2,16,16,8], index: 3, kind: output, shape index: {}]  }
   0x1   :  { %s5648_s14 = smov 0  }
   0x2 LB: > { %s25_s2 = sadd.s32 1, %s5618_s13  ;;  %p4539_p0 = scmp.ge.s32.totalorder %s5622_s14, 1  ;;  %s5622_s14 = sphi %s5648_s14, %s13_s14   ;;  %s5618_s13 = sphi %s5646_s13, %s8118_s13   ;;  %s5614_s12 = sphi %s5644_s12, %s8117_s12  }
   0x3   : > { %p27_p1 = scmp.ge.s32.totalorder %s25_s2, 2  ;;  %p149_p2 = scmp.lt.s32.totalorder %s5622_s14, 3 }
   0x5   : > { %s8120_s2 = smov (%p27_p1, %s25_s2), 0  ;;  %p150_p3 = pnand %p4539_p0, %p149_p2 }
   0x6   : > { %v5467_v0 = vld [vmem:[%s8078_s1 + $0x40] sm:$0xff] (!%p150_p3)   ;;  %p173_p4 = scmp.lt.s32.totalorder (!%p150_p3), %s5614_s12, 1  ;;  %v5469_v2 = vld [vmem:[%s8078_s1 + $0x48] sm:$0xff] (!%p150_p3)   ;;  %v5471_v4 = vld [vmem:[%s8078_s1 + $0x50] sm:$0xff] (!%p150_p3)   ;;  %vm348_vm0 = vsmask.f32 (!%p150_p3), 3328 }
   0x7   : > { %153 = sbr.rel (%p150_p3) target bundleno = 704 (0x2c0), region = 32  ;;  %v5468_v1 = vld [vmem:[%s8078_s1] sm:$0xff] (!%p150_p3)   ;;  %4906 = vmatprep.subr.bf16.mxu0 (!%p150_p3), %v5467_v0  ;;  %5426 = vmatprep.subr.bf16.mxu1 (!%p150_p3), %v5467_v0  ;;  %v5470_v3 = vld [vmem:[%s8078_s1 + $0x8] sm:$0xff] (!%p150_p3)   ;;  %v5472_v5 = vld [vmem:[%s8078_s1 + $0x10] sm:$0xff] (!%p150_p3)   ;;  %vm349_vm1 = vsmask.f32 (!%p150_p3), 7440 }
   0x8   : > { %4907 = vmatpush3.bf16.msra.mxu0 (!%p150_p3), %v5468_v1  ;;  %5434 = vmatpush3.bf16.msra.mxu1 (!%p150_p3), %v5468_v1  ;;  %v5473_v6 = vld [vmem:[%s8078_s1 + $0x58] sm:$0xff] (!%p150_p3)   ;;  %v5475_v8 = vld [vmem:[%s8078_s1 + $0x60] sm:$0xff] (!%p150_p3)   ;;  %v5477_v10 = vld [vmem:[%s8078_s1 + $0x68] sm:$0xff] (!%p150_p3)   ;;  %vm831_vm3 = vcmask (!%p150_p3), 1042432   ;;  %vm832_vm4 = vcmask (!%p150_p3), 1046532   ;;  %vm4429_vm6 = vcmask (!%p150_p3), 64512  }
   0x9   : > { %4908 = vmatprep.subr.bf16.mxu0 (!%p150_p3), %v5469_v2  ;;  %5427 = vmatprep.subr.bf16.mxu1 (!%p150_p3), %v5469_v2  ;;  %v5474_v7 = vld [vmem:[%s8078_s1 + $0x18] sm:$0xff] (!%p150_p3)   ;;  %v5476_v9 = vld [vmem:[%s8078_s1 + $0x20] sm:$0xff] (!%p150_p3)   ;;  %v5478_v14 = vld [vmem:[%s8078_s1 + $0x28] sm:$0xff] (!%p150_p3)  }
   0xa   : > { %v5479_v17 = vld [vmem:[%s8078_s1 + $0x70] sm:$0xff] (!%p150_p3)   ;;  %vm5741_vm2 = vmor (!%p150_p3), %vm348_vm0, %vm349_vm1  ;;  %v5481_v40 = vld [vmem:[%s8078_s1 + $0x78] sm:$0xff] (!%p150_p3)  }
   0xb   : > { %v5480_v34 = vld [vmem:[%s8078_s1 + $0x30] sm:$0xff] (!%p150_p3)   ;;  %v5482_v48 = vld [vmem:[%s8078_s1 + $0x38] sm:$0xff] (!%p150_p3)   ;;  %v5485_v57 = vld [vmem:[%s8078_s1 + $0xc0] sm:$0xff] (!%p150_p3)  }
   0xc   : > { %4909 = vmatpush3.bf16.msra.mxu0 (!%p150_p3), %v5470_v3  ;;  %5435 = vmatpush3.bf16.msra.mxu1 (!%p150_p3), %v5470_v3  ;;  %v5486_v60 = vld [vmem:[%s8078_s1 + $0x140] sm:$0xff] (!%p150_p3)   ;;  %vm5937_vm5 = vmor (!%p150_p3), %vm831_vm3, %vm832_vm4 }
   0xd   : > { %4910 = vmatprep.subr.bf16.mxu0 (!%p150_p3), %v5471_v4  ;;  %5428 = vmatprep.subr.bf16.mxu1 (!%p150_p3), %v5471_v4  ;;  %v5487_v0 = vld [vmem:[%s8078_s1 + $0x80] sm:$0xff] (!%p150_p3)  }
   0xe   : > { %s8122_s12 = smov (!%p173_p4, %s5614_s12), 1  ;;  %v5488_v1 = vld [vmem:[%s8078_s1 + $0x100] sm:$0xff]  }
   0xf   : > { %s5442_s29 = smul.u32 216, %s8122_s12 }
  0x10   : > { %4911 = vmatpush3.bf16.msra.mxu0 %v5472_v5  ;;  %5436 = vmatpush3.bf16.msra.mxu1 %v5472_v5 }
  0x11   : > { %4912 = vmatprep.subr.bf16.mxu0 %v5473_v6  ;;  %5429 = vmatprep.subr.bf16.mxu1 %v5473_v6  ;;  %s5695_s9 = scalar_lea.vmem %s8077_s0, %s5442_s29 }
  0x12   : > { %v5704_v11 = vld [vmem:[%s5695_s9] sm:$0xf]  ;;  %v5707_v12 = vld [vmem:[%s5695_s9 + $0x4] sm:$0xf]  ;;  %v5710_v13 = vld [vmem:[%s5695_s9 + $0x8] sm:$0x1] }
  0x13   : > { %v352_v15 = vshrl.u32 %v5704_v11, 16  ;;  %v355_v16 = vshll.u32 %v5704_v11, 16  ;;  %v361_v18 = vshll.u32 %v5707_v12, 16  ;;  %v365_v19 = vshrl.u32 %v5707_v12, 16  ;;  %v5724_v21 = vld [vmem:[%s5695_s9 + $0x90] sm:$0xf] }
  0x14   : > { %4913 = vmatpush3.bf16.msra.mxu0 %v5474_v7  ;;  %5437 = vmatpush3.bf16.msra.mxu1 %v5474_v7  ;;  %v371_v20 = vshll.u32 %v5710_v13, 16  ;;  %v5727_v24 = vld [vmem:[%s5695_s9 + $0x94] sm:$0xf]  ;;  %v836_v27 = vrot.slane %v5707_v12, 5  ;;  %v5731_v28 = vld [vmem:[%s5695_s9 + $0x98] sm:$0x1]  ;;  %v4543_v59 = vcombine.low %v5704_v11, %v5707_v12 }
  0x15   : > { %4914 = vmatprep.subr.bf16.mxu0 %v5475_v8  ;;  %5430 = vmatprep.subr.bf16.mxu1 %v5475_v8  ;;  %v354_v22 = vrot.slane %v352_v15, 4  ;;  %v357_v23 = vrot.slane %v355_v16, 5  ;;  %v363_v25 = vrot.slane %v361_v18, 5  ;;  %v367_v26 = vrot.slane %v365_v19, 4  ;;  %v5772_v61 = vld [vmem:[%s5695_s9 + $0xc] sm:$0xf] }
  0x16   : > { %v640_v29 = vshrl.u32 %v5724_v21, 16  ;;  %v373_v31 = vrot.slane %v371_v20, 5  ;;  %v643_v32 = vshll.u32 %v5724_v21, 16  ;;  %v649_v33 = vshll.u32 %v5727_v24, 16  ;;  %v5785_v2 = vld [vmem:[%s5695_s9 + $0x10] sm:$0xf] }
  0x17   : > { %v358_v30 = vor.u32 %v357_v23, %v354_v22  ;;  %v368_v36 = vor.u32 %v367_v26, %v363_v25  ;;  %v653_v38 = vshrl.u32 %v5727_v24, 16  ;;  %v659_v39 = vshll.u32 %v5731_v28, 16  ;;  %v5788_v3 = vld [vmem:[%s5695_s9 + $0x14] sm:$0x1]  ;;  %v5489_v7 = vld [vmem:[%s8078_s1 + $0xc8] sm:$0xff]  }
  0x18   : > { %4915 = vmatpush3.bf16.msra.mxu0 %v5476_v9  ;;  %5438 = vmatpush3.bf16.msra.mxu1 %v5476_v9  ;;  %v642_v37 = vrot.slane %v640_v29, 4  ;;  %v645_v42 = vrot.slane %v643_v32, 5  ;;  %v651_v43 = vrot.slane %v649_v33, 5  ;;  %v4575_v45 = vrot.slane %v5704_v11, 9  ;;  %v5804_v18 = vld [vmem:[%s5695_s9 + $0xa0] sm:$0xf] }
  0x19   : > { %4916 = vmatprep.subr.bf16.mxu0 %v5477_v10  ;;  %5431 = vmatprep.subr.bf16.mxu1 %v5477_v10  ;;  %v359_v41 = vrot.slane %v358_v30, 4  ;;  %v369_v44 = vrot.slane %v368_v36, 4  ;;  %v839_v46 = vrot.slane %v5710_v13, 5  ;;  %v655_v47 = vrot.slane %v653_v38, 4  ;;  %v229_v19 = vld [vmem:[%s5695_s9 + $0xa4] sm:$0x1] }
  0x1a   : > { %v646_v50 = vor.u32 %v645_v42, %v642_v37  ;;  %v5761_v52 = vrot.slane %v836_v27, 4  ;;  %v661_v54 = vrot.slane %v659_v39, 5  ;;  %v4555_v63 = vcombine.low %v5724_v21, %v5727_v24  ;;  %v5490_v24 = vld [vmem:[%s8078_s1 + $0x88] sm:$0xff]  }
  0x1b   : > { %v364_v49 = vsel %vm5741_vm2, %v359_v41, %v363_v25  ;;  %v374_v51 = vsel %vm5741_vm2, %v369_v44, %v373_v31  ;;  %v656_v53 = vor.u32 %v655_v47, %v651_v43  ;;  %v376_v4 = vshrl.u32 %v5772_v61, 16  ;;  %v5493_v41 = vld [vmem:[%s8078_s1 + $0xd0] sm:$0xff]   ;;  %v5496_v42 = vld [vmem:[%s8078_s1 + $0x148] sm:$0xff]  }
  0x1c   : > { %4917 = vmatpush3.bf16.msra.mxu0 %v5478_v14  ;;  %5439 = vmatpush3.bf16.msra.mxu1 %v5478_v14  ;;  %v4559_v55 = vcombine.low %v364_v49, %v374_v51  ;;  %v647_v56 = vrot.slane %v646_v50, 4  ;;  %v379_v5 = vshll.u32 %v5772_v61, 16  ;;  %v385_v8 = vshll.u32 %v5785_v2, 16  ;;  %v5801_v14 = vld [vmem:[%s5695_s9 + $0x9c] sm:$0xf]  ;;  %v5494_v51 = vld [vmem:[%s8078_s1 + $0x90] sm:$0xff]  }
  0x1d   : > { %4918 = vmatprep.subr.bf16.mxu0 %v5479_v17  ;;  %5432 = vmatprep.subr.bf16.mxu1 %v5479_v17  ;;  %v657_v58 = vrot.slane %v656_v53, 4  ;;  %v389_v9 = vshrl.u32 %v5785_v2, 16  ;;  %v395_v10 = vshll.u32 %v5788_v3, 16  ;;  %v378_v16 = vrot.slane %v376_v4, 4 }
  0x1e   : > { %3450 = vmatprep.mubr.bf16.mxu0 %v4559_v55  ;;  %v652_v62 = vsel %vm5741_vm2, %v647_v56, %v651_v43  ;;  %v381_v17 = vrot.slane %v379_v5, 5  ;;  %v387_v20 = vrot.slane %v385_v8, 5  ;;  %v664_v23 = vshrl.u32 %v5801_v14, 16  ;;  %v5495_v56 = vld [vmem:[%s8078_s1 + $0xd8] sm:$0xff]  }
  0x1f   : > { %v662_v6 = vsel %vm5741_vm2, %v657_v58, %v661_v54  ;;  %v391_v21 = vrot.slane %v389_v9, 4  ;;  %v397_v22 = vrot.slane %v395_v10, 5  ;;  %v667_v26 = vshll.u32 %v5801_v14, 16 }
  0x20   : > { %4919 = vmatpush3.bf16.msra.mxu0 %v5480_v34  ;;  %5440 = vmatpush3.bf16.msra.mxu1 %v5480_v34  ;;  %v4571_v15 = vcombine.low %v652_v62, %v662_v6  ;;  %v382_v25 = vor.u32 %v381_v17, %v378_v16  ;;  %v673_v29 = vshll.u32 %v5804_v18, 16  ;;  %v677_v30 = vshrl.u32 %v5804_v18, 16  ;;  %v5845_v62 = vld [vmem:[%s5695_s9 + $0x20] sm:$0x1]  ;;  %v5857_v6 = vld [vmem:[%s5695_s9 + $0xa8] sm:$0xf] }
  0x21   : > { %4920 = vmatprep.subr.bf16.mxu0 %v5481_v40  ;;  %5433 = vmatprep.subr.bf16.mxu1 %v5481_v40  ;;  %v392_v31 = vor.u32 %v391_v21, %v387_v20  ;;  %v666_v32 = vrot.slane %v664_v23, 4  ;;  %v683_v33 = vshll.u32 %v229_v19, 16  ;;  %v669_v36 = vrot.slane %v667_v26, 5  ;;  %v5501_v16 = vld [vmem:[%s8078_s1 + $0xe0] sm:$0xff]  }
  0x22   : > { %3546 = vmatprep.mubr.bf16.mxu1 %v4571_v15  ;;  %v383_v34 = vrot.slane %v382_v25, 4  ;;  %v675_v37 = vrot.slane %v673_v29, 5  ;;  %v679_v38 = vrot.slane %v677_v30, 4  ;;  %v4544_v50 = vcombine.low %v5772_v61, %v5785_v2  ;;  %v232_v15 = vld [vmem:[%s5695_s9 + $0xb0] sm:$0x1] }
  0x23   : > { %v393_v39 = vrot.slane %v392_v31, 4  ;;  %v685_v40 = vrot.slane %v683_v33, 5  ;;  %v670_v44 = vor.u32 %v669_v36, %v666_v32  ;;  %v4556_v58 = vcombine.low %v5801_v14, %v5804_v18  ;;  %v5502_v31 = vld [vmem:[%s8078_s1 + $0xa0] sm:$0xff]  }
  0x24   : > { %4921 = vmatpush3.bf16.msra.mxu0 %v5482_v48  ;;  %5441 = vmatpush3.bf16.msra.mxu1 %v5482_v48  ;;  %v388_v43 = vsel %vm5741_vm2, %v383_v34, %v387_v20  ;;  %v680_v47 = vor.u32 %v679_v38, %v675_v37  ;;  %v419_v14 = vshll.u32 %v5845_v62, 16  ;;  %v688_v19 = vshrl.u32 %v5857_v6, 16 }
  0x25   : > { %5018 = vmatprep.subr.bf16.mxu1 %v5485_v57  ;;  %5130 = vmatprep.subr.bf16.mxu0 %v5486_v60  ;;  %v398_v49 = vsel %vm5741_vm2, %v393_v39, %v397_v22  ;;  %v671_v54 = vrot.slane %v670_v44, 4  ;;  %v5498_v57 = vld [vmem:[%s8078_s1 + $0x108] sm:$0xff]   ;;  %v5842_v60 = vld [vmem:[%s5695_s9 + $0x1c] sm:$0xf]  ;;  %v691_v20 = vshll.u32 %v5857_v6, 16  ;;  %v707_v34 = vshll.u32 %v232_v15, 16 }
  0x26   : > { %v4560_v53 = vcombine.low %v388_v43, %v398_v49  ;;  %v681_v55 = vrot.slane %v680_v47, 4  ;;  %v409_v9 = vshll.u32 %v5842_v60, 16  ;;  %v413_v10 = vshrl.u32 %v5842_v60, 16 }
  0x27   : > { %3451 = vmatmul.mubr.bf16.vlgmr.msra.gmra.mrb[0].mxu0 %v4543_v59  ;;  %3547 = vmatmul.mubr.bf16.vlgmr.msra.gmra.mrb[0].mxu1 %v4555_v63  ;;  %v5839_v59 = vld [vmem:[%s5695_s9 + $0x18] sm:$0xf]  ;;  %v676_v63 = vsel %vm5741_vm2, %v671_v54, %v675_v37  ;;  %v421_v23 = vrot.slane %v419_v14, 5  ;;  %v690_v26 = vrot.slane %v688_v19, 4  ;;  %v693_v29 = vrot.slane %v691_v20, 5 }
  0x28   : > { %5019 = vmatpush3.bf16.msra.mxu1 %v5487_v0  ;;  %5131 = vmatpush3.bf16.msra.mxu0 %v5488_v1  ;;  %v686_v0 = vsel %vm5741_vm2, %v681_v55, %v685_v40  ;;  %v5497_v1 = vld [vmem:[%s8078_s1 + $0x98] sm:$0xff]   ;;  %v400_v4 = vshrl.u32 %v5839_v59, 16  ;;  %v403_v5 = vshll.u32 %v5839_v59, 16  ;;  %v411_v21 = vrot.slane %v409_v9, 5  ;;  %v5893_v54 = vld [vmem:[%s5695_s9 + $0x28] sm:$0xf] }
  0x29   : > { %5020 = vmatprep.subr.bf16.mxu1 %v5489_v7  ;;  %5132 = vmatprep.subr.bf16.mxu0 %v5496_v42  ;;  %v5860_v7 = vld [vmem:[%s5695_s9 + $0xac] sm:$0xf]  ;;  %v4572_v8 = vcombine.low %v676_v63, %v686_v0  ;;  %v415_v22 = vrot.slane %v413_v10, 4  ;;  %v694_v37 = vor.u32 %v693_v29, %v690_v26  ;;  %v709_v40 = vrot.slane %v707_v34, 5  ;;  %v5508_v55 = vld [vmem:[%s8078_s1 + $0x150] sm:$0xff]  }
  0x2a   : > { %3458 = vmatprep.mubr.bf16.mxu0 %v4560_v53  ;;  %v402_v17 = vrot.slane %v400_v4, 4  ;;  %v405_v18 = vrot.slane %v403_v5, 5  ;;  %v701_v30 = vshrl.u32 %v5860_v7, 16  ;;  %v5503_v42 = vld [vmem:[%s8078_s1 + $0xe8] sm:$0xff]   ;;  %v4576_v43 = vrot.slane %v5772_v61, 9 }
  0x2b   : > { %3554 = vmatprep.mubr.bf16.mxu1 %v4572_v8  ;;  %v416_v32 = vor.u32 %v415_v22, %v411_v21  ;;  %v695_v47 = vrot.slane %v694_v37, 4  ;;  %v5890_v53 = vld [vmem:[%s5695_s9 + $0x24] sm:$0xf]  ;;  %v433_v0 = vshll.u32 %v5893_v54, 16  ;;  %v5913_v8 = vld [vmem:[%s5695_s9 + $0xb4] sm:$0xf] }
  0x2c   : > { %5021 = vmatpush3.bf16.msra.mxu1 %v5490_v24  ;;  %5133 = vmatpush3.bf16.msra.mxu0 %v5498_v57  ;;  %v697_v24 = vshll.u32 %v5860_v7, 16  ;;  %v406_v25 = vor.u32 %v405_v18, %v402_v17  ;;  %v703_v38 = vrot.slane %v701_v30, 4  ;;  %v5901_v57 = vld [vmem:[%s5695_s9 + $0x2c] sm:$0x1]  ;;  %v427_v63 = vshll.u32 %v5890_v53, 16  ;;  %v5510_v22 = vld [vmem:[%s8078_s1 + $0x110] sm:$0xff]  }
  0x2d   : > { %5022 = vmatprep.subr.bf16.mxu1 %v5493_v41  ;;  %v417_v39 = vrot.slane %v416_v32, 4  ;;  %v4545_v41 = vcombine.low %v5839_v59, %v5842_v60  ;;  %v5916_v9 = vld [vmem:[%s5695_s9 + $0xb8] sm:$0xf]  ;;  %5134 = vmatprep.subr.bf16.mxu0 %v5508_v55  ;;  %v435_v15 = vrot.slane %v433_v0, 5  ;;  %v235_v17 = vld [vmem:[%s5695_s9 + $0xbc] sm:$0x1] }
  0x2e   : > { %v699_v33 = vrot.slane %v697_v24, 5  ;;  %v407_v36 = vrot.slane %v406_v25, 4  ;;  %v429_v14 = vrot.slane %v427_v63, 5  ;;  %v712_v20 = vshrl.u32 %v5913_v8, 16 }
  0x2f   : > { %3459 = vmatmul.mubr.bf16.gmra.mrb[4].mxu0 %v4544_v50  ;;  %3555 = vmatmul.mubr.bf16.gmra.mrb[4].mxu1 %v4556_v58  ;;  %v4557_v50 = vcombine.low %v5857_v6, %v5860_v7  ;;  %v424_v58 = vshrl.u32 %v5890_v53, 16  ;;  %v437_v7 = vshrl.u32 %v5893_v54, 16  ;;  %v721_v26 = vshll.u32 %v5916_v9, 16 }
  0x30   : > { %5023 = vmatpush3.bf16.msra.mxu1 %v5494_v51  ;;  %v412_v44 = vsel %vm5741_vm2, %v407_v36, %v411_v21  ;;  %v704_v49 = vor.u32 %v703_v38, %v699_v33  ;;  %v5504_v51 = vld [vmem:[%s8078_s1 + $0xa8] sm:$0xff]   ;;  %v700_v5 = vsel %vm5741_vm2, %v695_v47, %v699_v33  ;;  %v715_v21 = vshll.u32 %v5913_v8, 16  ;;  %v5509_v33 = vld [vmem:[%s8078_s1 + $0xb0] sm:$0xff]   ;;  %5135 = vmatpush3.bf16.msra.mxu0 %v5510_v22  ;;  %v5511_v38 = vld [vmem:[%s8078_s1 + $0xf8] sm:$0xff]  }
  0x31   : > { %5024 = vmatprep.subr.bf16.mxu1 %v5495_v56  ;;  %v422_v56 = vsel %vm5741_vm2, %v417_v39, %v421_v23  ;;  %v426_v10 = vrot.slane %v424_v58, 4  ;;  %v439_v19 = vrot.slane %v437_v7, 4  ;;  %v714_v30 = vrot.slane %v712_v20, 4  ;;  %v5515_v58 = vld [vmem:[%s8078_s1 + $0x1c0] sm:$0xff]   ;;  %v5969_v7 = vld [vmem:[%s5695_s9 + $0x38] sm:$0x1] }
  0x32   : > { %v4561_v4 = vcombine.low %v412_v44, %v422_v56  ;;  %v705_v6 = vrot.slane %v704_v49, 4  ;;  %v725_v32 = vshrl.u32 %v5916_v9, 16  ;;  %v723_v36 = vrot.slane %v721_v26, 5  ;;  %v5512_v49 = vld [vmem:[%s8078_s1 + $0xb8] sm:$0xff]   ;;  %v5523_v22 = vld [vmem:[%s8078_s1 + $0x160] sm:$0xff]  }
  0x33   : > { %v430_v24 = vor.u32 %v429_v14, %v426_v10  ;;  %v440_v29 = vor.u32 %v439_v19, %v435_v15  ;;  %v731_v37 = vshll.u32 %v235_v17, 16  ;;  %v5958_v63 = vsel %vm5937_vm5, %v5761_v52, %v839_v46  ;;  %v5517_v46 = vld [vmem:[%s8078_s1 + $0x158] sm:$0xff]   ;;  %v5982_v17 = vld [vmem:[%s5695_s9 + $0xc] sm:$0xf] }
  0x34   : > { %5025 = vmatpush3.bf16.msra.mxu1 %v5497_v1  ;;  %v5507_v1 = vld [vmem:[%s8078_s1 + $0xf0] sm:$0xff]   ;;  %3466 = vmatprep.mubr.bf16.mxu0 %v4561_v4  ;;  %v710_v18 = vsel %vm5741_vm2, %v705_v6, %v709_v40  ;;  %v4558_v52 = vcombine.low %v5913_v8, %v5916_v9  ;;  %v1191_v9 = vshrl.u32 %v5982_v17, 16  ;;  %v843_v12 = vrot.slane %v5785_v2, 5 }
  0x35   : > { %5026 = vmatprep.subr.bf16.mxu1 %v5501_v16  ;;  %v443_v16 = vshll.u32 %v5901_v57, 16  ;;  %v4573_v23 = vcombine.low %v700_v5, %v710_v18  ;;  %v431_v34 = vrot.slane %v430_v24, 4  ;;  %v441_v40 = vrot.slane %v440_v29, 4  ;;  %v5964_v4 = vld [vmem:[%s5695_s9 + $0x34] sm:$0xf]  ;;  %v5518_v18 = vld [vmem:[%s8078_s1 + $0x118] sm:$0xff]   ;;  %5136 = vmatprep.subr.bf16.mxu0 %v5517_v46 }
  0x36   : > { %v733_v47 = vrot.slane %v731_v37, 5  ;;  %v457_v14 = vshll.u32 %v5964_v4, 16  ;;  %v5990_v8 = vld [vmem:[%s5695_s9 + $0x10] sm:$0xf]  ;;  %5137 = vmatpush3.bf16.msra.mxu0 %v5518_v18  ;;  %v837_v37 = vsel %vm5937_vm5, %v4575_v45, %v836_v27 }
  0x37   : > { %3467 = vmatmul.mubr.bf16.gmra.mrb[8].mxu0 %v4545_v41  ;;  %v445_v25 = vrot.slane %v443_v16, 5  ;;  %3562 = vmatprep.mubr.bf16.mxu1 %v4573_v23  ;;  %v436_v44 = vsel %vm5741_vm2, %v431_v34, %v435_v15  ;;  %v461_v15 = vshrl.u32 %v5964_v4, 16  ;;  %v467_v16 = vshll.u32 %v5969_v7, 16 }
  0x38   : > { %5027 = vmatpush3.bf16.msra.mxu1 %v5502_v31  ;;  %v717_v31 = vrot.slane %v715_v21, 5  ;;  %v459_v24 = vrot.slane %v457_v14, 5  ;;  %v1200_v34 = vshll.u32 %v5990_v8, 16  ;;  %5138 = vmatprep.subr.bf16.mxu0 %v5523_v22  ;;  %v4591_v45 = vcombine.low %v837_v37, %v5958_v63  ;;  %v5525_v14 = vld [vmem:[%s8078_s1 + $0x120] sm:$0xff]  }
  0x39   : > { %5028 = vmatprep.subr.bf16.mxu1 %v5503_v42  ;;  %3563 = vmatmul.mubr.bf16.gmra.mrb[8].mxu1 %v4557_v50  ;;  %v727_v42 = vrot.slane %v725_v32, 4  ;;  %v4546_v50 = vcombine.low %v5890_v53, %v5893_v54  ;;  %v469_v26 = vrot.slane %v467_v16, 5  ;;  %v1194_v32 = vshll.u32 %v5982_v17, 16 }
  0x3a   : > { %v718_v41 = vor.u32 %v717_v31, %v714_v30  ;;  %v4655_v30 = vcombine.low %v5982_v17, %v5990_v8  ;;  %v1193_v31 = vrot.slane %v1191_v9, 4  ;;  %5139 = vmatpush3.bf16.msra.mxu0 %v5525_v14  ;;  %v844_v37 = vsel %vm5937_vm5, %v4576_v43, %v843_v12 }
  0x3b   : > { %v728_v56 = vor.u32 %v727_v42, %v723_v36  ;;  %v6007_v42 = vrot.slane %v1200_v34, 5 }
  0x3c   : > { %5029 = vmatpush3.bf16.msra.mxu1 %v5504_v51  ;;  %v446_v51 = vsel %vm5741_vm2, %v441_v40, %v445_v25  ;;  %v719_v55 = vrot.slane %v718_v41, 4  ;;  %v463_v25 = vrot.slane %v461_v15, 4  ;;  %v1196_v40 = vrot.slane %v1194_v32, 5  ;;  %v5526_v32 = vld [vmem:[%s8078_s1 + $0x188] sm:$0xff]  }
  0x3d   : > { %5030 = vmatprep.subr.bf16.mxu1 %v5507_v1  ;;  %v4562_v0 = vcombine.low %v436_v44, %v446_v51  ;;  %v5961_v1 = vld [vmem:[%s5695_s9 + $0x30] sm:$0xf]  ;;  %v729_v6 = vrot.slane %v728_v56, 4  ;;  %v6019_v51 = vld [vmem:[%s5695_s9 + $0x40] sm:$0xf] }
  0x3e   : > { %v724_v5 = vsel %vm5741_vm2, %v719_v55, %v723_v36  ;;  %v448_v13 = vshrl.u32 %v5961_v1, 16  ;;  %v451_v10 = vshll.u32 %v5961_v1, 16  ;;  %v1204_v36 = vshrl.u32 %v5990_v8, 16  ;;  %v6022_v55 = vld [vmem:[%s5695_s9 + $0x44] sm:$0x1] }
  0x3f   : > { %3474 = vmatprep.mubr.bf16.mxu0 %v4562_v0  ;;  %v734_v19 = vsel %vm5741_vm2, %v729_v6, %v733_v47  ;;  %v1197_v47 = vor.u32 %v1196_v40, %v1193_v31  ;;  %v4547_v27 = vcombine.low %v5961_v1, %v5964_v4  ;;  %v6033_v0 = vld [vmem:[%s5695_s9 + $0x18] sm:$0xf]  ;;  %v485_v46 = vshrl.u32 %v6019_v51, 16  ;;  %v6078_v40 = vld [vmem:[%s5695_s9 + $0x24] sm:$0xf] }
  0x40   : > { %5031 = vmatpush3.bf16.msra.mxu1 %v5509_v33  ;;  %3475 = vmatmul.mubr.bf16.gmra.mrb[12].mxu0 %v4546_v50  ;;  %v450_v20 = vrot.slane %v448_v13, 4  ;;  %v453_v21 = vrot.slane %v451_v10, 5  ;;  %v4574_v23 = vcombine.low %v724_v5, %v734_v19  ;;  %v464_v33 = vor.u32 %v463_v25, %v459_v24  ;;  %v5516_v50 = vld [vmem:[%s8078_s1 + $0x180] sm:$0xff]   ;;  %v6036_v5 = vld [vmem:[%s5695_s9 + $0x1c] sm:$0xf]  ;;  %v5524_v25 = vld [vmem:[%s8078_s1 + $0x1c8] sm:$0xff]  }
  0x41   : > { %5032 = vmatprep.subr.bf16.mxu1 %v5511_v38  ;;  %v1206_v44 = vrot.slane %v1204_v36, 4  ;;  %v6038_v13 = vrot.slane %v1197_v47, 4  ;;  %v481_v10 = vshll.u32 %v6019_v51, 16  ;;  %v491_v19 = vshll.u32 %v6022_v55, 16  ;;  %v6334_v31 = vld [vmem:[%s5695_s9 + $0x70] sm:$0xf] }
  0x42   : > { %v454_v29 = vor.u32 %v453_v21, %v450_v20  ;;  %3570 = vmatprep.mubr.bf16.mxu1 %v4574_v23  ;;  %v465_v41 = vrot.slane %v464_v33, 4  ;;  %v6052_v20 = vld [vmem:[%s5695_s9 + $0x4c] sm:$0xf]  ;;  %v487_v9 = vrot.slane %v485_v46, 4  ;;  %v4656_v22 = vcombine.low %v6033_v0, %v6036_v5 }
  0x43   : > { %3571 = vmatmul.mubr.bf16.gmra.mrb[12].mxu1 %v4558_v52  ;;  %v1207_v2 = vor.u32 %v1206_v44, %v6007_v42  ;;  %v6043_v52 = vld [vmem:[%s5695_s9 + $0x48] sm:$0xf]  ;;  %v483_v21 = vrot.slane %v481_v10, 5  ;;  %v1215_v23 = vshrl.u32 %v6033_v0, 16  ;;  %v846_v47 = vrot.slane %v5788_v3, 5 }
  0x44   : > { %5033 = vmatpush3.bf16.msra.mxu1 %v5512_v49  ;;  %v455_v38 = vrot.slane %v454_v29, 4  ;;  %3611 = vmatprep.mubr.bf16.mxu1 %v4655_v30  ;;  %v6016_v49 = vld [vmem:[%s5695_s9 + $0x3c] sm:$0xf]  ;;  %v470_v56 = vsel %vm5741_vm2, %v465_v41, %v469_v26  ;;  %v493_v29 = vrot.slane %v491_v19, 5  ;;  %v1218_v30 = vshll.u32 %v6033_v0, 16  ;;  %v5529_v33 = vld [vmem:[%s8078_s1 + $0x168] sm:$0xff]  }
  0x45   : > { %5242 = vmatprep.subr.bf16.mxu1 %v5515_v58  ;;  %v472_v58 = vshrl.u32 %v6016_v49, 16  ;;  %v475_v63 = vshll.u32 %v6016_v49, 16  ;;  %v6048_v15 = vrot.slane %v1207_v2, 4  ;;  %v488_v34 = vor.u32 %v487_v9, %v483_v21  ;;  %v6081_v41 = vld [vmem:[%s5695_s9 + $0x28] sm:$0xf]  ;;  %5140 = vmatprep.subr.bf16.mxu0 %v5529_v33  ;;  %v5533_v9 = vld [vmem:[%s8078_s1 + $0x1d0] sm:$0xff]  }
  0x46   : > { %v460_v11 = vsel %vm5741_vm2, %v455_v38, %v459_v24  ;;  %v6058_v24 = vld [vmem:[%s5695_s9 + $0x50] sm:$0x1]  ;;  %v4548_v36 = vcombine.low %v6016_v49, %v6019_v51  ;;  %v845_v38 = vrot.slane %v843_v12, 4  ;;  %v5530_v44 = vld [vmem:[%s8078_s1 + $0x128] sm:$0xff]   ;;  %v499_v61 = vshll.u32 %v6043_v52, 16 }
  0x47   : > { %v4563_v6 = vcombine.low %v460_v11, %v470_v56  ;;  %v474_v16 = vrot.slane %v472_v58, 4  ;;  %v477_v18 = vrot.slane %v475_v63, 5  ;;  %v505_v43 = vshll.u32 %v6052_v20, 16  ;;  %5141 = vmatpush3.bf16.msra.mxu0 %v5530_v44  ;;  %v6110_v33 = vld [vmem:[%s5695_s9 + $0x58] sm:$0xf] }
  0x48   : > { %v509_v12 = vshrl.u32 %v6052_v20, 16  ;;  %v515_v56 = vshll.u32 %v6058_v24, 16  ;;  %v847_v3 = vsel %vm5937_vm5, %v845_v38, %v846_v47  ;;  %v501_v58 = vrot.slane %v499_v61, 5  ;;  %v5537_v47 = vld [vmem:[%s8078_s1 + $0x170] sm:$0xff]  }
  0x49   : > { %3482 = vmatprep.mubr.bf16.mxu0 %v4563_v6  ;;  %v478_v26 = vor.u32 %v477_v18, %v474_v16  ;;  %v4592_v6 = vcombine.low %v844_v37, %v847_v3  ;;  %v507_v10 = vrot.slane %v505_v43, 5  ;;  %v4657_v19 = vcombine.low %v6078_v40, %v6081_v41  ;;  %5142 = vmatprep.subr.bf16.mxu0 %v5537_v47 }
  0x4a   : > { %3483 = vmatmul.mubr.bf16.gmra.mrb[16].mxu0 %v4547_v27  ;;  %v496_v27 = vshrl.u32 %v6043_v52, 16  ;;  %v511_v46 = vrot.slane %v509_v12, 4  ;;  %v517_v18 = vrot.slane %v515_v56, 5  ;;  %v4549_v37 = vcombine.low %v6043_v52, %v6052_v20 }
  0x4b   : > { %3612 = vmatmul.mubr.bf16.vlgmr.msra.gmra.mrb[16].mxu1 %v4591_v45  ;;  %v479_v11 = vrot.slane %v478_v26, 4  ;;  %v489_v45 = vrot.slane %v488_v34, 4  ;;  %v4577_v38 = vrot.slane %v5839_v59, 9  ;;  %v850_v44 = vrot.slane %v5842_v60, 5  ;;  %v6129_v59 = vld [vmem:[%s5695_s9 + $0x30] sm:$0xf] }
  0x4c   : > { %5243 = vmatpush3.bf16.msra.mxu1 %v5516_v50  ;;  %3619 = vmatprep.mubr.bf16.mxu1 %v4656_v22  ;;  %v498_v50 = vrot.slane %v496_v27, 4  ;;  %v512_v22 = vor.u32 %v511_v46, %v507_v10  ;;  %v853_v61 = vrot.slane %v5845_v62, 5 }
  0x4d   : > { %5244 = vmatprep.subr.bf16.mxu1 %v5524_v25  ;;  %v484_v2 = vsel %vm5741_vm2, %v479_v11, %v483_v21  ;;  %v494_v63 = vsel %vm5741_vm2, %v489_v45, %v493_v29  ;;  %v6101_v21 = vld [vmem:[%s5695_s9 + $0x54] sm:$0xf]  ;;  %v6120_v11 = vld [vmem:[%s5695_s9 + $0x5c] sm:$0x1]  ;;  %v851_v12 = vsel %vm5937_vm5, %v4577_v38, %v850_v44  ;;  %v852_v56 = vrot.slane %v850_v44, 4  ;;  %v5553_v29 = vld [vmem:[%s8078_s1 + $0x1e8] sm:$0xff]  }
  0x4e   : > { %v4564_v14 = vcombine.low %v484_v2, %v494_v63  ;;  %v502_v16 = vor.u32 %v501_v58, %v498_v50  ;;  %v513_v27 = vrot.slane %v512_v22, 4  ;;  %v520_v45 = vshrl.u32 %v6101_v21, 16  ;;  %v6137_v2 = vld [vmem:[%s5695_s9 + $0x34] sm:$0xf]  ;;  %v6151_v22 = vld [vmem:[%s5695_s9 + $0x60] sm:$0xf] }
  0x4f   : > { %v523_v43 = vshll.u32 %v6101_v21, 16  ;;  %v533_v58 = vshrl.u32 %v6110_v33, 16  ;;  %v5538_v63 = vld [vmem:[%s8078_s1 + $0x130] sm:$0xff]  }
  0x50   : > { %5245 = vmatpush3.bf16.msra.mxu1 %v5526_v32  ;;  %v5534_v32 = vld [vmem:[%s8078_s1 + $0x190] sm:$0xff]   ;;  %3490 = vmatprep.mubr.bf16.mxu0 %v4564_v14  ;;  %v503_v34 = vrot.slane %v502_v16, 4  ;;  %v518_v62 = vsel %vm5741_vm2, %v513_v27, %v517_v18  ;;  %v522_v3 = vrot.slane %v520_v45, 4  ;;  %v539_v14 = vshll.u32 %v6120_v11, 16  ;;  %v6262_v27 = vld [vmem:[%s5695_s9 + $0x80] sm:$0x1] }
  0x51   : > { %5246 = vmatprep.subr.bf16.mxu1 %v5533_v9  ;;  %v525_v50 = vrot.slane %v523_v43, 5  ;;  %v535_v18 = vrot.slane %v533_v58, 4  ;;  %v4658_v9 = vcombine.low %v6129_v59, %v6137_v2  ;;  %5143 = vmatpush3.bf16.msra.mxu0 %v5538_v63  ;;  %v547_v58 = vshll.u32 %v6151_v22, 16 }
  0x52   : > { %3491 = vmatmul.mubr.bf16.gmra.mrb[20].mxu0 %v4548_v36  ;;  %v508_v60 = vsel %vm5741_vm2, %v503_v34, %v507_v10  ;;  %v529_v36 = vshll.u32 %v6110_v33, 16  ;;  %v854_v10 = vsel %vm5937_vm5, %v852_v56, %v853_v61  ;;  %v5541_v34 = vld [vmem:[%s8078_s1 + $0x1d8] sm:$0xff]   ;;  %v541_v38 = vrot.slane %v539_v14, 5  ;;  %v6163_v61 = vld [vmem:[%s5695_s9 + $0x68] sm:$0x1] }
  0x53   : > { %3620 = vmatmul.mubr.bf16.gmra.mrb[20].mxu1 %v4592_v6  ;;  %v4565_v6 = vcombine.low %v508_v60, %v518_v62  ;;  %v4593_v16 = vcombine.low %v851_v12, %v854_v10  ;;  %v4550_v60 = vcombine.low %v6101_v21, %v6110_v33  ;;  %v4578_v12 = vrot.slane %v5890_v53, 9  ;;  %v6169_v56 = vld [vmem:[%s5695_s9 + $0x3c] sm:$0xf] }
  0x54   : > { %3627 = vmatprep.mubr.bf16.mxu1 %v4657_v19  ;;  %5247 = vmatpush3.bf16.msra.mxu1 %v5534_v32  ;;  %v531_v46 = vrot.slane %v529_v36, 5  ;;  %v526_v19 = vor.u32 %v525_v50, %v522_v3  ;;  %v6154_v32 = vld [vmem:[%s5695_s9 + $0x64] sm:$0xf]  ;;  %v6172_v36 = vld [vmem:[%s5695_s9 + $0x40] sm:$0xf]  ;;  %v857_v62 = vrot.slane %v5893_v54, 5 }
  0x55   : > { %3498 = vmatprep.mubr.bf16.mxu0 %v4565_v6  ;;  %5248 = vmatprep.subr.bf16.mxu1 %v5541_v34  ;;  %v860_v3 = vrot.slane %v5901_v57, 5  ;;  %v544_v50 = vshrl.u32 %v6151_v22, 16  ;;  %v553_v53 = vshll.u32 %v6154_v32, 16  ;;  %v557_v10 = vshrl.u32 %v6154_v32, 16  ;;  %v5542_v54 = vld [vmem:[%s8078_s1 + $0x198] sm:$0xff]  }
  0x56   : > { %v527_v45 = vrot.slane %v526_v19, 4  ;;  %v536_v43 = vor.u32 %v535_v18, %v531_v46  ;;  %v858_v57 = vsel %vm5937_vm5, %v4578_v12, %v857_v62  ;;  %v859_v14 = vrot.slane %v857_v62, 4 }
  0x57   : > { %v546_v19 = vrot.slane %v544_v50, 4  ;;  %v555_v18 = vrot.slane %v553_v53, 5  ;;  %v559_v34 = vrot.slane %v557_v10, 4  ;;  %v6202_v10 = vld [vmem:[%s5695_s9 + $0x6c] sm:$0xf] }
  0x58   : > { %v532_v63 = vsel %vm5741_vm2, %v527_v45, %v531_v46  ;;  %v537_v6 = vrot.slane %v536_v43, 4  ;;  %v5543_v46 = vld [vmem:[%s8078_s1 + $0x178] sm:$0xff]   ;;  %v563_v45 = vshll.u32 %v6163_v61, 16  ;;  %5249 = vmatpush3.bf16.msra.mxu1 %v5542_v54  ;;  %v861_v12 = vsel %vm5937_vm5, %v859_v14, %v860_v3  ;;  %v6205_v54 = vld [vmem:[%s5695_s9 + $0x70] sm:$0xf] }
  0x59   : > { %5144 = vmatprep.subr.bf16.mxu0 %v5543_v46  ;;  %v4594_v50 = vcombine.low %v858_v57, %v861_v12  ;;  %v6215_v57 = vld [vmem:[%s5695_s9 + $0x48] sm:$0xf]  ;;  %v6218_v46 = vld [vmem:[%s5695_s9 + $0x4c] sm:$0xf]  ;;  %v571_v48 = vshll.u32 %v6202_v10, 16  ;;  %v577_v14 = vshll.u32 %v6205_v54, 16 }
  0x5a   : > { %3499 = vmatmul.mubr.bf16.gmra.mrb[24].mxu0 %v4549_v37  ;;  %v549_v37 = vrot.slane %v547_v58, 5  ;;  %v560_v58 = vor.u32 %v559_v34, %v555_v18 }
  0x5b   : > { %3628 = vmatmul.mubr.bf16.gmra.mrb[24].mxu1 %v4593_v16  ;;  %v542_v16 = vsel %vm5741_vm2, %v537_v6, %v541_v38  ;;  %v4659_v38 = vcombine.low %v6169_v56, %v6172_v36  ;;  %v565_v6 = vrot.slane %v563_v45, 5  ;;  %v4579_v45 = vrot.slane %v5961_v1, 9 }
  0x5c   : > { %3635 = vmatprep.mubr.bf16.mxu1 %v4658_v9  ;;  %v5544_v9 = vld [vmem:[%s8078_s1 + $0x138] sm:$0xff]   ;;  %v4566_v43 = vcombine.low %v532_v63, %v542_v16  ;;  %v550_v62 = vor.u32 %v549_v37, %v546_v19  ;;  %v4551_v19 = vcombine.low %v6151_v22, %v6154_v32  ;;  %v6212_v37 = vld [vmem:[%s5695_s9 + $0x74] sm:$0x1]  ;;  %v5548_v16 = vld [vmem:[%s8078_s1 + $0x1e0] sm:$0xff]   ;;  %v561_v34 = vrot.slane %v560_v58, 4 }
  0x5d   : > { %5145 = vmatpush3.bf16.msra.mxu0 %v5544_v9  ;;  %v864_v9 = vrot.slane %v5964_v4, 5  ;;  %5250 = vmatprep.subr.bf16.mxu1 %v5548_v16  ;;  %v6234_v58 = vld [vmem:[%s8078_s1 + $0x200] sm:$0xff]   ;;  %v573_v63 = vrot.slane %v571_v48, 5  ;;  %v579_v53 = vrot.slane %v577_v14, 5 }
  0x5e   : > { %3506 = vmatprep.mubr.bf16.mxu0 %v4566_v43  ;;  %v551_v3 = vrot.slane %v550_v62, 4  ;;  %v867_v43 = vrot.slane %v5969_v7, 5  ;;  %v568_v62 = vshrl.u32 %v6202_v10, 16  ;;  %v566_v1 = vsel %vm5741_vm2, %v561_v34, %v565_v6  ;;  %5378 = vmatprep.subr.bf16.mxu0 %v6234_v58 }
  0x5f   : > { %v865_v4 = vsel %vm5937_vm5, %v4579_v45, %v864_v9  ;;  %v866_v7 = vrot.slane %v864_v9, 4  ;;  %v587_v34 = vshll.u32 %v6212_v37, 16  ;;  %v6251_v45 = vld [vmem:[%s5695_s9 + $0x78] sm:$0xf] }
  0x60   : > { %v556_v12 = vsel %vm5741_vm2, %v551_v3, %v555_v18  ;;  %v581_v18 = vshrl.u32 %v6205_v54, 16  ;;  %v570_v16 = vrot.slane %v568_v62, 4  ;;  %v6256_v62 = vld [vmem:[%s5695_s9 + $0x7c] sm:$0xf] }
  0x61   : > { %v4567_v3 = vcombine.low %v556_v12, %v566_v1  ;;  %v589_v1 = vrot.slane %v587_v34, 5  ;;  %v6271_v12 = vld [vmem:[%s5695_s9 + $0x58] sm:$0xf]  ;;  %v595_v34 = vshll.u32 %v6251_v45, 16 }
  0x62   : > { %3507 = vmatmul.mubr.bf16.gmra.mrb[28].mxu0 %v4550_v60  ;;  %v5550_v60 = vld [vmem:[%s8078_s1 + $0x1a0] sm:$0xff]   ;;  %v583_v6 = vrot.slane %v581_v18, 4  ;;  %v574_v14 = vor.u32 %v573_v63, %v570_v16  ;;  %v4552_v18 = vcombine.low %v6202_v10, %v6205_v54  ;;  %v871_v63 = vrot.slane %v6019_v51, 5 }
  0x63   : > { %3636 = vmatmul.mubr.bf16.gmra.mrb[28].mxu1 %v4594_v50  ;;  %v868_v50 = vsel %vm5937_vm5, %v866_v7, %v867_v43  ;;  %3514 = vmatprep.mubr.bf16.mxu0 %v4567_v3  ;;  %v874_v16 = vrot.slane %v6022_v55, 5  ;;  %v601_v7 = vshll.u32 %v6256_v62, 16  ;;  %v605_v55 = vshrl.u32 %v6256_v62, 16 }
  0x64   : > { %3643 = vmatprep.mubr.bf16.mxu1 %v4659_v38  ;;  %v4660_v38 = vcombine.low %v6215_v57, %v6218_v46  ;;  %v4595_v48 = vcombine.low %v865_v4, %v868_v50  ;;  %5251 = vmatpush3.bf16.msra.mxu1 %v5550_v60  ;;  %v584_v43 = vor.u32 %v583_v6, %v579_v53  ;;  %v575_v3 = vrot.slane %v574_v14, 4  ;;  %v6268_v50 = vld [vmem:[%s5695_s9 + $0x54] sm:$0xf] }
  0x65   : > { %v4580_v4 = vrot.slane %v6016_v49, 9  ;;  %v592_v6 = vshrl.u32 %v6251_v45, 16  ;;  %v873_v51 = vrot.slane %v871_v63, 4  ;;  %v597_v47 = vrot.slane %v595_v34, 5  ;;  %5252 = vmatprep.subr.bf16.mxu1 %v5553_v29 }
  0x66   : > { %v585_v60 = vrot.slane %v584_v43, 4  ;;  %v580_v14 = vsel %vm5741_vm2, %v575_v3, %v579_v53  ;;  %v603_v44 = vrot.slane %v601_v7, 5  ;;  %v4581_v29 = vrot.slane %v6043_v52, 9 }
  0x67   : > { %v872_v49 = vsel %vm5937_vm5, %v4580_v4, %v871_v63  ;;  %v594_v9 = vrot.slane %v592_v6, 4  ;;  %v875_v3 = vsel %vm5937_vm5, %v873_v51, %v874_v16  ;;  %v607_v4 = vrot.slane %v605_v55, 4  ;;  %v6308_v55 = vld [vmem:[%s5695_s9 + $0x8c] sm:$0x1]  ;;  %v6325_v16 = vld [vmem:[%s5695_s9 + $0x64] sm:$0xf] }
  0x68   : > { %v590_v43 = vsel %vm5741_vm2, %v585_v60, %v589_v1  ;;  %v4661_v1 = vcombine.low %v6268_v50, %v6271_v12  ;;  %v6293_v60 = vld [vmem:[%s5695_s9 + $0x84] sm:$0xf]  ;;  %v878_v51 = vrot.slane %v6052_v20, 5 }
  0x69   : > { %v4568_v53 = vcombine.low %v580_v14, %v590_v43  ;;  %v598_v63 = vor.u32 %v597_v47, %v594_v9  ;;  %v608_v6 = vor.u32 %v607_v4, %v603_v44  ;;  %v6298_v14 = vld [vmem:[%s5695_s9 + $0x88] sm:$0xf]  ;;  %v5558_v43 = vld [vmem:[%s8078_s1 + $0x1f0] sm:$0xff]   ;;  %v616_v4 = vshrl.u32 %v6293_v60, 16 }
  0x6a   : > { %3515 = vmatmul.mubr.bf16.gmra.mrb[32].mxu0 %v4551_v19  ;;  %v611_v19 = vshll.u32 %v6262_v27, 16  ;;  %v5555_v47 = vld [vmem:[%s8078_s1 + $0x1a8] sm:$0xff]   ;;  %v879_v20 = vsel %vm5937_vm5, %v4581_v29, %v878_v51  ;;  %v880_v34 = vrot.slane %v878_v51, 4  ;;  %v629_v25 = vshrl.u32 %v6298_v14, 16 }
  0x6b   : > { %3644 = vmatmul.mubr.bf16.gmra.mrb[32].mxu1 %v4595_v48  ;;  %v4596_v48 = vcombine.low %v872_v49, %v875_v3  ;;  %3522 = vmatprep.mubr.bf16.mxu0 %v4568_v53  ;;  %v599_v9 = vrot.slane %v598_v63, 4  ;;  %v4553_v49 = vcombine.low %v6251_v45, %v6256_v62  ;;  %v609_v53 = vrot.slane %v608_v6, 4  ;;  %v6317_v63 = vld [vmem:[%s5695_s9 + $0x60] sm:$0xf] }
  0x6c   : > { %3651 = vmatprep.mubr.bf16.mxu1 %v4660_v38  ;;  %v613_v38 = vrot.slane %v611_v19, 5  ;;  %v881_v3 = vrot.slane %v6058_v24, 5  ;;  %v619_v19 = vshll.u32 %v6293_v60, 16  ;;  %5253 = vmatpush3.bf16.msra.mxu1 %v5555_v47  ;;  %v625_v6 = vshll.u32 %v6298_v14, 16  ;;  %v6331_v47 = vld [vmem:[%s5695_s9 + $0x6c] sm:$0xf] }
  0x6d   : > { %v604_v52 = vsel %vm5741_vm2, %v599_v9, %v603_v44  ;;  %5254 = vmatprep.subr.bf16.mxu1 %v5558_v43  ;;  %v618_v7 = vrot.slane %v616_v4, 4  ;;  %v4662_v4 = vcombine.low %v6317_v63, %v6325_v16 }
  0x6e   : > { %v614_v24 = vsel %vm5741_vm2, %v609_v53, %v613_v38  ;;  %v621_v26 = vrot.slane %v619_v19, 5  ;;  %v882_v9 = vsel %vm5937_vm5, %v880_v34, %v881_v3  ;;  %v627_v29 = vrot.slane %v625_v6, 5  ;;  %v6373_v34 = vld [vmem:[%s5695_s9 + $0x7c] sm:$0xf] }
  0x6f   : > { %v4569_v44 = vcombine.low %v604_v52, %v614_v24  ;;  %v635_v38 = vshll.u32 %v6308_v55, 16  ;;  %v4597_v51 = vcombine.low %v879_v20, %v882_v9  ;;  %v631_v53 = vrot.slane %v629_v25, 4  ;;  %v5563_v9 = vld [vmem:[%s8078_s1 + $0x1f8] sm:$0xff]  }
  0x70   : > { %v622_v43 = vor.u32 %v621_v26, %v618_v7  ;;  %v1359_v19 = vshrl.u32 %v6317_v63, 16  ;;  %v4554_v25 = vcombine.low %v6293_v60, %v6298_v14  ;;  %v4582_v26 = vrot.slane %v6101_v21, 9  ;;  %v4609_v7 = vld [vmem:[%s5695_s9 + $0x14] sm:$0x1] }
  0x71   : > { %v885_v20 = vrot.slane %v6110_v33, 5  ;;  %v888_v6 = vrot.slane %v6120_v11, 5  ;;  %v4663_v24 = vcombine.low %v6331_v47, %v6334_v31  ;;  %v4687_v3 = vrot.slane %v5982_v17, 9 }
  0x72   : > { %3523 = vmatmul.mubr.bf16.gmra.mrb[36].mxu0 %v4552_v18  ;;  %v5560_v18 = vld [vmem:[%s8078_s1 + $0x1b0] sm:$0xff]   ;;  %v623_v52 = vrot.slane %v622_v43, 4  ;;  %v892_v43 = vrot.slane %v6154_v32, 5  ;;  %v1203_v32 = vsel %vm5741_vm2, %v6038_v13, %v6007_v42  ;;  %v1420_v13 = vshrl.u32 %v6373_v34, 16 }
  0x73   : > { %3652 = vmatmul.mubr.bf16.gmra.mrb[36].mxu1 %v4596_v48  ;;  %3530 = vmatprep.mubr.bf16.mxu0 %v4569_v44  ;;  %v637_v48 = vrot.slane %v635_v38, 5  ;;  %v886_v33 = vsel %vm5937_vm5, %v4582_v26, %v885_v20  ;;  %v887_v11 = vrot.slane %v885_v20, 4  ;;  %v6370_v44 = vld [vmem:[%s5695_s9 + $0x78] sm:$0xf]  ;;  %v4583_v26 = vrot.slane %v6151_v22, 9 }
  0x74   : > { %3659 = vmatprep.mubr.bf16.mxu1 %v4661_v1  ;;  %v632_v1 = vor.u32 %v631_v53, %v627_v29  ;;  %5255 = vmatpush3.bf16.msra.mxu1 %v5560_v18  ;;  %v628_v21 = vsel %vm5741_vm2, %v623_v52, %v627_v29  ;;  %v1210_v18 = vshll.u32 %v4609_v7, 16  ;;  %v5565_v29 = vld [vmem:[%s8078_s1 + $0x1b8] sm:$0xff]   ;;  %v1675_v53 = vrot.slane %v4609_v7, 5 }
  0x75   : > { %5256 = vmatprep.subr.bf16.mxu1 %v5563_v9  ;;  %v889_v20 = vsel %vm5937_vm5, %v887_v11, %v888_v6  ;;  %v895_v22 = vrot.slane %v6163_v61, 5  ;;  %v1410_v42 = vshll.u32 %v6370_v44, 16 }
  0x76   : > { %v633_v38 = vrot.slane %v632_v1, 4  ;;  %v1672_v1 = vrot.slane %v5990_v8, 5  ;;  %v1212_v9 = vrot.slane %v1210_v18, 5  ;;  %v1679_v18 = vrot.slane %v6036_v5, 5 }
  0x78   : > { %v638_v52 = vsel %vm5741_vm2, %v633_v38, %v637_v48  ;;  %v4598_v48 = vcombine.low %v886_v33, %v889_v20  ;;  %v1673_v8 = vsel %vm5937_vm5, %v4687_v3, %v1672_v1  ;;  %v1674_v7 = vrot.slane %v1672_v1, 4  ;;  %5257 = vmatpush3.bf16.msra.mxu1 %v5565_v29  ;;  %v4612_v3 = vld [vmem:[%s5695_s9 + $0x20] sm:$0x1] }
  0x79   : > { %v4570_v17 = vcombine.low %v628_v21, %v638_v52  ;;  %v4664_v21 = vcombine.low %v6370_v44, %v6373_v34  ;;  %v1407_v38 = vshrl.u32 %v6370_v44, 16  ;;  %v1682_v29 = vrot.slane %v4612_v3, 5  ;;  %v6419_v52 = vld [vmem:[%s5695_s9 + $0x88] sm:$0xf] }
  0x7a   : > { %3531 = vmatmul.mubr.bf16.gmra.mrb[40].mxu0 %v4553_v49  ;;  %v6393_v49 = vsel %vm5937_vm5, %v4583_v26, %v892_v43  ;;  %v1676_v61 = vsel %vm5937_vm5, %v1674_v7, %v1675_v53  ;;  %v4688_v53 = vrot.slane %v6033_v0, 9  ;;  %v4584_v1 = vrot.slane %v6202_v10, 9 }
  0x7b   : > { %3660 = vmatmul.mubr.bf16.gmra.mrb[40].mxu1 %v4597_v51  ;;  %3538 = vmatprep.mubr.bf16.mxu0 %v4570_v17  ;;  %v894_v51 = vrot.slane %v892_v43, 4  ;;  %v4703_v43 = vcombine.low %v1673_v8, %v1676_v61  ;;  %v899_v26 = vrot.slane %v6205_v54, 5  ;;  %v902_v17 = vrot.slane %v6212_v37, 5 }
  0x7c   : > { %3667 = vmatprep.mubr.bf16.mxu1 %v4662_v4  ;;  %v1213_v4 = vsel %vm5741_vm2, %v6048_v15, %v1212_v9  ;;  %v6413_v15 = vld [vmem:[%s5695_s9 + $0x84] sm:$0xf]  ;;  %v1217_v20 = vrot.slane %v1215_v23, 4  ;;  %v1680_v9 = vsel %vm5937_vm5, %v4688_v53, %v1679_v18  ;;  %v1681_v8 = vrot.slane %v1679_v18, 4 }
  0x7d   : > { %v4671_v6 = vcombine.low %v1203_v32, %v1213_v4  ;;  %v896_v33 = vsel %vm5937_vm5, %v894_v51, %v895_v22  ;;  %v1220_v7 = vrot.slane %v1218_v30, 5  ;;  %v1224_v22 = vshll.u32 %v6036_v5, 16 }
  0x7e   : > { %v4599_v11 = vcombine.low %v6393_v49, %v896_v33  ;;  %v4615_v49 = vld [vmem:[%s5695_s9 + $0x2c] sm:$0x1]  ;;  %v6437_v10 = vsel %vm5937_vm5, %v4584_v1, %v899_v26  ;;  %v901_v23 = vrot.slane %v899_v26, 4  ;;  %v8085_v54 = vshrl.u32 %v6036_v5, 16 }
  0x7f   : > { %v1234_v51 = vshll.u32 %v4612_v3, 16  ;;  %v1683_v0 = vsel %vm5937_vm5, %v1681_v8, %v1682_v29  ;;  %v1221_v30 = vor.u32 %v1220_v7, %v1217_v20  ;;  %v1431_v3 = vshrl.u32 %v6413_v15, 16  ;;  %v6464_v8 = vld [vmem:[%s5695_s9 + $0x90] sm:$0xf] }
  0x80   : > { %v1230_v37 = vrot.slane %v8085_v54, 4  ;;  %v4704_v32 = vcombine.low %v1680_v9, %v1683_v0  ;;  %v6450_v5 = vsel %vm5937_vm5, %v901_v23, %v902_v17  ;;  %v1434_v33 = vshll.u32 %v6413_v15, 16  ;;  %v6475_v0 = vld [vmem:[%s5695_s9 + $0x94] sm:$0xf] }
  0x81   : > { %v1236_v4 = vrot.slane %v1234_v51, 5  ;;  %v1222_v61 = vrot.slane %v1221_v30, 4  ;;  %v1444_v53 = vshrl.u32 %v6419_v52, 16  ;;  %v4689_v18 = vrot.slane %v6078_v40, 9  ;;  %v5554_v51 = vld [vmem:[%s8078_s1 + $0x208] sm:$0xff]  }
  0x82   : > { %3539 = vmatmul.mubr.bf16.gmra.mrb[44].mxu0 %v4554_v25  ;;  %v1226_v25 = vrot.slane %v1224_v22, 5  ;;  %v1686_v29 = vrot.slane %v6081_v41, 5  ;;  %v1689_v1 = vrot.slane %v4615_v49, 5  ;;  %v4585_v20 = vrot.slane %v6251_v45, 9 }
  0x83   : > { %3668 = vmatmul.mubr.bf16.gmra.mrb[44].mxu1 %v4598_v48  ;;  %3772 = vmatprep.mubr.bf16.mxu0 %v4703_v43  ;;  %v4665_v48 = vcombine.low %v6413_v15, %v6419_v52  ;;  %v906_v9 = vrot.slane %v6256_v62, 5  ;;  %v909_v23 = vrot.slane %v6262_v27, 5  ;;  %v8086_v54 = vshrl.u32 %v6078_v40, 16 }
  0x84   : > { %3675 = vmatprep.mubr.bf16.mxu1 %v4663_v24  ;;  %v4600_v24 = vcombine.low %v6437_v10, %v6450_v5  ;;  %v1231_v43 = vor.u32 %v1230_v37, %v1226_v25  ;;  %v1227_v26 = vsel %vm5741_vm2, %v1222_v61, %v1226_v25  ;;  %v1687_v7 = vsel %vm5937_vm5, %v4689_v18, %v1686_v29  ;;  %v4618_v61 = vld [vmem:[%s5695_s9 + $0x38] sm:$0x1] }
  0x85   : > { %v1688_v22 = vrot.slane %v1686_v29, 4  ;;  %v1241_v37 = vrot.slane %v8086_v54, 4  ;;  %v6481_v62 = vsel %vm5937_vm5, %v4585_v20, %v906_v9  ;;  %v908_v30 = vrot.slane %v906_v9, 4 }
  0x86   : > { %v1232_v17 = vrot.slane %v1231_v43, 4  ;;  %v8087_v25 = vshll.u32 %v6078_v40, 16  ;;  %v1248_v29 = vshll.u32 %v6081_v41, 16  ;;  %v8088_v54 = vshrl.u32 %v6081_v41, 16 }
  0x87   : > { %v1690_v18 = vsel %vm5937_vm5, %v1688_v22, %v1689_v1  ;;  %v4666_v41 = vcombine.low %v6464_v8, %v6475_v0  ;;  %v4690_v22 = vrot.slane %v6129_v59, 9 }
  0x88   : > { %v1237_v45 = vsel %vm5741_vm2, %v1232_v17, %v1236_v4  ;;  %v1244_v27 = vrot.slane %v8087_v25, 5  ;;  %v1254_v4 = vrot.slane %v8088_v54, 4  ;;  %v4705_v40 = vcombine.low %v1687_v7, %v1690_v18 }
  0x89   : > { %v4672_v43 = vcombine.low %v1227_v26, %v1237_v45  ;;  %v1258_v26 = vshll.u32 %v4615_v49, 16  ;;  %v1250_v17 = vrot.slane %v1248_v29, 5  ;;  %v1458_v49 = vshll.u32 %v6464_v8, 16 }
  0x8a   : > { %3773 = vmatmul.mubr.bf16.vlgmr.msra.gmra.mrb[48].mxu0 %v4671_v6  ;;  %v1245_v6 = vor.u32 %v1244_v27, %v1241_v37  ;;  %v1696_v37 = vrot.slane %v4618_v61, 5  ;;  %v913_v25 = vrot.slane %v6298_v14, 5  ;;  %v916_v27 = vrot.slane %v6308_v55, 5 }
  0x8b   : > { %3676 = vmatmul.mubr.bf16.gmra.mrb[48].mxu1 %v4599_v11  ;;  %5379 = vmatpush3.bf16.msra.mxu0 %v6234_v58  ;;  %v6497_v11 = vsel %vm5937_vm5, %v908_v30, %v909_v23  ;;  %v1455_v58 = vshrl.u32 %v6464_v8, 16  ;;  %v1260_v9 = vrot.slane %v1258_v26, 5  ;;  %v1255_v7 = vor.u32 %v1254_v4, %v1250_v17  ;;  %v6523_v26 = vld [vmem:[%s5695_s9 + $0x9c] sm:$0xf] }
  0x8c   : > { %3683 = vmatprep.mubr.bf16.mxu1 %v4664_v21  ;;  %3780 = vmatprep.mubr.bf16.mxu0 %v4704_v32  ;;  %v4601_v1 = vcombine.low %v6481_v62, %v6497_v11  ;;  %v5559_v21 = vld [vmem:[%s8078_s1 + $0x210] sm:$0xff]   ;;  %v1246_v20 = vrot.slane %v1245_v6, 4  ;;  %v1468_v32 = vshrl.u32 %v6475_v0, 16  ;;  %v1693_v23 = vrot.slane %v6137_v2, 5 }
  0x8d   : > { %5380 = vmatprep.subr.bf16.mxu0 %v5554_v51  ;;  %v4586_v30 = vrot.slane %v6293_v60, 9  ;;  %v1256_v18 = vrot.slane %v1255_v7, 4  ;;  %v8089_v4 = vshrl.u32 %v6129_v59, 16  ;;  %v915_v60 = vrot.slane %v913_v25, 4  ;;  %v5564_v7 = vld [vmem:[%s8078_s1 + $0x218] sm:$0xff]  }
  0x8e   : > { %v1251_v45 = vsel %vm5741_vm2, %v1246_v20, %v1250_v17  ;;  %v6518_v29 = vsel %vm5937_vm5, %v4690_v22, %v1693_v23  ;;  %v1695_v54 = vrot.slane %v1693_v23, 4  ;;  %v8090_v14 = vshll.u32 %v6129_v59, 16  ;;  %v6533_v20 = vld [vmem:[%s5695_s9 + $0xa0] sm:$0xf] }
  0x8f   : > { %5381 = vmatpush3.bf16.msra.mxu0 %v5554_v51  ;;  %v1265_v6 = vrot.slane %v8089_v4, 4  ;;  %v6527_v51 = vsel %vm5937_vm5, %v4586_v30, %v913_v25  ;;  %v1272_v17 = vshll.u32 %v6137_v2, 16  ;;  %v1261_v22 = vsel %vm5741_vm2, %v1256_v18, %v1260_v9  ;;  %v5568_v18 = vld [vmem:[%s8078_s1 + $0x220] sm:$0xff]  }
  0x90   : > { %5382 = vmatprep.subr.bf16.mxu0 %v5559_v21  ;;  %v1268_v55 = vrot.slane %v8090_v14, 5  ;;  %v1697_v59 = vsel %vm5937_vm5, %v1695_v54, %v1696_v37  ;;  %v8091_v23 = vshrl.u32 %v6137_v2, 16  ;;  %v1282_v25 = vshll.u32 %v4618_v61, 16  ;;  %v5589_v14 = vld [vmem:[%s5695_s9 + $0x90] sm:$0xf] }
  0x91   : > { %v4673_v4 = vcombine.low %v1251_v45, %v1261_v22  ;;  %v4706_v10 = vcombine.low %v6518_v29, %v1697_v59  ;;  %v6553_v5 = vsel %vm5937_vm5, %v915_v60, %v916_v27  ;;  %v4691_v54 = vrot.slane %v6169_v56, 9  ;;  %v6584_v45 = vld [vmem:[%s5695_s9 + $0xa8] sm:$0xf] }
  0x92   : > { %3781 = vmatmul.mubr.bf16.gmra.mrb[52].mxu0 %v4672_v43  ;;  %v1278_v30 = vrot.slane %v8091_v23, 4  ;;  %v4621_v43 = vld [vmem:[%s5695_s9 + $0x44] sm:$0x1]  ;;  %v4602_v9 = vcombine.low %v6527_v51, %v6553_v5  ;;  %v1269_v2 = vor.u32 %v1268_v55, %v1265_v6  ;;  %v1284_v61 = vrot.slane %v1282_v25, 5 }
  0x93   : > { %3684 = vmatmul.mubr.bf16.gmra.mrb[52].mxu1 %v4600_v24  ;;  %3788 = vmatprep.mubr.bf16.mxu0 %v4705_v40  ;;  %v1274_v24 = vrot.slane %v1272_v17, 5  ;;  %v1700_v6 = vrot.slane %v6172_v36, 5  ;;  %v1703_v60 = vrot.slane %v4621_v43, 5  ;;  %v4587_v55 = vrot.slane %v5589_v14, 9  ;;  %v5590_v17 = vld [vmem:[%s5695_s9 + $0x94] sm:$0xf] }
  0x94   : > { %3691 = vmatprep.mubr.bf16.mxu1 %v4665_v48  ;;  %v4667_v48 = vcombine.low %v6523_v26, %v6533_v20  ;;  %5383 = vmatpush3.bf16.msra.mxu0 %v5559_v21  ;;  %v1270_v29 = vrot.slane %v1269_v2, 4  ;;  %v920_v22 = vrot.slane %v5590_v17, 5  ;;  %v8092_v59 = vshrl.u32 %v6169_v56, 16 }
  0x95   : > { %v1279_v40 = vor.u32 %v1278_v30, %v1274_v24  ;;  %5384 = vmatprep.subr.bf16.mxu0 %v5564_v7  ;;  %v5571_v30 = vld [vmem:[%s8078_s1 + $0x228] sm:$0xff]   ;;  %v6579_v2 = vsel %vm5937_vm5, %v4691_v54, %v1700_v6  ;;  %v8093_v27 = vshll.u32 %v6169_v56, 16 }
  0x96   : > { %v1289_v23 = vrot.slane %v8092_v59, 4  ;;  %v1275_v25 = vsel %vm5741_vm2, %v1270_v29, %v1274_v24  ;;  %v6590_v59 = vsel %vm5937_vm5, %v4587_v55, %v920_v22  ;;  %v922_v37 = vrot.slane %v920_v22, 4  ;;  %v6594_v29 = vld [vmem:[%s5695_s9 + $0xac] sm:$0xf]  ;;  %v5574_v22 = vld [vmem:[%s8078_s1 + $0x230] sm:$0xff]  }
  0x97   : > { %v1280_v21 = vrot.slane %v1279_v40, 4  ;;  %v1702_v40 = vrot.slane %v1700_v6, 4  ;;  %v1292_v14 = vrot.slane %v8093_v27, 5  ;;  %v1296_v24 = vshll.u32 %v6172_v36, 16 }
  0x98   : > { %5385 = vmatpush3.bf16.msra.mxu0 %v5564_v7  ;;  %v8094_v27 = vshrl.u32 %v6172_v36, 16 }
  0x99   : > { %v1285_v17 = vsel %vm5741_vm2, %v1280_v21, %v1284_v61  ;;  %5386 = vmatprep.subr.bf16.mxu0 %v5568_v18  ;;  %v1704_v7 = vsel %vm5937_vm5, %v1702_v40, %v1703_v60  ;;  %v1293_v61 = vor.u32 %v1292_v14, %v1289_v23  ;;  %v8095_v21 = vrot.slane %v5731_v28, 5  ;;  %v5591_v14 = vld [vmem:[%s5695_s9 + $0x9c] sm:$0xf] }
  0x9a   : > { %3789 = vmatmul.mubr.bf16.gmra.mrb[56].mxu0 %v4673_v4  ;;  %v4674_v56 = vcombine.low %v1275_v25, %v1285_v17  ;;  %v1302_v54 = vrot.slane %v8094_v27, 4  ;;  %v4707_v6 = vcombine.low %v6579_v2, %v1704_v7  ;;  %v1298_v11 = vrot.slane %v1296_v24, 5  ;;  %v4624_v4 = vld [vmem:[%s5695_s9 + $0x50] sm:$0x1]  ;;  %v5592_v24 = vld [vmem:[%s5695_s9 + $0xa0] sm:$0xf] }
  0x9b   : > { %3692 = vmatmul.mubr.bf16.gmra.mrb[56].mxu1 %v4601_v1  ;;  %3796 = vmatprep.mubr.bf16.mxu0 %v4706_v10  ;;  %v6611_v62 = vsel %vm5937_vm5, %v922_v37, %v8095_v21  ;;  %v1306_v1 = vshll.u32 %v4621_v43, 16  ;;  %v1294_v60 = vrot.slane %v1293_v61, 4  ;;  %v1503_v10 = vshrl.u32 %v6584_v45, 16  ;;  %v5593_v61 = vld [vmem:[%s5695_s9 + $0xa4] sm:$0x1] }
  0x9c   : > { %3699 = vmatprep.mubr.bf16.mxu1 %v4666_v41  ;;  %v4603_v36 = vcombine.low %v6590_v59, %v6611_v62  ;;  %v4668_v41 = vcombine.low %v6584_v45, %v6594_v29  ;;  %5387 = vmatpush3.bf16.msra.mxu0 %v5568_v18  ;;  %v1303_v28 = vor.u32 %v1302_v54, %v1298_v11  ;;  %v1506_v37 = vshll.u32 %v6584_v45, 16 }
  0x9d   : > { %v1308_v55 = vrot.slane %v1306_v1, 5  ;;  %5388 = vmatprep.subr.bf16.mxu0 %v5571_v30  ;;  %v1299_v23 = vsel %vm5741_vm2, %v1294_v60, %v1298_v11  ;;  %v4692_v25 = vrot.slane %v6215_v57, 9  ;;  %v1707_v2 = vrot.slane %v6218_v46, 5 }
  0x9e   : > { %v1710_v18 = vrot.slane %v4624_v4, 5  ;;  %v1304_v40 = vrot.slane %v1303_v28, 4  ;;  %v4588_v17 = vrot.slane %v5591_v14, 9  ;;  %v927_v7 = vrot.slane %v5592_v24, 5  ;;  %v5577_v28 = vld [vmem:[%s8078_s1 + $0x238] sm:$0xff]  }
  0x9f   : > { %v930_v27 = vrot.slane %v5593_v61, 5  ;;  %v6633_v54 = vsel %vm5937_vm5, %v4692_v25, %v1707_v2  ;;  %v1709_v21 = vrot.slane %v1707_v2, 4  ;;  %v8096_v11 = vshrl.u32 %v6215_v57, 16  ;;  %v6650_v61 = vld [vmem:[%s5695_s9 + $0xb4] sm:$0xf] }
  0xa0   : > { %v8097_v60 = vshll.u32 %v6215_v57, 16  ;;  %5389 = vmatpush3.bf16.msra.mxu0 %v5571_v30  ;;  %v1309_v14 = vsel %vm5741_vm2, %v1304_v40, %v1308_v55  ;;  %v6646_v24 = vsel %vm5937_vm5, %v4588_v17, %v927_v7  ;;  %v929_v25 = vrot.slane %v927_v7, 4  ;;  %v6653_v57 = vld [vmem:[%s5695_s9 + $0xb8] sm:$0xf] }
  0xa1   : > { %v1313_v1 = vrot.slane %v8096_v11, 4  ;;  %v1320_v2 = vshll.u32 %v6218_v46, 16  ;;  %5390 = vmatprep.subr.bf16.mxu0 %v5574_v22  ;;  %v4675_v30 = vcombine.low %v1299_v23, %v1309_v14  ;;  %v1711_v55 = vsel %vm5937_vm5, %v1709_v21, %v1710_v18 }
  0xa2   : > { %v1316_v43 = vrot.slane %v8097_v60, 5  ;;  %3797 = vmatmul.mubr.bf16.gmra.mrb[60].mxu0 %v4674_v56  ;;  %v8098_v17 = vshrl.u32 %v6218_v46, 16  ;;  %v4708_v11 = vcombine.low %v6633_v54, %v1711_v55  ;;  %v6668_v51 = vsel %vm5937_vm5, %v929_v25, %v930_v27  ;;  %v4627_v56 = vld [vmem:[%s5695_s9 + $0x5c] sm:$0x1]  ;;  %v5594_v25 = vld [vmem:[%s5695_s9 + $0xa8] sm:$0xf] }
  0xa3   : > { %3700 = vmatmul.mubr.bf16.gmra.mrb[60].mxu1 %v4602_v9  ;;  %3804 = vmatprep.mubr.bf16.mxu0 %v4707_v6  ;;  %v1322_v5 = vrot.slane %v1320_v2, 5  ;;  %v1330_v9 = vshll.u32 %v4624_v4, 16  ;;  %v4669_v23 = vcombine.low %v6650_v61, %v6653_v57  ;;  %v4693_v21 = vrot.slane %v6268_v50, 9  ;;  %v5595_v2 = vld [vmem:[%s5695_s9 + $0xac] sm:$0xf] }
  0xa4   : > { %v1317_v40 = vor.u32 %v1316_v43, %v1313_v1  ;;  %v1326_v7 = vrot.slane %v8098_v17, 4  ;;  %3707 = vmatprep.mubr.bf16.mxu1 %v4667_v48  ;;  %v4604_v43 = vcombine.low %v6646_v24, %v6668_v51  ;;  %5391 = vmatpush3.bf16.msra.mxu0 %v5574_v22  ;;  %v1714_v1 = vrot.slane %v6271_v12, 5  ;;  %v4636_v48 = vld [vmem:[%s5695_s9 + $0x80] sm:$0x1] }
  0xa5   : > { %v1332_v18 = vrot.slane %v1330_v9, 5  ;;  %5392 = vmatprep.subr.bf16.mxu0 %v5577_v28  ;;  %v1717_v60 = vrot.slane %v4627_v56, 5  ;;  %v4589_v22 = vrot.slane %v5594_v25, 9  ;;  %v934_v55 = vrot.slane %v5595_v2, 5 }
  0xa6   : > { %v1318_v46 = vrot.slane %v1317_v40, 4  ;;  %v1327_v6 = vor.u32 %v1326_v7, %v1322_v5  ;;  %v5596_v40 = vld [vmem:[%s5695_s9 + $0xb0] sm:$0x1]  ;;  %v1715_v7 = vsel %vm5937_vm5, %v4693_v21, %v1714_v1  ;;  %v1716_v9 = vrot.slane %v1714_v1, 4  ;;  %v6699_v21 = vld [vmem:[%s5695_s9 + $0xc0] sm:$0xf] }
  0xa7   : > { %v937_v17 = vrot.slane %v5596_v40, 5  ;;  %v8100_v4 = vshll.u32 %v6268_v50, 16  ;;  %v6695_v25 = vsel %vm5937_vm5, %v4589_v22, %v934_v55  ;;  %v936_v2 = vrot.slane %v934_v55, 4  ;;  %v6702_v1 = vld [vmem:[%s5695_s9 + $0xc4] sm:$0xf] }
  0xa8   : > { %v1323_v54 = vsel %vm5741_vm2, %v1318_v46, %v1322_v5  ;;  %v1328_v14 = vrot.slane %v1327_v6, 4  ;;  %v8099_v5 = vshrl.u32 %v6268_v50, 16  ;;  %5393 = vmatpush3.bf16.msra.mxu0 %v5577_v28  ;;  %v1344_v40 = vshll.u32 %v6271_v12, 16 }
  0xa9   : > { %v1340_v27 = vrot.slane %v8100_v4, 5  ;;  %v1718_v28 = vsel %vm5937_vm5, %v1716_v9, %v1717_v60  ;;  %v8101_v4 = vshrl.u32 %v6271_v12, 16  ;;  %v6716_v55 = vsel %vm5937_vm5, %v936_v2, %v937_v17 }
  0xaa   : > { %v1337_v46 = vrot.slane %v8099_v5, 4  ;;  %v1333_v6 = vsel %vm5741_vm2, %v1328_v14, %v1332_v18  ;;  %3805 = vmatmul.mubr.bf16.gmra.mrb[64].mxu0 %v4675_v30  ;;  %v4709_v22 = vcombine.low %v1715_v7, %v1718_v28  ;;  %v1346_v59 = vrot.slane %v1344_v40, 5  ;;  %v5598_v40 = vld [vmem:[%s5695_s9 + $0xb8] sm:$0xf] }
  0xab   : > { %3708 = vmatmul.mubr.bf16.gmra.mrb[64].mxu1 %v4603_v36  ;;  %v4676_v50 = vcombine.low %v1323_v54, %v1333_v6  ;;  %v1350_v14 = vrot.slane %v8101_v4, 4  ;;  %3812 = vmatprep.mubr.bf16.mxu0 %v4708_v11  ;;  %v1354_v62 = vshll.u32 %v4627_v56, 16  ;;  %v4630_v36 = vld [vmem:[%s5695_s9 + $0x68] sm:$0x1]  ;;  %v4605_v30 = vcombine.low %v6695_v25, %v6716_v55  ;;  %v5597_v6 = vld [vmem:[%s5695_s9 + $0xb4] sm:$0xf] }
  0xac   : > { %v1341_v18 = vor.u32 %v1340_v27, %v1337_v46  ;;  %3715 = vmatprep.mubr.bf16.mxu1 %v4668_v41  ;;  %v4670_v27 = vcombine.low %v6699_v21, %v6702_v1  ;;  %v4694_v7 = vrot.slane %v6317_v63, 9  ;;  %v1721_v9 = vrot.slane %v6325_v16, 5 }
  0xad   : > { %v1351_v11 = vor.u32 %v1350_v14, %v1346_v59  ;;  %v1356_v54 = vrot.slane %v1354_v62, 5  ;;  %v1724_v5 = vrot.slane %v4630_v36, 5  ;;  %v4590_v2 = vrot.slane %v5597_v6, 9 }
  0xae   : > { %v1342_v12 = vrot.slane %v1341_v18, 4  ;;  %v941_v28 = vrot.slane %v5598_v40, 5  ;;  %v5599_v18 = vld [vmem:[%s5695_s9 + $0xbc] sm:$0x1]  ;;  %v1722_v14 = vsel %vm5937_vm5, %v4694_v7, %v1721_v9  ;;  %v1723_v62 = vrot.slane %v1721_v9, 4 }
  0xaf   : > { %v1352_v46 = vrot.slane %v1351_v11, 4  ;;  %v944_v4 = vrot.slane %v5599_v18, 5  ;;  %v1368_v18 = vshll.u32 %v6325_v16, 16  ;;  %v8106_v25 = vshrl.u32 %v6334_v31, 16 }
  0xb0   : > { %v1347_v56 = vsel %vm5741_vm2, %v1342_v12, %v1346_v59  ;;  %v1361_v59 = vrot.slane %v1359_v19, 4  ;;  %v8102_v12 = vshll.u32 %v6317_v63, 16  ;;  %v6743_v6 = vsel %vm5937_vm5, %v4590_v2, %v941_v28  ;;  %v6755_v2 = vld [vmem:[%s5695_s9 + $0x18] sm:$0xf] }
  0xb1   : > { %v1357_v11 = vsel %vm5741_vm2, %v1352_v46, %v1356_v54  ;;  %v943_v40 = vrot.slane %v941_v28, 4  ;;  %v1725_v63 = vsel %vm5937_vm5, %v1723_v62, %v1724_v5  ;;  %v8103_v54 = vshrl.u32 %v6325_v16, 16  ;;  %v4633_v46 = vld [vmem:[%s5695_s9 + $0x74] sm:$0x1]  ;;  %v6769_v28 = vld [vmem:[%s5695_s9 + $0x1c] sm:$0xf] }
  0xb2   : > { %v1364_v17 = vrot.slane %v8102_v12, 5  ;;  %3813 = vmatmul.mubr.bf16.gmra.mrb[68].mxu0 %v4676_v50  ;;  %v4677_v7 = vcombine.low %v1347_v56, %v1357_v11  ;;  %v4710_v24 = vcombine.low %v1722_v14, %v1725_v63  ;;  %v1378_v50 = vshll.u32 %v4630_v36, 16  ;;  %v6772_v14 = vld [vmem:[%s5695_s9 + $0x20] sm:$0x1] }
  0xb3   : > { %3716 = vmatmul.mubr.bf16.gmra.mrb[68].mxu1 %v4604_v43  ;;  %v1374_v9 = vrot.slane %v8103_v54, 4  ;;  %3820 = vmatprep.mubr.bf16.mxu0 %v4709_v22  ;;  %v6762_v51 = vsel %vm5937_vm5, %v943_v40, %v944_v4  ;;  %v1370_v43 = vrot.slane %v1368_v18, 5  ;;  %v4695_v56 = vrot.slane %v6331_v47, 9 }
  0xb4   : > { %v1365_v19 = vor.u32 %v1364_v17, %v1361_v59  ;;  %3723 = vmatprep.mubr.bf16.mxu1 %v4669_v23  ;;  %v4606_v16 = vcombine.low %v6743_v6, %v6762_v51  ;;  %v1728_v5 = vrot.slane %v6334_v31, 5  ;;  %v1380_v23 = vrot.slane %v1378_v50, 5 }
  0xb5   : > { %v1375_v62 = vor.u32 %v1374_v9, %v1370_v43  ;;  %v1731_v22 = vrot.slane %v4633_v46, 5  ;;  %v2027_v4 = vshrl.u32 %v6755_v2, 16  ;;  %v2030_v11 = vshll.u32 %v6755_v2, 16 }
  0xb6   : > { %v1366_v17 = vrot.slane %v1365_v19, 4  ;;  %v1729_v59 = vsel %vm5937_vm5, %v4695_v56, %v1728_v5  ;;  %v1730_v12 = vrot.slane %v1728_v5, 4  ;;  %v2036_v63 = vshll.u32 %v6769_v28, 16 }
  0xb7   : > { %v1376_v40 = vrot.slane %v1375_v62, 4  ;;  %v2029_v18 = vrot.slane %v2027_v4, 4  ;;  %v2040_v19 = vshrl.u32 %v6769_v28, 16  ;;  %v2032_v9 = vrot.slane %v2030_v11, 5 }
  0xb8   : > { %v1371_v36 = vsel %vm5741_vm2, %v1366_v17, %v1370_v43  ;;  %v1732_v54 = vsel %vm5937_vm5, %v1730_v12, %v1731_v22  ;;  %v2046_v50 = vshll.u32 %v6772_v14, 16  ;;  %v8104_v43 = vshrl.u32 %v6331_v47, 16 }
  0xb9   : > { %v1381_v56 = vsel %vm5741_vm2, %v1376_v40, %v1380_v23  ;;  %v4711_v5 = vcombine.low %v1729_v59, %v1732_v54  ;;  %v2038_v62 = vrot.slane %v2036_v63, 5  ;;  %v2042_v4 = vrot.slane %v2040_v19, 4 }
  0xba   : > { %v1385_v17 = vrot.slane %v8104_v43, 4  ;;  %3821 = vmatmul.mubr.bf16.gmra.mrb[72].mxu0 %v4677_v7  ;;  %v4678_v60 = vcombine.low %v1371_v36, %v1381_v56  ;;  %v2033_v22 = vor.u32 %v2032_v9, %v2029_v18  ;;  %v2048_v12 = vrot.slane %v2046_v50, 5  ;;  %v6802_v7 = vld [vmem:[%s5695_s9 + $0x24] sm:$0xf]  ;;  %v6811_v9 = vld [vmem:[%s5695_s9 + $0x28] sm:$0xf] }
  0xbb   : > { %3724 = vmatmul.mubr.bf16.gmra.mrb[72].mxu1 %v4605_v30  ;;  %v8105_v11 = vshll.u32 %v6331_v47, 16  ;;  %3828 = vmatprep.mubr.bf16.mxu0 %v4710_v24  ;;  %v2043_v23 = vor.u32 %v2042_v4, %v2038_v62  ;;  %v1392_v59 = vshll.u32 %v6334_v31, 16  ;;  %v1398_v55 = vrot.slane %v8106_v25, 4  ;;  %v6819_v4 = vld [vmem:[%s5695_s9 + $0x2c] sm:$0x1] }
  0xbc   : > { %3731 = vmatprep.mubr.bf16.mxu1 %v4670_v27  ;;  %v1402_v30 = vshll.u32 %v4633_v46, 16  ;;  %v2034_v36 = vrot.slane %v2033_v22, 4  ;;  %v4767_v47 = vcombine.low %v6755_v2, %v6769_v28  ;;  %v4696_v18 = vrot.slane %v6370_v44, 9 }
  0xbd   : > { %v1388_v41 = vrot.slane %v8105_v11, 5  ;;  %v2044_v27 = vrot.slane %v2043_v23, 4  ;;  %v1394_v24 = vrot.slane %v1392_v59, 5  ;;  %v1735_v19 = vrot.slane %v6373_v34, 5 }
  0xbe   : > { %v1404_v63 = vrot.slane %v1402_v30, 5  ;;  %v2039_v31 = vsel %vm5741_vm2, %v2034_v36, %v2038_v62  ;;  %v1738_v46 = vrot.slane %v4636_v48, 5  ;;  %v2054_v23 = vshll.u32 %v6802_v7, 16 }
  0xbf   : > { %v1389_v40 = vor.u32 %v1388_v41, %v1385_v17  ;;  %v2051_v41 = vshrl.u32 %v6802_v7, 16  ;;  %v2049_v50 = vsel %vm5741_vm2, %v2044_v27, %v2048_v12  ;;  %v1399_v43 = vor.u32 %v1398_v55, %v1394_v24 }
  0xc0   : > { %v1736_v17 = vsel %vm5937_vm5, %v4696_v18, %v1735_v19  ;;  %v1737_v56 = vrot.slane %v1735_v19, 4  ;;  %v4783_v22 = vcombine.low %v2039_v31, %v2049_v50  ;;  %v2060_v12 = vshll.u32 %v6811_v9, 16  ;;  %v6844_v50 = vld [vmem:[%s5695_s9 + $0x30] sm:$0xf] }
  0xc1   : > { %v1390_v54 = vrot.slane %v1389_v40, 4  ;;  %v2053_v11 = vrot.slane %v2051_v41, 4  ;;  %v1400_v59 = vrot.slane %v1399_v43, 4  ;;  %v2064_v55 = vshrl.u32 %v6811_v9, 16 }
  0xc2   : > { %v1739_v25 = vsel %vm5937_vm5, %v1737_v56, %v1738_v46  ;;  %3829 = vmatmul.mubr.bf16.gmra.mrb[76].mxu0 %v4678_v60  ;;  %v2056_v36 = vrot.slane %v2054_v23, 5  ;;  %v2070_v40 = vshll.u32 %v6819_v4, 16  ;;  %v2518_v18 = vrot.slane %v6819_v4, 5 }
  0xc3   : > { %v1395_v62 = vsel %vm5741_vm2, %v1390_v54, %v1394_v24  ;;  %3732 = vmatmul.mubr.bf16.gmra.mrb[76].mxu1 %v4606_v16  ;;  %v4712_v30 = vcombine.low %v1736_v17, %v1739_v25  ;;  %3836 = vmatprep.mubr.bf16.mxu0 %v4711_v5  ;;  %v1405_v27 = vsel %vm5741_vm2, %v1400_v59, %v1404_v63  ;;  %v2062_v24 = vrot.slane %v2060_v12, 5  ;;  %v4639_v54 = vld [vmem:[%s5695_s9 + $0x8c] sm:$0x1] }
  0xc4   : > { %3933 = vmatprep.mubr.bf16.mxu1 %v4783_v22  ;;  %v2066_v19 = vrot.slane %v2064_v55, 4  ;;  %v1409_v6 = vrot.slane %v1407_v38, 4  ;;  %v4679_v51 = vcombine.low %v1395_v62, %v1405_v27  ;;  %v2057_v16 = vor.u32 %v2056_v36, %v2053_v11  ;;  %v6853_v11 = vld [vmem:[%s5695_s9 + $0x34] sm:$0xf]  ;;  %v6861_v36 = vld [vmem:[%s5695_s9 + $0x38] sm:$0x1] }
  0xc5   : > { %v2072_v60 = vrot.slane %v2070_v40, 5  ;;  %v1412_v31 = vrot.slane %v1410_v42, 5  ;;  %v1416_v5 = vshll.u32 %v6373_v34, 16  ;;  %v1422_v41 = vrot.slane %v1420_v13, 4 }
  0xc6   : > { %v2067_v46 = vor.u32 %v2066_v19, %v2062_v24  ;;  %v1426_v63 = vshll.u32 %v4636_v48, 16  ;;  %v2058_v43 = vrot.slane %v2057_v16, 4  ;;  %v4768_v38 = vcombine.low %v6802_v7, %v6811_v9 }
  0xc7   : > { %v1413_v17 = vor.u32 %v1412_v31, %v1409_v6  ;;  %v4697_v44 = vrot.slane %v6413_v15, 9  ;;  %v1418_v56 = vrot.slane %v1416_v5, 5  ;;  %v1742_v62 = vrot.slane %v6419_v52, 5 }
  0xc8   : > { %v2068_v42 = vrot.slane %v2067_v46, 4  ;;  %v1428_v22 = vrot.slane %v1426_v63, 5  ;;  %v2063_v34 = vsel %vm5741_vm2, %v2058_v43, %v2062_v24  ;;  %v1745_v48 = vrot.slane %v4639_v54, 5 }
  0xc9   : > { %v1414_v13 = vrot.slane %v1413_v17, 4  ;;  %v2075_v23 = vshrl.u32 %v6844_v50, 16  ;;  %v1423_v25 = vor.u32 %v1422_v41, %v1418_v56  ;;  %v1743_v12 = vsel %vm5937_vm5, %v4697_v44, %v1742_v62 }
  0xca   : > { %v2073_v59 = vsel %vm5741_vm2, %v2068_v42, %v2072_v60  ;;  %v1744_v55 = vrot.slane %v1742_v62, 4  ;;  %3837 = vmatmul.mubr.bf16.gmra.mrb[80].mxu0 %v4679_v51  ;;  %v2078_v19 = vshll.u32 %v6844_v50, 16  ;;  %v2084_v60 = vshll.u32 %v6853_v11, 16 }
  0xcb   : > { %3934 = vmatmul.mubr.bf16.vlgmr.msra.gmra.mrb[80].mxu1 %v4767_v47  ;;  %v4784_v40 = vcombine.low %v2063_v34, %v2073_v59  ;;  %v1419_v27 = vsel %vm5741_vm2, %v1414_v13, %v1418_v56  ;;  %v2077_v24 = vrot.slane %v2075_v23, 4  ;;  %3844 = vmatprep.mubr.bf16.mxu0 %v4712_v30  ;;  %v1424_v6 = vrot.slane %v1423_v25, 4 }
  0xcc   : > { %v1746_v16 = vsel %vm5937_vm5, %v1744_v55, %v1745_v48  ;;  %v2088_v51 = vshrl.u32 %v6853_v11, 16  ;;  %v2080_v47 = vrot.slane %v2078_v19, 5  ;;  %v2094_v46 = vshll.u32 %v6861_v36, 16 }
  0xcd   : > { %3941 = vmatprep.mubr.bf16.mxu1 %v4784_v40  ;;  %v4713_v31 = vcombine.low %v1743_v12, %v1746_v16  ;;  %v1433_v5 = vrot.slane %v1431_v3, 4  ;;  %v1429_v30 = vsel %vm5741_vm2, %v1424_v6, %v1428_v22  ;;  %v2086_v41 = vrot.slane %v2084_v60, 5  ;;  %v4642_v3 = vld [vmem:[%s5695_s9 + $0x98] sm:$0x1]  ;;  %v6885_v22 = vld [vmem:[%s5695_s9 + $0x3c] sm:$0xf] }
  0xce   : > { %v2090_v63 = vrot.slane %v2088_v51, 4  ;;  %v1436_v43 = vrot.slane %v1434_v33, 5  ;;  %v4680_v17 = vcombine.low %v1419_v27, %v1429_v30  ;;  %v2081_v44 = vor.u32 %v2080_v47, %v2077_v24  ;;  %v6894_v27 = vld [vmem:[%s5695_s9 + $0x40] sm:$0xf]  ;;  %v6897_v24 = vld [vmem:[%s5695_s9 + $0x44] sm:$0x1] }
  0xcf   : > { %v2096_v42 = vrot.slane %v2094_v46, 5  ;;  %v1440_v56 = vshll.u32 %v6419_v52, 16  ;;  %v1446_v13 = vrot.slane %v1444_v53, 4  ;;  %v1450_v48 = vshll.u32 %v4639_v54, 16 }
  0xd0   : > { %v2091_v62 = vor.u32 %v2090_v63, %v2086_v41  ;;  %v1437_v34 = vor.u32 %v1436_v43, %v1433_v5  ;;  %v2082_v23 = vrot.slane %v2081_v44, 4  ;;  %v4769_v15 = vcombine.low %v6844_v50, %v6853_v11 }
  0xd1   : > { %v1442_v59 = vrot.slane %v1440_v56, 5  ;;  %v4698_v33 = vrot.slane %v6464_v8, 9  ;;  %v1452_v55 = vrot.slane %v1450_v48, 5  ;;  %v1749_v40 = vrot.slane %v6475_v0, 5  ;;  %v6917_v48 = vld [vmem:[%s5695_s9 + $0xa4] sm:$0x1] }
  0xd2   : > { %v2092_v25 = vrot.slane %v2091_v62, 4  ;;  %v1438_v12 = vrot.slane %v1437_v34, 4  ;;  %3845 = vmatmul.mubr.bf16.gmra.mrb[84].mxu0 %v4680_v17  ;;  %v2087_v52 = vsel %vm5741_vm2, %v2082_v23, %v2086_v41  ;;  %v1752_v54 = vrot.slane %v4642_v3, 5 }
  0xd3   : > { %3942 = vmatmul.mubr.bf16.gmra.mrb[84].mxu1 %v4768_v38  ;;  %v1447_v53 = vor.u32 %v1446_v13, %v1442_v59  ;;  %v2099_v19 = vshrl.u32 %v6885_v22, 16  ;;  %3852 = vmatprep.mubr.bf16.mxu0 %v4713_v31  ;;  %v1750_v38 = vsel %vm5937_vm5, %v4698_v33, %v1749_v40  ;;  %v1751_v60 = vrot.slane %v1749_v40, 4 }
  0xd4   : > { %v2097_v6 = vsel %vm5741_vm2, %v2092_v25, %v2096_v42  ;;  %v1443_v16 = vsel %vm5741_vm2, %v1438_v12, %v1442_v59  ;;  %v2102_v5 = vshll.u32 %v6885_v22, 16  ;;  %v2108_v31 = vshll.u32 %v6894_v27, 16  ;;  %v6925_v12 = vld [vmem:[%s5695_s9 + $0x48] sm:$0xf] }
  0xd5   : > { %v4785_v51 = vcombine.low %v2087_v52, %v2097_v6  ;;  %v1448_v47 = vrot.slane %v1447_v53, 4  ;;  %v2101_v46 = vrot.slane %v2099_v19, 4  ;;  %v1753_v30 = vsel %vm5937_vm5, %v1751_v60, %v1752_v54  ;;  %v6933_v6 = vld [vmem:[%s5695_s9 + $0x4c] sm:$0xf] }
  0xd6   : > { %v2112_v41 = vshrl.u32 %v6894_v27, 16  ;;  %v2118_v63 = vshll.u32 %v6897_v24, 16  ;;  %v4714_v17 = vcombine.low %v1750_v38, %v1753_v30  ;;  %v2104_v44 = vrot.slane %v2102_v5, 5 }
  0xd7   : > { %3949 = vmatprep.mubr.bf16.mxu1 %v4785_v51  ;;  %v1453_v43 = vsel %vm5741_vm2, %v1448_v47, %v1452_v55  ;;  %v1457_v42 = vrot.slane %v1455_v58, 4  ;;  %v2110_v62 = vrot.slane %v2108_v31, 5  ;;  %v1460_v59 = vrot.slane %v1458_v49, 5  ;;  %v6941_v51 = vld [vmem:[%s5695_s9 + $0x50] sm:$0x1] }
  0xd8   : > { %v4681_v56 = vcombine.low %v1443_v16, %v1453_v43  ;;  %v2114_v34 = vrot.slane %v2112_v41, 4  ;;  %v2120_v13 = vrot.slane %v2118_v63, 5  ;;  %v2105_v23 = vor.u32 %v2104_v44, %v2101_v46 }
  0xd9   : > { %v1464_v33 = vshll.u32 %v6475_v0, 16  ;;  %v1470_v25 = vrot.slane %v1468_v32, 4  ;;  %v1474_v58 = vshll.u32 %v4642_v3, 16  ;;  %v4770_v40 = vcombine.low %v6885_v22, %v6894_v27 }
  0xda   : > { %v2115_v55 = vor.u32 %v2114_v34, %v2110_v62  ;;  %v4699_v52 = vrot.slane %v6523_v26, 9  ;;  %3853 = vmatmul.mubr.bf16.gmra.mrb[88].mxu0 %v4681_v56  ;;  %v2106_v8 = vrot.slane %v2105_v23, 4  ;;  %v1461_v49 = vor.u32 %v1460_v59, %v1457_v42 }
  0xdb   : > { %3950 = vmatmul.mubr.bf16.gmra.mrb[88].mxu1 %v4769_v15  ;;  %v1466_v53 = vrot.slane %v1464_v33, 5  ;;  %v1756_v54 = vrot.slane %v6533_v20, 5  ;;  %3860 = vmatprep.mubr.bf16.mxu0 %v4714_v17  ;;  %v1476_v32 = vrot.slane %v1474_v58, 5  ;;  %v1759_v19 = vrot.slane %v6917_v48, 5 }
  0xdc   : > { %v2116_v0 = vrot.slane %v2115_v55, 4  ;;  %v2123_v3 = vshrl.u32 %v6925_v12, 16  ;;  %v2111_v16 = vsel %vm5741_vm2, %v2106_v8, %v2110_v62  ;;  %v1462_v38 = vrot.slane %v1461_v49, 4 }
  0xdd   : > { %v1471_v60 = vor.u32 %v1470_v25, %v1466_v53  ;;  %v1757_v15 = vsel %vm5937_vm5, %v4699_v52, %v1756_v54  ;;  %v1758_v46 = vrot.slane %v1756_v54, 4  ;;  %v2126_v30 = vshll.u32 %v6925_v12, 16  ;;  %v4648_v52 = vld [vmem:[%s5695_s9 + $0xb0] sm:$0x1] }
  0xde   : > { %v2121_v47 = vsel %vm5741_vm2, %v2116_v0, %v2120_v13  ;;  %v2125_v5 = vrot.slane %v2123_v3, 4  ;;  %v1467_v41 = vsel %vm5741_vm2, %v1462_v38, %v1466_v53  ;;  %v2132_v43 = vshll.u32 %v6933_v6, 16 }
  0xdf   : > { %v4786_v31 = vcombine.low %v2111_v16, %v2121_v47  ;;  %v1472_v63 = vrot.slane %v1471_v60, 4  ;;  %v1760_v17 = vsel %vm5937_vm5, %v1758_v46, %v1759_v19  ;;  %v2128_v44 = vrot.slane %v2126_v30, 5  ;;  %v6965_v19 = vld [vmem:[%s5695_s9 + $0x54] sm:$0xf]  ;;  %v6972_v47 = vld [vmem:[%s5695_s9 + $0x58] sm:$0xf] }
  0xe0   : > { %v2136_v42 = vshrl.u32 %v6933_v6, 16  ;;  %v2142_v56 = vshll.u32 %v6941_v51, 16  ;;  %v4715_v34 = vcombine.low %v1757_v15, %v1760_v17  ;;  %v2134_v13 = vrot.slane %v2132_v43, 5 }
  0xe1   : > { %3957 = vmatprep.mubr.bf16.mxu1 %v4786_v31  ;;  %v1477_v62 = vsel %vm5741_vm2, %v1472_v63, %v1476_v32  ;;  %v8107_v23 = vshrl.u32 %v6523_v26, 16  ;;  %v2129_v25 = vor.u32 %v2128_v44, %v2125_v5  ;;  %v8108_v8 = vshll.u32 %v6523_v26, 16  ;;  %v6982_v44 = vld [vmem:[%s5695_s9 + $0x5c] sm:$0x1] }
  0xe2   : > { %v4682_v33 = vcombine.low %v1467_v41, %v1477_v62  ;;  %v2138_v55 = vrot.slane %v2136_v42, 4  ;;  %v2144_v58 = vrot.slane %v2142_v56, 5  ;;  %v1488_v53 = vshll.u32 %v6533_v20, 16 }
  0xe3   : > { %v1481_v59 = vrot.slane %v8107_v23, 4  ;;  %3958 = vmatmul.mubr.bf16.gmra.mrb[92].mxu1 %v4770_v40  ;;  %v1484_v49 = vrot.slane %v8108_v8, 5  ;;  %v8109_v54 = vshrl.u32 %v6533_v20, 16  ;;  %v1498_v32 = vshll.u32 %v6917_v48, 16 }
  0xe4   : > { %3861 = vmatmul.mubr.bf16.gmra.mrb[92].mxu0 %v4682_v33  ;;  %v2130_v3 = vrot.slane %v2129_v25, 4  ;;  %v2139_v16 = vor.u32 %v2138_v55, %v2134_v13  ;;  %v4771_v38 = vcombine.low %v6925_v12, %v6933_v6  ;;  %v4700_v40 = vrot.slane %v6584_v45, 9 }
  0xe5   : > { %v1494_v0 = vrot.slane %v8109_v54, 4  ;;  %3868 = vmatprep.mubr.bf16.mxu0 %v4715_v34  ;;  %v1485_v26 = vor.u32 %v1484_v49, %v1481_v59  ;;  %v1490_v60 = vrot.slane %v1488_v53, 5  ;;  %v1500_v15 = vrot.slane %v1498_v32, 5 }
  0xe6   : > { %v1763_v20 = vrot.slane %v6594_v29, 5  ;;  %v2135_v48 = vsel %vm5741_vm2, %v2130_v3, %v2134_v13  ;;  %v2140_v46 = vrot.slane %v2139_v16, 4  ;;  %v1766_v5 = vrot.slane %v4648_v52, 5 }
  0xe7   : > { %v2147_v30 = vshrl.u32 %v6965_v19, 16  ;;  %v1486_v31 = vrot.slane %v1485_v26, 4  ;;  %v1495_v41 = vor.u32 %v1494_v0, %v1490_v60  ;;  %v2150_v56 = vshll.u32 %v6965_v19, 16 }
  0xe8   : > { %v1764_v63 = vsel %vm5937_vm5, %v4700_v40, %v1763_v20  ;;  %v1765_v43 = vrot.slane %v1763_v20, 4  ;;  %v2145_v17 = vsel %vm5741_vm2, %v2140_v46, %v2144_v58  ;;  %v2156_v62 = vshll.u32 %v6972_v47, 16  ;;  %v7007_v46 = vld [vmem:[%s5695_s9 + $0x60] sm:$0xf] }
  0xe9   : > { %v2149_v42 = vrot.slane %v2147_v30, 4  ;;  %v4787_v34 = vcombine.low %v2135_v48, %v2145_v17  ;;  %v1491_v13 = vsel %vm5741_vm2, %v1486_v31, %v1490_v60  ;;  %v1496_v23 = vrot.slane %v1495_v41, 4  ;;  %v7002_v48 = vld [vmem:[%s5695_s9 + $0xbc] sm:$0x1] }
  0xea   : > { %v1767_v59 = vsel %vm5937_vm5, %v1765_v43, %v1766_v5  ;;  %v2152_v25 = vrot.slane %v2150_v56, 5  ;;  %v2158_v55 = vrot.slane %v2156_v62, 5  ;;  %v2160_v58 = vshrl.u32 %v6972_v47, 16 }
  0xeb   : > { %v4716_v33 = vcombine.low %v1764_v63, %v1767_v59  ;;  %3965 = vmatprep.mubr.bf16.mxu1 %v4787_v34  ;;  %v1501_v8 = vsel %vm5741_vm2, %v1496_v23, %v1500_v15  ;;  %v2166_v49 = vshll.u32 %v6982_v44, 16  ;;  %v1505_v53 = vrot.slane %v1503_v10, 4  ;;  %v7025_v59 = vld [vmem:[%s5695_s9 + $0x68] sm:$0x1] }
  0xec   : > { %v1508_v54 = vrot.slane %v1506_v37, 5  ;;  %v4683_v0 = vcombine.low %v1491_v13, %v1501_v8  ;;  %3966 = vmatmul.mubr.bf16.gmra.mrb[96].mxu1 %v4771_v38  ;;  %v2153_v32 = vor.u32 %v2152_v25, %v2149_v42  ;;  %v2162_v3 = vrot.slane %v2160_v58, 4 }
  0xed   : > { %v1512_v16 = vshll.u32 %v6594_v29, 16  ;;  %v2168_v40 = vrot.slane %v2166_v49, 5  ;;  %v8110_v60 = vshrl.u32 %v6594_v29, 16  ;;  %v1522_v20 = vshll.u32 %v4648_v52, 16  ;;  %v7012_v52 = vld [vmem:[%s5695_s9 + $0x64] sm:$0xf] }
  0xee   : > { %v1509_v26 = vor.u32 %v1508_v54, %v1505_v53  ;;  %3869 = vmatmul.mubr.bf16.gmra.mrb[96].mxu0 %v4683_v0  ;;  %v2154_v10 = vrot.slane %v2153_v32, 4  ;;  %v2163_v45 = vor.u32 %v2162_v3, %v2158_v55  ;;  %v4772_v38 = vcombine.low %v6965_v19, %v6972_v47 }
  0xef   : > { %v1518_v15 = vrot.slane %v8110_v60, 4  ;;  %v1514_v37 = vrot.slane %v1512_v16, 5  ;;  %3876 = vmatprep.mubr.bf16.mxu0 %v4716_v33  ;;  %v1524_v30 = vrot.slane %v1522_v20, 5  ;;  %v4701_v31 = vrot.slane %v6650_v61, 9 }
  0xf0   : > { %v1510_v5 = vrot.slane %v1509_v26, 4  ;;  %v1770_v29 = vrot.slane %v6653_v57, 5  ;;  %v2159_v41 = vsel %vm5741_vm2, %v2154_v10, %v2158_v55  ;;  %v2164_v63 = vrot.slane %v2163_v45, 4 }
  0xf1   : > { %v1519_v43 = vor.u32 %v1518_v15, %v1514_v37  ;;  %v1773_v17 = vrot.slane %v7002_v48, 5  ;;  %v2171_v34 = vshrl.u32 %v7007_v46, 16  ;;  %v2174_v33 = vshll.u32 %v7007_v46, 16 }
  0xf2   : > { %v1515_v42 = vsel %vm5741_vm2, %v1510_v5, %v1514_v37  ;;  %v1771_v56 = vsel %vm5937_vm5, %v4701_v31, %v1770_v29  ;;  %v1772_v62 = vrot.slane %v1770_v29, 4  ;;  %v2169_v13 = vsel %vm5741_vm2, %v2164_v63, %v2168_v40 }
  0xf3   : > { %v1520_v23 = vrot.slane %v1519_v43, 4  ;;  %v2180_v25 = vshll.u32 %v7012_v52, 16  ;;  %v4788_v55 = vcombine.low %v2159_v41, %v2169_v13  ;;  %v2173_v8 = vrot.slane %v2171_v34, 4 }
  0xf4   : > { %v1774_v58 = vsel %vm5937_vm5, %v1772_v62, %v1773_v17  ;;  %v2184_v49 = vshrl.u32 %v7012_v52, 16  ;;  %v2176_v0 = vrot.slane %v2174_v33, 5  ;;  %v2190_v40 = vshll.u32 %v7025_v59, 16  ;;  %v7048_v33 = vld [vmem:[%s5695_s9 + $0xc8] sm:$0x1] }
  0xf5   : > { %v1525_v53 = vsel %vm5741_vm2, %v1520_v23, %v1524_v30  ;;  %v4717_v54 = vcombine.low %v1771_v56, %v1774_v58  ;;  %v2182_v32 = vrot.slane %v2180_v25, 5  ;;  %3973 = vmatprep.mubr.bf16.mxu1 %v4788_v55  ;;  %v8111_v26 = vshrl.u32 %v6650_v61, 16 }
  0xf6   : > { %v4684_v3 = vcombine.low %v1515_v42, %v1525_v53  ;;  %v2186_v16 = vrot.slane %v2184_v49, 4  ;;  %3974 = vmatmul.mubr.bf16.gmra.mrb[100].mxu1 %v4772_v38  ;;  %v2177_v10 = vor.u32 %v2176_v0, %v2173_v8  ;;  %v8112_v45 = vshll.u32 %v6650_v61, 16  ;;  %v7055_v8 = vld [vmem:[%s5695_s9 + $0x6c] sm:$0xf] }
  0xf7   : > { %v1529_v60 = vrot.slane %v8111_v26, 4  ;;  %v1536_v5 = vshll.u32 %v6653_v57, 16  ;;  %v8113_v30 = vshrl.u32 %v6653_v57, 16  ;;  %v2192_v43 = vrot.slane %v2190_v40, 5 }
  0xf8   : > { %v1532_v37 = vrot.slane %v8112_v45, 5  ;;  %3877 = vmatmul.mubr.bf16.gmra.mrb[100].mxu0 %v4684_v3  ;;  %v2187_v63 = vor.u32 %v2186_v16, %v2182_v32  ;;  %v1546_v17 = vshll.u32 %v7002_v48, 16  ;;  %v4773_v38 = vcombine.low %v7007_v46, %v7012_v52  ;;  %v7062_v3 = vld [vmem:[%s5695_s9 + $0x70] sm:$0xf] }
  0xf9   : > { %v1542_v31 = vrot.slane %v8113_v30, 4  ;;  %3884 = vmatprep.mubr.bf16.mxu0 %v4717_v54  ;;  %v2178_v56 = vrot.slane %v2177_v10, 4  ;;  %v1538_v57 = vrot.slane %v1536_v5, 5  ;;  %v4702_v40 = vrot.slane %v6699_v21, 9 }
  0xfa   : > { %v4922_v15 = vpop.f32.mrb[0].mxu0  ;;  %v4994_v20 = vpop.f32.mrb[0].mxu1  ;;  %v1533_v62 = vor.u32 %v1532_v37, %v1529_v60  ;;  %v2188_v25 = vrot.slane %v2187_v63, 4  ;;  %v1548_v48 = vrot.slane %v1546_v17, 5  ;;  %v1777_v26 = vrot.slane %v6702_v1, 5 }
  0xfb   : > { %v4923_v29 = vpop.f32.mrb[1].mxu0  ;;  %v4995_v41 = vpop.f32.mrb[1].mxu1  ;;  %v2183_v49 = vsel %vm5741_vm2, %v2178_v56, %v2182_v32  ;;  %v1543_v54 = vor.u32 %v1542_v31, %v1538_v57  ;;  %v1780_v60 = vrot.slane %v7048_v33, 5  ;;  %v2195_v45 = vshrl.u32 %v7055_v8, 16 }
  0xfc   : > { %v4925_v42 = vpop.f32.mrb[2].mxu0  ;;  %v4997_v61 = vpop.f32.mrb[2].mxu1  ;;  %v7045_v34 = vadd.f32 %v4923_v29, %v4922_v15  ;;  %v7050_v55 = vadd.f32 %v4995_v41, %v4994_v20  ;;  %v1534_v53 = vrot.slane %v1533_v62, 4  ;;  %v2193_v16 = vsel %vm5741_vm2, %v2188_v25, %v2192_v43  ;;  %v7070_v15 = vld [vmem:[%s5695_s9 + $0x74] sm:$0x1] }
  0xfd   : > { %v4926_v13 = vpop.f32.mrb[3].mxu0  ;;  %v4998_v23 = vpop.f32.mrb[3].mxu1  ;;  %v4789_v20 = vcombine.low %v2183_v49, %v2193_v16  ;;  %v1544_v10 = vrot.slane %v1543_v54, 4  ;;  %v1778_v37 = vsel %vm5937_vm5, %v4702_v40, %v1777_v26  ;;  %v1779_v5 = vrot.slane %v1777_v26, 4 }
  0xfe   : > { %v7052_v58 = vadd.f32 %v4926_v13, %v4925_v42  ;;  %v7059_v0 = vadd.f32 %v4998_v23, %v4997_v61  ;;  %v1539_v32 = vsel %vm5741_vm2, %v1534_v53, %v1538_v57  ;;  %v2198_v30 = vshll.u32 %v7055_v8, 16 }
  0xff   : > { %v2204_v31 = vshll.u32 %v7062_v3, 16  ;;  %3981 = vmatprep.mubr.bf16.mxu1 %v4789_v20  ;;  %v1549_v41 = vsel %vm5741_vm2, %v1544_v10, %v1548_v48  ;;  %v2197_v63 = vrot.slane %v2195_v45, 4  ;;  %v2208_v43 = vshrl.u32 %v7062_v3, 16 }
 0x100   : > { %v2214_v17 = vshll.u32 %v7070_v15, 16  ;;  %v4685_v61 = vcombine.low %v1539_v32, %v1549_v41  ;;  %3982 = vmatmul.mubr.bf16.gmra.mrb[104].mxu1 %v4773_v38  ;;  %v1781_v56 = vsel %vm5937_vm5, %v1779_v5, %v1780_v60  ;;  %v2200_v62 = vrot.slane %v2198_v30, 5 }
 0x101   : > { %v2206_v57 = vrot.slane %v2204_v31, 5  ;;  %v4718_v23 = vcombine.low %v1778_v37, %v1781_v56  ;;  %v2210_v25 = vrot.slane %v2208_v43, 4  ;;  %v8114_v53 = vshrl.u32 %v6699_v21, 16 }
 0x102   : > { %v4928_v29 = vpop.f32.mrb[4].mxu0  ;;  %v2216_v49 = vrot.slane %v2214_v17, 5  ;;  %v5000_v54 = vpop.f32.mrb[4].mxu1  ;;  %3885 = vmatmul.mubr.bf16.gmra.mrb[104].mxu0 %v4685_v61  ;;  %v2201_v40 = vor.u32 %v2200_v62, %v2197_v63  ;;  %v8115_v26 = vshll.u32 %v6699_v21, 16  ;;  %v1560_v60 = vshll.u32 %v6702_v1, 16 }
 0x103   : > { %v4929_v42 = vpop.f32.mrb[5].mxu0  ;;  %v1553_v48 = vrot.slane %v8114_v53, 4  ;;  %v8116_v20 = vshrl.u32 %v6702_v1, 16  ;;  %v5001_v10 = vpop.f32.mrb[5].mxu1  ;;  %3892 = vmatprep.mubr.bf16.mxu0 %v4718_v23  ;;  %v2211_v45 = vor.u32 %v2210_v25, %v2206_v57  ;;  %v1570_v37 = vshll.u32 %v7048_v33, 16 }
 0x104   : > { %v4931_v13 = vpop.f32.mrb[6].mxu0  ;;  %v1556_v38 = vrot.slane %v8115_v26, 5  ;;  %v4774_v5 = vcombine.low %v7055_v8, %v7062_v3  ;;  %v7095_v30 = vadd.f32 %v4929_v42, %v4928_v29  ;;  %v5003_v31 = vpop.f32.mrb[6].mxu1  ;;  %v7098_v21 = vld [vmem:[%s5695_s9 + $0x78] sm:$0xf]  ;;  %v2202_v41 = vrot.slane %v2201_v40, 4 }
 0x105   : > { %v4932_v16 = vpop.f32.mrb[7].mxu0  ;;  %v1566_v32 = vrot.slane %v8116_v20, 4  ;;  %v1562_v43 = vrot.slane %v1560_v60, 5  ;;  %v7100_v17 = vadd.f32 %v5001_v10, %v5000_v54  ;;  %v5004_v1 = vpop.f32.mrb[7].mxu1  ;;  %v7103_v61 = vld [vmem:[%s5695_s9 + $0x7c] sm:$0xf] }
 0x106   : > { %v1557_v63 = vor.u32 %v1556_v38, %v1553_v48  ;;  %v2212_v56 = vrot.slane %v2211_v45, 4  ;;  %v1572_v62 = vrot.slane %v1570_v37, 5  ;;  %v7105_v33 = vadd.f32 %v4932_v16, %v4931_v13  ;;  %v7112_v53 = vld [vmem:[%s5695_s9 + $0x80] sm:$0x1] }
 0x107   : > { %v7107_v23 = vadd.f32 %v5004_v1, %v5003_v31  ;;  %v2207_v29 = vsel %vm5741_vm2, %v2202_v41, %v2206_v57  ;;  %v1567_v25 = vor.u32 %v1566_v32, %v1562_v43  ;;  %v2219_v48 = vshrl.u32 %v7098_v21, 16 }
 0x108   : > { %v1558_v42 = vrot.slane %v1557_v63, 4  ;;  %v2217_v54 = vsel %vm5741_vm2, %v2212_v56, %v2216_v49  ;;  %v2222_v40 = vshll.u32 %v7098_v21, 16  ;;  %v2228_v26 = vshll.u32 %v7103_v61, 16 }
 0x109   : > { %v2232_v13 = vshrl.u32 %v7103_v61, 16  ;;  %v4790_v16 = vcombine.low %v2207_v29, %v2217_v54  ;;  %v1568_v57 = vrot.slane %v1567_v25, 4  ;;  %v2221_v60 = vrot.slane %v2219_v48, 4  ;;  %v7129_v25 = vld [vmem:[%s5695_s9 + $0x84] sm:$0xf] }
 0x10a   : > { %v1563_v38 = vsel %vm5741_vm2, %v1558_v42, %v1562_v43  ;;  %v2224_v20 = vrot.slane %v2222_v40, 5  ;;  %v2230_v32 = vrot.slane %v2228_v26, 5  ;;  %v2238_v45 = vshll.u32 %v7112_v53, 16  ;;  %v4934_v63 = vpop.f32.mrb[8].mxu0 }
 0x10b   : > { %v2234_v10 = vrot.slane %v2232_v13, 4  ;;  %3989 = vmatprep.mubr.bf16.mxu1 %v4790_v16  ;;  %v1573_v49 = vsel %vm5741_vm2, %v1568_v57, %v1572_v62  ;;  %v4799_v37 = vrot.slane %v6755_v2, 9  ;;  %v2508_v31 = vrot.slane %v6769_v28, 5  ;;  %v4935_v42 = vpop.f32.mrb[9].mxu0 }
 0x10c   : > { %v2511_v41 = vrot.slane %v6772_v14, 5  ;;  %v4686_v43 = vcombine.low %v1563_v38, %v1573_v49  ;;  %3990 = vmatmul.mubr.bf16.gmra.mrb[108].mxu1 %v4774_v5  ;;  %v2225_v1 = vor.u32 %v2224_v20, %v2221_v60  ;;  %v2240_v29 = vrot.slane %v2238_v45, 5  ;;  %v4937_v14 = vpop.f32.mrb[10].mxu0  ;;  %v5006_v26 = vpop.f32.mrb[8].mxu1  ;;  %v7144_v20 = vld [vmem:[%s5695_s9 + $0x88] sm:$0xf] }
 0x10d   : > { %v2235_v56 = vor.u32 %v2234_v10, %v2230_v32  ;;  %v2509_v48 = vsel %vm5937_vm5, %v4799_v37, %v2508_v31  ;;  %v2510_v62 = vrot.slane %v2508_v31, 4  ;;  %v4775_v2 = vcombine.low %v7098_v21, %v7103_v61  ;;  %v4938_v16 = vpop.f32.mrb[11].mxu0  ;;  %v5007_v57 = vpop.f32.mrb[9].mxu1 }
 0x10e   : > { %v4800_v28 = vrot.slane %v6802_v7, 9  ;;  %3893 = vmatmul.mubr.bf16.gmra.mrb[108].mxu0 %v4686_v43  ;;  %v2226_v54 = vrot.slane %v2225_v1, 4  ;;  %v2515_v40 = vrot.slane %v6811_v9, 5  ;;  %v7137_v13 = vadd.f32 %v4935_v42, %v4934_v63  ;;  %v5009_v31 = vpop.f32.mrb[10].mxu1 }
 0x10f   : > { %v2236_v5 = vrot.slane %v2235_v56, 4  ;;  %v2512_v38 = vsel %vm5937_vm5, %v2510_v62, %v2511_v41  ;;  %v7141_v60 = vadd.f32 %v4938_v16, %v4937_v14  ;;  %v2243_v7 = vshrl.u32 %v7129_v25, 16  ;;  %v7155_v41 = vld [vmem:[%s5695_s9 + $0x8c] sm:$0x1]  ;;  %v5010_v56 = vpop.f32.mrb[11].mxu1 }
 0x110   : > { %v2246_v10 = vshll.u32 %v7129_v25, 16  ;;  %v2231_v45 = vsel %vm5741_vm2, %v2226_v54, %v2230_v32  ;;  %v4815_v49 = vcombine.low %v2509_v48, %v2512_v38  ;;  %v2516_v37 = vsel %vm5937_vm5, %v4800_v28, %v2515_v40 }
 0x111   : > { %v2241_v9 = vsel %vm5741_vm2, %v2236_v5, %v2240_v29  ;;  %v2517_v43 = vrot.slane %v2515_v40, 4  ;;  %v7157_v1 = vadd.f32 %v5007_v57, %v5006_v26  ;;  %v2245_v42 = vrot.slane %v2243_v7, 4 }
 0x112   : > { %v4791_v63 = vcombine.low %v2231_v45, %v2241_v9  ;;  %5394 = vmatprep.mubr.bf16.mxu0 %v4815_v49  ;;  %v7159_v62 = vadd.f32 %v5010_v56, %v5009_v31  ;;  %v2248_v32 = vrot.slane %v2246_v10, 5  ;;  %v2252_v14 = vshll.u32 %v7144_v20, 16 }
 0x113   : > { %v2256_v29 = vshrl.u32 %v7144_v20, 16  ;;  %v2519_v48 = vsel %vm5937_vm5, %v2517_v43, %v2518_v18  ;;  %v2262_v28 = vshll.u32 %v7155_v41, 16  ;;  %v4801_v54 = vrot.slane %v6844_v50, 9  ;;  %v4940_v57 = vpop.f32.mrb[12].mxu0 }
 0x114   : > { %3997 = vmatprep.mubr.bf16.mxu1 %v4791_v63  ;;  %v2522_v5 = vrot.slane %v6853_v11, 5  ;;  %v4816_v40 = vcombine.low %v2516_v37, %v2519_v48  ;;  %v2249_v26 = vor.u32 %v2248_v32, %v2245_v42  ;;  %v2254_v16 = vrot.slane %v2252_v14, 5  ;;  %v4941_v45 = vpop.f32.mrb[13].mxu0  ;;  %v7177_v37 = vld [vmem:[%s5695_s9 + $0x90] sm:$0xf] }
 0x115   : > { %3998 = vmatmul.mubr.bf16.gmra.mrb[112].mxu1 %v4775_v2  ;;  %v2258_v38 = vrot.slane %v2256_v29, 4  ;;  %v2264_v7 = vrot.slane %v2262_v28, 5  ;;  %v2525_v18 = vrot.slane %v6861_v36, 5  ;;  %v4776_v11 = vcombine.low %v7129_v25, %v7144_v20  ;;  %v4943_v49 = vpop.f32.mrb[14].mxu0  ;;  %v7186_v42 = vld [vmem:[%s5695_s9 + $0x94] sm:$0xf] }
 0x116   : > { %v2523_v4 = vsel %vm5937_vm5, %v4801_v54, %v2522_v5  ;;  %v2524_v10 = vrot.slane %v2522_v5, 4  ;;  %5395 = vmatmul.mubr.bf16.vlgmr.msra.gmra.mrb[112].mxu0 %v4816_v40  ;;  %v2250_v50 = vrot.slane %v2249_v26, 4  ;;  %v4802_v2 = vrot.slane %v6885_v22, 9  ;;  %v4944_v56 = vpop.f32.mrb[15].mxu0  ;;  %v5012_v29 = vpop.f32.mrb[12].mxu1 }
 0x117   : > { %v2259_v9 = vor.u32 %v2258_v38, %v2254_v16  ;;  %v2529_v63 = vrot.slane %v6894_v27, 5  ;;  %v2532_v43 = vrot.slane %v6897_v24, 5  ;;  %v7183_v36 = vadd.f32 %v4941_v45, %v4940_v57  ;;  %v5013_v54 = vpop.f32.mrb[13].mxu1  ;;  %v7201_v38 = vld [vmem:[%s5695_s9 + $0x98] sm:$0x1] }
 0x118   : > { %v2526_v31 = vsel %vm5937_vm5, %v2524_v10, %v2525_v18  ;;  %v2255_v32 = vsel %vm5741_vm2, %v2250_v50, %v2254_v16  ;;  %v7190_v48 = vadd.f32 %v4944_v56, %v4943_v49  ;;  %v2267_v24 = vshrl.u32 %v7177_v37, 16  ;;  %v5015_v16 = vpop.f32.mrb[14].mxu1 }
 0x119   : > { %v2260_v22 = vrot.slane %v2259_v9, 4  ;;  %v4817_v14 = vcombine.low %v2523_v4, %v2526_v31  ;;  %v2530_v28 = vsel %vm5937_vm5, %v4802_v2, %v2529_v63  ;;  %v2531_v27 = vrot.slane %v2529_v63, 4  ;;  %v5016_v45 = vpop.f32.mrb[15].mxu1 }
 0x11a   : > { %v2270_v5 = vshll.u32 %v7177_v37, 16  ;;  %v7198_v26 = vadd.f32 %v5013_v54, %v5012_v29  ;;  %v2276_v57 = vshll.u32 %v7186_v42, 16  ;;  %v2280_v4 = vshrl.u32 %v7186_v42, 16 }
 0x11b   : > { %v2265_v40 = vsel %vm5741_vm2, %v2260_v22, %v2264_v7  ;;  %5398 = vmatprep.mubr.bf16.mxu0 %v4817_v14  ;;  %v2533_v18 = vsel %vm5937_vm5, %v2531_v27, %v2532_v43  ;;  %v2269_v50 = vrot.slane %v2267_v24, 4  ;;  %v7207_v7 = vadd.f32 %v5016_v45, %v5015_v16 }
 0x11c   : > { %v4792_v10 = vcombine.low %v2255_v32, %v2265_v40  ;;  %v2272_v9 = vrot.slane %v2270_v5, 5  ;;  %v4818_v2 = vcombine.low %v2530_v28, %v2533_v18  ;;  %v2278_v49 = vrot.slane %v2276_v57, 5  ;;  %v7213_v32 = vld [vmem:[%s5695_s9 + $0x9c] sm:$0xf] }
 0x11d   : > { %v2282_v31 = vrot.slane %v2280_v4, 4  ;;  %v2286_v56 = vshll.u32 %v7201_v38, 16  ;;  %v4803_v22 = vrot.slane %v6925_v12, 9  ;;  %v2536_v14 = vrot.slane %v6933_v6, 5  ;;  %v4946_v6 = vpop.f32.mrb[16].mxu0 }
 0x11e   : > { %4005 = vmatprep.mubr.bf16.mxu1 %v4792_v10  ;;  %v2273_v63 = vor.u32 %v2272_v9, %v2269_v50  ;;  %5399 = vmatmul.mubr.bf16.gmra.mrb[116].mxu0 %v4818_v2  ;;  %v2539_v29 = vrot.slane %v6941_v51, 5  ;;  %v4777_v28 = vcombine.low %v7177_v37, %v7186_v42  ;;  %v4804_v27 = vrot.slane %v6965_v19, 9  ;;  %v5034_v57 = vpop.f32.mrb[16].mxu1  ;;  %v4947_v51 = vpop.f32.mrb[17].mxu0  ;;  %v7231_v9 = vld [vmem:[%s5695_s9 + $0xa0] sm:$0xf] }
 0x11f   : > { %4006 = vmatmul.mubr.bf16.gmra.mrb[116].mxu1 %v4776_v11  ;;  %v2283_v43 = vor.u32 %v2282_v31, %v2278_v49  ;;  %v2288_v24 = vrot.slane %v2286_v56, 5  ;;  %v2537_v12 = vsel %vm5937_vm5, %v4803_v22, %v2536_v14  ;;  %v2538_v5 = vrot.slane %v2536_v14, 4  ;;  %v5035_v45 = vpop.f32.mrb[17].mxu1  ;;  %v4949_v50 = vpop.f32.mrb[18].mxu0  ;;  %v7239_v22 = vld [vmem:[%s5695_s9 + $0xa4] sm:$0x1] }
 0x120   : > { %v2274_v54 = vrot.slane %v2273_v63, 4  ;;  %v2543_v11 = vrot.slane %v6972_v47, 5  ;;  %v2546_v16 = vrot.slane %v6982_v44, 5  ;;  %v2291_v4 = vshrl.u32 %v7213_v32, 16  ;;  %v4950_v56 = vpop.f32.mrb[19].mxu0 }
 0x121   : > { %v2284_v40 = vrot.slane %v2283_v43, 4  ;;  %v2540_v10 = vsel %vm5937_vm5, %v2538_v5, %v2539_v29  ;;  %v7228_v18 = vadd.f32 %v4947_v51, %v4946_v6  ;;  %v2294_v47 = vshll.u32 %v7213_v32, 16 }
 0x122   : > { %v2279_v19 = vsel %vm5741_vm2, %v2274_v54, %v2278_v49  ;;  %v4819_v2 = vcombine.low %v2537_v12, %v2540_v10  ;;  %v2544_v31 = vsel %vm5937_vm5, %v4804_v27, %v2543_v11  ;;  %v2545_v63 = vrot.slane %v2543_v11, 4  ;;  %v5037_v49 = vpop.f32.mrb[18].mxu1 }
 0x123   : > { %v2289_v44 = vsel %vm5741_vm2, %v2284_v40, %v2288_v24  ;;  %v5036_v43 = vadd.f32 %v5035_v45, %v5034_v57  ;;  %v7241_v29 = vadd.f32 %v4950_v56, %v4949_v50  ;;  %v5038_v54 = vpop.f32.mrb[19].mxu1  ;;  %v2293_v5 = vrot.slane %v2291_v4, 4 }
 0x124   : > { %v4793_v14 = vcombine.low %v2279_v19, %v2289_v44  ;;  %5402 = vmatprep.mubr.bf16.mxu0 %v4819_v2  ;;  %v2547_v6 = vsel %vm5937_vm5, %v2545_v63, %v2546_v16  ;;  %v5039_v24 = vadd.f32 %v5038_v54, %v5037_v49  ;;  %v2296_v12 = vrot.slane %v2294_v47, 5  ;;  %v7258_v44 = vld [vmem:[%s5695_s9 + $0xa8] sm:$0xf] }
 0x125   : > { %v2300_v40 = vshll.u32 %v7231_v9, 16  ;;  %v4820_v27 = vcombine.low %v2544_v31, %v2547_v6  ;;  %v7247_v11 = vadd.f32 %v5036_v43, %v7045_v34  ;;  %v2304_v57 = vshrl.u32 %v7231_v9, 16  ;;  %v4952_v63 = vpop.f32.mrb[20].mxu0 }
 0x126   : > { %4013 = vmatprep.mubr.bf16.mxu1 %v4793_v14  ;;  %v2310_v51 = vshll.u32 %v7239_v22, 16  ;;  %v7252_v4 = vadd.f32 %v5039_v24, %v7052_v58  ;;  %v2297_v19 = vor.u32 %v2296_v12, %v2293_v5  ;;  %v4805_v10 = vrot.slane %v7007_v46, 9  ;;  %v5040_v49 = vpop.f32.mrb[20].mxu1  ;;  %v4953_v14 = vpop.f32.mrb[21].mxu0 }
 0x127   : > { %4014 = vmatmul.mubr.bf16.gmra.mrb[120].mxu1 %v4777_v28  ;;  %v2302_v16 = vrot.slane %v2300_v40, 5  ;;  %5403 = vmatmul.mubr.bf16.gmra.mrb[120].mxu0 %v4820_v27  ;;  %v2306_v45 = vrot.slane %v2304_v57, 4  ;;  %v2550_v47 = vrot.slane %v7012_v52, 5  ;;  %v2553_v34 = vrot.slane %v7025_v59, 5  ;;  %v5041_v43 = vpop.f32.mrb[21].mxu1  ;;  %v4955_v6 = vpop.f32.mrb[22].mxu0 }
 0x128   : > { %v2312_v50 = vrot.slane %v2310_v51, 5  ;;  %v2298_v2 = vrot.slane %v2297_v19, 4  ;;  %v4778_v28 = vcombine.low %v7213_v32, %v7231_v9  ;;  %v4806_v58 = vrot.slane %v7055_v8, 9  ;;  %v5043_v24 = vpop.f32.mrb[22].mxu1  ;;  %v7276_v51 = vld [vmem:[%s5695_s9 + $0xac] sm:$0xf] }
 0x129   : > { %v2557_v31 = vrot.slane %v7062_v3, 5  ;;  %v2307_v46 = vor.u32 %v2306_v45, %v2302_v16  ;;  %v2551_v56 = vsel %vm5937_vm5, %v4805_v10, %v2550_v47  ;;  %v2552_v52 = vrot.slane %v2550_v47, 4  ;;  %v5044_v57 = vpop.f32.mrb[23].mxu1 }
 0x12a   : > { %v2560_v59 = vrot.slane %v7070_v15, 5  ;;  %v2303_v54 = vsel %vm5741_vm2, %v2298_v2, %v2302_v16  ;;  %v7271_v5 = vadd.f32 %v4953_v14, %v4952_v63  ;;  %v5042_v27 = vadd.f32 %v5041_v43, %v5040_v49  ;;  %v4956_v15 = vpop.f32.mrb[23].mxu0  ;;  %v7284_v2 = vld [vmem:[%s5695_s9 + $0xb0] sm:$0x1] }
 0x12b   : > { %v2558_v8 = vsel %vm5937_vm5, %v4806_v58, %v2557_v31  ;;  %v2559_v3 = vrot.slane %v2557_v31, 4  ;;  %v2308_v12 = vrot.slane %v2307_v46, 4  ;;  %v2554_v40 = vsel %vm5937_vm5, %v2552_v52, %v2553_v34 }
 0x12c   : > { %v2315_v19 = vshrl.u32 %v7258_v44, 16  ;;  %v4821_v16 = vcombine.low %v2551_v56, %v2554_v40  ;;  %v7281_v45 = vadd.f32 %v4956_v15, %v4955_v6  ;;  %v5045_v47 = vadd.f32 %v5044_v57, %v5043_v24 }
 0x12d   : > { %v2561_v10 = vsel %vm5937_vm5, %v2559_v3, %v2560_v59  ;;  %v2313_v58 = vsel %vm5741_vm2, %v2308_v12, %v2312_v50  ;;  %v7289_v31 = vadd.f32 %v5042_v27, %v7095_v30  ;;  %v2318_v56 = vshll.u32 %v7258_v44, 16  ;;  %v4958_v3 = vpop.f32.mrb[24].mxu0 }
 0x12e   : > { %v4822_v34 = vcombine.low %v2558_v8, %v2561_v10  ;;  %v2317_v63 = vrot.slane %v2315_v19, 4  ;;  %v4794_v49 = vcombine.low %v2303_v54, %v2313_v58  ;;  %5406 = vmatprep.mubr.bf16.mxu0 %v4821_v16  ;;  %v7292_v46 = vadd.f32 %v5045_v47, %v7105_v33  ;;  %v5046_v6 = vpop.f32.mrb[24].mxu1  ;;  %v4959_v27 = vpop.f32.mrb[25].mxu0 }
 0x12f   : > { %v2324_v52 = vshll.u32 %v7276_v51, 16  ;;  %v2328_v59 = vshrl.u32 %v7276_v51, 16  ;;  %v2334_v14 = vshll.u32 %v7284_v2, 16  ;;  %v4807_v50 = vrot.slane %v7098_v21, 9  ;;  %v4961_v16 = vpop.f32.mrb[26].mxu0 }
 0x130   : > { %5407 = vmatmul.mubr.bf16.gmra.mrb[124].mxu0 %v4822_v34  ;;  %v2564_v30 = vrot.slane %v7103_v61, 5  ;;  %4021 = vmatprep.mubr.bf16.mxu1 %v4794_v49  ;;  %v2320_v43 = vrot.slane %v2318_v56, 5  ;;  %v2567_v8 = vrot.slane %v7112_v53, 5  ;;  %v4779_v33 = vcombine.low %v7258_v44, %v7276_v51  ;;  %v5047_v61 = vpop.f32.mrb[25].mxu1  ;;  %v4962_v49 = vpop.f32.mrb[27].mxu0 }
 0x131   : > { %v2326_v54 = vrot.slane %v2324_v52, 5  ;;  %4022 = vmatmul.mubr.bf16.gmra.mrb[124].mxu1 %v4778_v28  ;;  %v2330_v24 = vrot.slane %v2328_v59, 4  ;;  %v2336_v12 = vrot.slane %v2334_v14, 5  ;;  %v4808_v57 = vrot.slane %v7129_v25, 9  ;;  %v5049_v10 = vpop.f32.mrb[26].mxu1 }
 0x132   : > { %v2565_v40 = vsel %vm5937_vm5, %v4807_v50, %v2564_v30  ;;  %v2566_v21 = vrot.slane %v2564_v30, 4  ;;  %v2321_v15 = vor.u32 %v2320_v43, %v2317_v63  ;;  %v2571_v53 = vrot.slane %v7144_v20, 5  ;;  %v5050_v56 = vpop.f32.mrb[27].mxu1  ;;  %v7313_v63 = vld [vmem:[%s5695_s9 + $0xb4] sm:$0xf] }
 0x133   : > { %v2574_v19 = vrot.slane %v7155_v41, 5  ;;  %v2331_v28 = vor.u32 %v2330_v24, %v2326_v54  ;;  %v7310_v58 = vadd.f32 %v4959_v27, %v4958_v3  ;;  %v5048_v34 = vadd.f32 %v5047_v61, %v5046_v6  ;;  %v7318_v59 = vld [vmem:[%s5695_s9 + $0xb8] sm:$0xf]  ;;  %v7330_v6 = vld [vmem:[%s5695_s9 + $0xbc] sm:$0x1] }
 0x134   : > { %v2568_v47 = vsel %vm5937_vm5, %v2566_v21, %v2567_v8  ;;  %v2322_v25 = vrot.slane %v2321_v15, 4  ;;  %v2572_v20 = vsel %vm5937_vm5, %v4808_v57, %v2571_v53  ;;  %v2573_v41 = vrot.slane %v2571_v53, 4 }
 0x135   : > { %v4823_v52 = vcombine.low %v2565_v40, %v2568_v47  ;;  %v2332_v14 = vrot.slane %v2331_v28, 4  ;;  %v7321_v50 = vadd.f32 %v5048_v34, %v7137_v13  ;;  %v7323_v30 = vadd.f32 %v4962_v49, %v4961_v16 }
 0x136   : > { %v5051_v43 = vadd.f32 %v5050_v56, %v5049_v10  ;;  %v2327_v8 = vsel %vm5741_vm2, %v2322_v25, %v2326_v54  ;;  %v2575_v3 = vsel %vm5937_vm5, %v2573_v41, %v2574_v19  ;;  %v2339_v24 = vshrl.u32 %v7313_v63, 16  ;;  %v4964_v19 = vpop.f32.mrb[28].mxu0  ;;  %v5052_v16 = vpop.f32.mrb[28].mxu1 }
 0x137   : > { %5410 = vmatprep.mubr.bf16.mxu0 %v4823_v52  ;;  %v2342_v40 = vshll.u32 %v7313_v63, 16  ;;  %v2337_v13 = vsel %vm5741_vm2, %v2332_v14, %v2336_v12  ;;  %v4824_v21 = vcombine.low %v2572_v20, %v2575_v3  ;;  %v2348_v61 = vshll.u32 %v7318_v59, 16  ;;  %v4965_v34 = vpop.f32.mrb[29].mxu0 }
 0x138   : > { %v7337_v27 = vadd.f32 %v5051_v43, %v7141_v60  ;;  %v4795_v54 = vcombine.low %v2327_v8, %v2337_v13  ;;  %v2341_v15 = vrot.slane %v2339_v24, 4  ;;  %v2352_v53 = vshrl.u32 %v7318_v59, 16  ;;  %v5053_v60 = vpop.f32.mrb[29].mxu1  ;;  %v4967_v20 = vpop.f32.mrb[30].mxu0 }
 0x139   : > { %v2344_v57 = vrot.slane %v2342_v40, 5  ;;  %5411 = vmatmul.mubr.bf16.gmra.mrb[128].mxu0 %v4824_v21  ;;  %v2350_v10 = vrot.slane %v2348_v61, 5  ;;  %v2358_v28 = vshll.u32 %v7330_v6, 16  ;;  %v4809_v47 = vrot.slane %v7177_v37, 9  ;;  %v5055_v41 = vpop.f32.mrb[30].mxu1  ;;  %v4968_v8 = vpop.f32.mrb[31].mxu0 }
 0x13a   : > { %v2578_v12 = vrot.slane %v7186_v42, 5  ;;  %4029 = vmatprep.mubr.bf16.mxu1 %v4795_v54  ;;  %v2354_v56 = vrot.slane %v2352_v53, 4  ;;  %v2581_v25 = vrot.slane %v7201_v38, 5  ;;  %v4780_v52 = vcombine.low %v7313_v63, %v7318_v59  ;;  %v5056_v3 = vpop.f32.mrb[31].mxu1  ;;  %v7353_v21 = vld [vmem:[%s5695_s9 + $0xc0] sm:$0xf] }
 0x13b   : > { %v2345_v49 = vor.u32 %v2344_v57, %v2341_v15  ;;  %4030 = vmatmul.mubr.bf16.gmra.mrb[128].mxu1 %v4779_v33  ;;  %v2360_v14 = vrot.slane %v2358_v28, 5  ;;  %v4810_v43 = vrot.slane %v7213_v32, 9  ;;  %v2585_v38 = vrot.slane %v7231_v9, 5  ;;  %v7362_v32 = vld [vmem:[%s5695_s9 + $0xc4] sm:$0xf] }
 0x13c   : > { %v2579_v37 = vsel %vm5937_vm5, %v4809_v47, %v2578_v12  ;;  %v2580_v42 = vrot.slane %v2578_v12, 4  ;;  %v2355_v40 = vor.u32 %v2354_v56, %v2350_v10  ;;  %v2588_v13 = vrot.slane %v7239_v22, 5 }
 0x13d   : > { %v2346_v24 = vrot.slane %v2345_v49, 4  ;;  %v7357_v61 = vadd.f32 %v4965_v34, %v4964_v19  ;;  %v5054_v54 = vadd.f32 %v5053_v60, %v5052_v16  ;;  %v7359_v15 = vadd.f32 %v4968_v8, %v4967_v20  ;;  %v7372_v19 = vld [vmem:[%s5695_s9 + $0xc8] sm:$0x1]  ;;  %v4970_v56 = vpop.f32.mrb[32].mxu0 }
 0x13e   : > { %v2582_v33 = vsel %vm5937_vm5, %v2580_v42, %v2581_v25  ;;  %v2356_v53 = vrot.slane %v2355_v40, 4  ;;  %v2586_v9 = vsel %vm5937_vm5, %v4810_v43, %v2585_v38  ;;  %v2587_v22 = vrot.slane %v2585_v38, 4  ;;  %v5058_v25 = vpop.f32.mrb[32].mxu1  ;;  %v4971_v42 = vpop.f32.mrb[33].mxu0 }
 0x13f   : > { %v2351_v57 = vsel %vm5741_vm2, %v2346_v24, %v2350_v10  ;;  %v4825_v28 = vcombine.low %v2579_v37, %v2582_v33  ;;  %v7369_v47 = vadd.f32 %v5054_v54, %v7183_v36  ;;  %v5057_v12 = vadd.f32 %v5056_v3, %v5055_v41  ;;  %v5059_v43 = vpop.f32.mrb[33].mxu1  ;;  %v4973_v40 = vpop.f32.mrb[34].mxu0 }
 0x140   : > { %v2363_v16 = vshrl.u32 %v7353_v21, 16  ;;  %v2361_v34 = vsel %vm5741_vm2, %v2356_v53, %v2360_v14  ;;  %v2366_v10 = vshll.u32 %v7353_v21, 16  ;;  %v2372_v60 = vshll.u32 %v7362_v32, 16  ;;  %v5061_v38 = vpop.f32.mrb[34].mxu1 }
 0x141   : > { %5414 = vmatprep.mubr.bf16.mxu0 %v4825_v28  ;;  %v2376_v49 = vshrl.u32 %v7362_v32, 16  ;;  %v4796_v20 = vcombine.low %v2351_v57, %v2361_v34  ;;  %v2589_v36 = vsel %vm5937_vm5, %v2587_v22, %v2588_v13  ;;  %v7383_v41 = vadd.f32 %v5057_v12, %v7190_v48  ;;  %v4974_v48 = vpop.f32.mrb[35].mxu0  ;;  %v5062_v53 = vpop.f32.mrb[35].mxu1 }
 0x142   : > { %v2365_v37 = vrot.slane %v2363_v16, 4  ;;  %v4826_v14 = vcombine.low %v2586_v9, %v2589_v36  ;;  %v2368_v8 = vrot.slane %v2366_v10, 5  ;;  %v2374_v3 = vrot.slane %v2372_v60, 5 }
 0x143   : > { %v2378_v24 = vrot.slane %v2376_v49, 4  ;;  %4037 = vmatprep.mubr.bf16.mxu1 %v4796_v20  ;;  %v2382_v33 = vshll.u32 %v7372_v19, 16  ;;  %v4811_v54 = vrot.slane %v7258_v44, 9  ;;  %v2592_v57 = vrot.slane %v7276_v51, 5 }
 0x144   : > { %v2595_v13 = vrot.slane %v7284_v2, 5  ;;  %4038 = vmatmul.mubr.bf16.gmra.mrb[132].mxu1 %v4780_v52  ;;  %5415 = vmatmul.mubr.bf16.gmra.mrb[132].mxu0 %v4826_v14  ;;  %v2369_v28 = vor.u32 %v2368_v8, %v2365_v37  ;;  %v4781_v22 = vcombine.low %v7353_v21, %v7362_v32  ;;  %v4812_v12 = vrot.slane %v7313_v63, 9  ;;  %v7403_v37 = vld [vmem:[%s5695_s9 + $0xcc] sm:$0xf]  ;;  %v7406_v14 = vld [vmem:[%s5695_s9 + $0xd0] sm:$0xf] }
 0x145   : > { %v2379_v9 = vor.u32 %v2378_v24, %v2374_v3  ;;  %v2384_v16 = vrot.slane %v2382_v33, 5  ;;  %v2593_v44 = vsel %vm5937_vm5, %v4811_v54, %v2592_v57  ;;  %v2594_v51 = vrot.slane %v2592_v57, 4  ;;  %v7415_v8 = vld [vmem:[%s5695_s9 + $0xd4] sm:$0x1]  ;;  %v4976_v24 = vpop.f32.mrb[36].mxu0  ;;  %s4905_s9 = sshll.u32 %s8122_s12, 8 }
 0x146   : > { %v2599_v2 = vrot.slane %v7318_v59, 5  ;;  %v2370_v34 = vrot.slane %v2369_v28, 4  ;;  %v2602_v10 = vrot.slane %v7330_v6, 5  ;;  %v7396_v60 = vadd.f32 %v4971_v42, %v4970_v56  ;;  %v5064_v33 = vpop.f32.mrb[36].mxu1  ;;  %s7978_s25 = scalar_lea.vmem %s8080_s3, %s4905_s9 }
 0x147   : > { %v2380_v52 = vrot.slane %v2379_v9, 4  ;;  %v2596_v49 = vsel %vm5937_vm5, %v2594_v51, %v2595_v13  ;;  %v5060_v36 = vadd.f32 %v5059_v43, %v5058_v25  ;;  %v7412_v42 = vadd.f32 %v4974_v48, %v4973_v40  ;;  %v4977_v13 = vpop.f32.mrb[37].mxu0 }
 0x148   : > { %v2600_v63 = vsel %vm5937_vm5, %v4812_v12, %v2599_v2  ;;  %v2601_v20 = vrot.slane %v2599_v2, 4  ;;  %v2375_v59 = vsel %vm5741_vm2, %v2370_v34, %v2374_v3  ;;  %v4827_v56 = vcombine.low %v2593_v44, %v2596_v49  ;;  %v5065_v3 = vpop.f32.mrb[37].mxu1  ;;  %v4979_v12 = vpop.f32.mrb[38].mxu0 }
 0x149   : > { %v2385_v6 = vsel %vm5741_vm2, %v2380_v52, %v2384_v16  ;;  %v7420_v43 = vadd.f32 %v5060_v36, %v7228_v18  ;;  %v5063_v57 = vadd.f32 %v5062_v53, %v5061_v38  ;;  %v2387_v9 = vshrl.u32 %v7403_v37, 16  ;;  %v5067_v16 = vpop.f32.mrb[38].mxu1  ;;  %v4980_v51 = vpop.f32.mrb[39].mxu0 }
 0x14a   : > { %v4797_v54 = vcombine.low %v2375_v59, %v2385_v6  ;;  %v2603_v25 = vsel %vm5937_vm5, %v2601_v20, %v2602_v10  ;;  %5418 = vmatprep.mubr.bf16.mxu0 %v4827_v56  ;;  %v2390_v40 = vshll.u32 %v7403_v37, 16  ;;  %v2396_v48 = vshll.u32 %v7406_v14, 16  ;;  %v5068_v2 = vpop.f32.mrb[39].mxu1 }
 0x14b   : > { %v4828_v28 = vcombine.low %v2600_v63, %v2603_v25  ;;  %v7426_v44 = vadd.f32 %v5063_v57, %v7241_v29  ;;  %v2400_v18 = vshrl.u32 %v7406_v14, 16  ;;  %v2406_v38 = vshll.u32 %v7415_v8, 16 }
 0x14c   : > { %4045 = vmatprep.mubr.bf16.mxu1 %v4797_v54  ;;  %v4813_v53 = vrot.slane %v7353_v21, 9  ;;  %v2389_v34 = vrot.slane %v2387_v9, 4  ;;  %v2392_v52 = vrot.slane %v2390_v40, 5  ;;  %v2398_v10 = vrot.slane %v2396_v48, 5 }
 0x14d   : > { %4046 = vmatmul.mubr.bf16.gmra.mrb[136].mxu1 %v4781_v22  ;;  %5419 = vmatmul.mubr.bf16.gmra.mrb[136].mxu0 %v4828_v28  ;;  %v2606_v49 = vrot.slane %v7362_v32, 5  ;;  %v2402_v63 = vrot.slane %v2400_v18, 4  ;;  %v2408_v20 = vrot.slane %v2406_v38, 5  ;;  %v2609_v29 = vrot.slane %v7372_v19, 5  ;;  %v4982_v9 = vpop.f32.mrb[40].mxu0 }
 0x14e   : > { %v2393_v36 = vor.u32 %v2392_v52, %v2389_v34  ;;  %v4814_v21 = vrot.slane %v7403_v37, 9  ;;  %v2613_v22 = vrot.slane %v7406_v14, 5  ;;  %v2616_v54 = vrot.slane %v7415_v8, 5  ;;  %v5070_v40 = vpop.f32.mrb[40].mxu1  ;;  %v4983_v34 = vpop.f32.mrb[41].mxu0 }
 0x14f   : > { %v2607_v59 = vsel %vm5937_vm5, %v4813_v53, %v2606_v49  ;;  %v2608_v6 = vrot.slane %v2606_v49, 4  ;;  %v2403_v56 = vor.u32 %v2402_v63, %v2398_v10  ;;  %v7438_v25 = vadd.f32 %v4977_v13, %v4976_v24  ;;  %v5071_v52 = vpop.f32.mrb[41].mxu1 }
 0x150   : > { %v2394_v57 = vrot.slane %v2393_v36, 4  ;;  %v5066_v28 = vadd.f32 %v5065_v3, %v5064_v33  ;;  %v7442_v19 = vadd.f32 %v4980_v51, %v4979_v12  ;;  %v2614_v38 = vsel %vm5937_vm5, %v4814_v21, %v2613_v22  ;;  %v4985_v3 = vpop.f32.mrb[42].mxu0  ;;  %v5073_v12 = vpop.f32.mrb[42].mxu1 }
 0x151   : > { %v2610_v32 = vsel %vm5937_vm5, %v2608_v6, %v2609_v29  ;;  %v2404_v48 = vrot.slane %v2403_v56, 4  ;;  %v2615_v53 = vrot.slane %v2613_v22, 4  ;;  %v5069_v13 = vadd.f32 %v5068_v2, %v5067_v16  ;;  %v5074_v36 = vpop.f32.mrb[43].mxu1 }
 0x152   : > { %v4829_v18 = vcombine.low %v2607_v59, %v2610_v32  ;;  %v2399_v8 = vsel %vm5741_vm2, %v2394_v57, %v2398_v10  ;;  %v7449_v24 = vadd.f32 %v5066_v28, %v7271_v5  ;;  %v7451_v33 = vadd.f32 %v4983_v34, %v4982_v9  ;;  %v4986_v10 = vpop.f32.mrb[43].mxu0 }
 0x153   : > { %v2409_v51 = vsel %vm5741_vm2, %v2404_v48, %v2408_v20  ;;  %v4782_v49 = vcombine.low %v7403_v37, %v7406_v14  ;;  %v2617_v63 = vsel %vm5937_vm5, %v2615_v53, %v2616_v54  ;;  %v5072_v29 = vadd.f32 %v5071_v52, %v5070_v40 }
 0x154   : > { %5422 = vmatprep.mubr.bf16.mxu0 %v4829_v18  ;;  %v4798_v5 = vcombine.low %v2399_v8, %v2409_v51  ;;  %v4830_v59 = vcombine.low %v2614_v38, %v2617_v63  ;;  %v7460_v16 = vadd.f32 %v5069_v13, %v7281_v45  ;;  %v7462_v2 = vadd.f32 %v4986_v10, %v4985_v3 }
 0x155   : > { %v7465_v35 = vadd.f32 %v5072_v29, %v7310_v58  ;;  %v5075_v20 = vadd.f32 %v5074_v36, %v5073_v12  ;;  %v4988_v37 = vpop.f32.mrb[44].mxu0 }
 0x156   : > { %4053 = vmatprep.mubr.bf16.mxu1 %v4798_v5  ;;  %5423 = vmatmul.mubr.bf16.gmra.mrb[140].mxu0 %v4830_v59  ;;  %v5076_v14 = vpop.f32.mrb[44].mxu1  ;;  %v4989_v6 = vpop.f32.mrb[45].mxu0 }
 0x157   : > { %4054 = vmatmul.mubr.bf16.gmra.mrb[140].mxu1 %v4782_v49  ;;  %v7468_v39 = vadd.f32 %v5075_v20, %v7323_v30  ;;  %v5077_v21 = vpop.f32.mrb[45].mxu1  ;;  %v7470_v56 = vadd.f32 %v4989_v6, %v4988_v37  ;;  %v4991_v22 = vpop.f32.mrb[46].mxu0 }
 0x158   : > { %v5078_v45 = vadd.f32 %v5077_v21, %v5076_v14  ;;  %v5079_v54 = vpop.f32.mrb[46].mxu1  ;;  %v4992_v57 = vpop.f32.mrb[47].mxu0 }
 0x159   : > { %v5080_v32 = vpop.f32.mrb[47].mxu1  ;;  %v7475_v28 = vadd.f32 %v4992_v57, %v4991_v22 }
 0x15a   : > { %v7473_v58 = vadd.f32 %v5078_v45, %v7357_v61  ;;  %v5081_v9 = vadd.f32 %v5080_v32, %v5079_v54 }
 0x15c   : > { %v7478_v30 = vadd.f32 %v5081_v9, %v7359_v15 }
 0x15d   : > { %v5146_v48 = vpop.f32.mrb[48].mxu0 }
 0x15e   : > { %v5082_v40 = vpop.f32.mrb[48].mxu1  ;;  %v5147_v38 = vpop.f32.mrb[49].mxu0 }
 0x15f   : > { %v5083_v18 = vpop.f32.mrb[49].mxu1  ;;  %v5148_v34 = vadd.f32 %v5147_v38, %v5146_v48  ;;  %v5149_v8 = vpop.f32.mrb[50].mxu0 }
 0x160   : > { %v5084_v53 = vadd.f32 %v5083_v18, %v5082_v40  ;;  %v5085_v52 = vpop.f32.mrb[50].mxu1  ;;  %v5150_v3 = vpop.f32.mrb[51].mxu0 }
 0x161   : > { %v5086_v13 = vpop.f32.mrb[51].mxu1  ;;  %v7484_v61 = vadd.f32 %v5148_v34, %v7247_v11  ;;  %v5151_v49 = vadd.f32 %v5150_v3, %v5149_v8 }
 0x162   : > { %v7481_v12 = vadd.f32 %v5084_v53, %v7396_v60  ;;  %v5087_v51 = vadd.f32 %v5086_v13, %v5085_v52 }
 0x163   : > { %v7490_v63 = vadd.f32 %v5151_v49, %v7252_v4 }
 0x164   : > { %v7487_v15 = vadd.f32 %v5087_v51, %v7412_v42 }
 0x165   : > { %v5152_v10 = vpop.f32.mrb[52].mxu0 }
 0x166   : > { %v5088_v29 = vpop.f32.mrb[52].mxu1  ;;  %v5153_v5 = vpop.f32.mrb[53].mxu0 }
 0x167   : > { %v5089_v36 = vpop.f32.mrb[53].mxu1  ;;  %v5154_v20 = vadd.f32 %v5153_v5, %v5152_v10  ;;  %v5155_v60 = vpop.f32.mrb[54].mxu0 }
 0x168   : > { %v5090_v59 = vadd.f32 %v5089_v36, %v5088_v29  ;;  %v5091_v37 = vpop.f32.mrb[54].mxu1  ;;  %v5156_v6 = vpop.f32.mrb[55].mxu0 }
 0x169   : > { %v5092_v14 = vpop.f32.mrb[55].mxu1  ;;  %v7496_v21 = vadd.f32 %v5154_v20, %v7289_v31  ;;  %v5157_v45 = vadd.f32 %v5156_v6, %v5155_v60 }
 0x16a   : > { %v7493_v11 = vadd.f32 %v5090_v59, %v7438_v25  ;;  %v5093_v42 = vadd.f32 %v5092_v14, %v5091_v37 }
 0x16b   : > { %v7502_v22 = vadd.f32 %v5157_v45, %v7292_v46 }
 0x16c   : > { %v7499_v4 = vadd.f32 %v5093_v42, %v7442_v19 }
 0x16d   : > { %v5158_v57 = vpop.f32.mrb[56].mxu0 }
 0x16e   : > { %v5094_v54 = vpop.f32.mrb[56].mxu1  ;;  %v5159_v9 = vpop.f32.mrb[57].mxu0 }
 0x16f   : > { %v5095_v32 = vpop.f32.mrb[57].mxu1  ;;  %v5160_v48 = vadd.f32 %v5159_v9, %v5158_v57  ;;  %v5161_v25 = vpop.f32.mrb[58].mxu0 }
 0x170   : > { %v5096_v40 = vadd.f32 %v5095_v32, %v5094_v54  ;;  %v5097_v18 = vpop.f32.mrb[58].mxu1  ;;  %v5162_v53 = vpop.f32.mrb[59].mxu0 }
 0x171   : > { %v5098_v38 = vpop.f32.mrb[59].mxu1  ;;  %v7508_v34 = vadd.f32 %v5160_v48, %v7321_v50  ;;  %v5163_v52 = vadd.f32 %v5162_v53, %v5161_v25 }
 0x172   : > { %v7505_v31 = vadd.f32 %v5096_v40, %v7451_v33  ;;  %v5099_v19 = vadd.f32 %v5098_v38, %v5097_v18 }
 0x173   : > { %v7514_v8 = vadd.f32 %v5163_v52, %v7337_v27 }
 0x174   : > { %v7511_v46 = vadd.f32 %v5099_v19, %v7462_v2 }
 0x175   : > { %v5164_v3 = vpop.f32.mrb[60].mxu0 }
 0x176   : > { %v5100_v13 = vpop.f32.mrb[60].mxu1  ;;  %v5165_v49 = vpop.f32.mrb[61].mxu0 }
 0x177   : > { %v5101_v51 = vpop.f32.mrb[61].mxu1  ;;  %v5166_v10 = vadd.f32 %v5165_v49, %v5164_v3  ;;  %v5167_v33 = vpop.f32.mrb[62].mxu0 }
 0x178   : > { %v5102_v29 = vadd.f32 %v5101_v51, %v5100_v13  ;;  %v5103_v36 = vpop.f32.mrb[62].mxu1  ;;  %v5168_v59 = vpop.f32.mrb[63].mxu0 }
 0x179   : > { %v5104_v5 = vpop.f32.mrb[63].mxu1  ;;  %v7520_v20 = vadd.f32 %v5166_v10, %v7369_v47  ;;  %v5169_v37 = vadd.f32 %v5168_v59, %v5167_v33 }
 0x17a   : > { %v7517_v50 = vadd.f32 %v5102_v29, %v7470_v56  ;;  %v5105_v2 = vadd.f32 %v5104_v5, %v5103_v36 }
 0x17b   : > { %v7526_v60 = vadd.f32 %v5169_v37, %v7383_v41 }
 0x17c   : > { %v7523_v27 = vadd.f32 %v5105_v2, %v7475_v28 }
 0x17d   : > { %v5170_v6 = vpop.f32.mrb[64].mxu0 }
 0x17e   : > { %v5106_v14 = vpop.f32.mrb[64].mxu1  ;;  %v5171_v45 = vpop.f32.mrb[65].mxu0 }
 0x17f   : > { %v5107_v42 = vpop.f32.mrb[65].mxu1  ;;  %v5172_v57 = vadd.f32 %v5171_v45, %v5170_v6  ;;  %v5173_v56 = vpop.f32.mrb[66].mxu0 }
 0x180   : > { %v5108_v54 = vadd.f32 %v5107_v42, %v5106_v14  ;;  %v5109_v32 = vpop.f32.mrb[66].mxu1  ;;  %v5174_v40 = vpop.f32.mrb[67].mxu0 }
 0x181   : > { %v5110_v9 = vpop.f32.mrb[67].mxu1  ;;  %v7532_v48 = vadd.f32 %v5172_v57, %v7420_v43  ;;  %v5175_v18 = vadd.f32 %v5174_v40, %v5173_v56 }
 0x182   : > { %v7529_v47 = vadd.f32 %v5108_v54, %v7050_v55  ;;  %v5111_v28 = vadd.f32 %v5110_v9, %v5109_v32 }
 0x183   : > { %v7538_v25 = vadd.f32 %v5175_v18, %v7426_v44 }
 0x184   : > { %v7535_v41 = vadd.f32 %v5111_v28, %v7059_v0 }
 0x185   : > { %v5176_v53 = vpop.f32.mrb[68].mxu0 }
 0x186   : > { %v5112_v38 = vpop.f32.mrb[68].mxu1  ;;  %v5177_v52 = vpop.f32.mrb[69].mxu0 }
 0x187   : > { %v5113_v19 = vpop.f32.mrb[69].mxu1  ;;  %v5178_v3 = vadd.f32 %v5177_v52, %v5176_v53  ;;  %v5179_v55 = vpop.f32.mrb[70].mxu0 }
 0x188   : > { %v5114_v13 = vadd.f32 %v5113_v19, %v5112_v38  ;;  %v5115_v51 = vpop.f32.mrb[70].mxu1  ;;  %v5180_v29 = vpop.f32.mrb[71].mxu0 }
 0x189   : > { %v5116_v49 = vpop.f32.mrb[71].mxu1  ;;  %v7544_v10 = vadd.f32 %v5178_v3, %v7449_v24  ;;  %v5181_v36 = vadd.f32 %v5180_v29, %v5179_v55 }
 0x18a   : > { %v7541_v43 = vadd.f32 %v5114_v13, %v7100_v17  ;;  %v5117_v0 = vadd.f32 %v5116_v49, %v5115_v51 }
 0x18b   : > { %v7550_v33 = vadd.f32 %v5181_v36, %v7460_v16 }
 0x18c   : > { %v7547_v44 = vadd.f32 %v5117_v0, %v7107_v23 }
 0x18d   : > { %v5182_v59 = vpop.f32.mrb[72].mxu0 }
 0x18e   : > { %v5118_v5 = vpop.f32.mrb[72].mxu1  ;;  %v5183_v37 = vpop.f32.mrb[73].mxu0 }
 0x18f   : > { %v5119_v2 = vpop.f32.mrb[73].mxu1  ;;  %v5184_v6 = vadd.f32 %v5183_v37, %v5182_v59  ;;  %v5185_v17 = vpop.f32.mrb[74].mxu0 }
 0x190   : > { %v5120_v14 = vadd.f32 %v5119_v2, %v5118_v5  ;;  %v5121_v42 = vpop.f32.mrb[74].mxu1  ;;  %v5186_v54 = vpop.f32.mrb[75].mxu0 }
 0x191   : > { %v5122_v45 = vpop.f32.mrb[75].mxu1  ;;  %v7556_v57 = vadd.f32 %v5184_v6, %v7465_v35  ;;  %v5187_v32 = vadd.f32 %v5186_v54, %v5185_v17 }
 0x192   : > { %v7553_v24 = vadd.f32 %v5120_v14, %v7157_v1  ;;  %v5123_v23 = vadd.f32 %v5122_v45, %v5121_v42 }
 0x193   : > { %v7562_v56 = vadd.f32 %v5187_v32, %v7468_v39 }
 0x194   : > { %v7559_v16 = vadd.f32 %v5123_v23, %v7159_v62 }
 0x195   : > { %v5188_v40 = vpop.f32.mrb[76].mxu0 }
 0x196   : > { %v5124_v9 = vpop.f32.mrb[76].mxu1  ;;  %v5189_v18 = vpop.f32.mrb[77].mxu0 }
 0x197   : > { %v5125_v28 = vpop.f32.mrb[77].mxu1  ;;  %v5190_v53 = vadd.f32 %v5189_v18, %v5188_v40  ;;  %v5191_v1 = vpop.f32.mrb[78].mxu0 }
 0x198   : > { %v5126_v38 = vadd.f32 %v5125_v28, %v5124_v9  ;;  %v5127_v19 = vpop.f32.mrb[78].mxu1  ;;  %v5192_v13 = vpop.f32.mrb[79].mxu0 }
 0x199   : > { %v5128_v52 = vpop.f32.mrb[79].mxu1  ;;  %v7568_v3 = vadd.f32 %v5190_v53, %v7473_v58  ;;  %v5193_v51 = vadd.f32 %v5192_v13, %v5191_v1 }
 0x19a   : > { %v7565_v35 = vadd.f32 %v5126_v38, %v7198_v26  ;;  %v5129_v62 = vadd.f32 %v5128_v52, %v5127_v19 }
 0x19b   : > { %v7574_v55 = vadd.f32 %v5193_v51, %v7478_v30 }
 0x19c   : > { %v7571_v39 = vadd.f32 %v5129_v62, %v7207_v7 }
 0x19d   : > { %v5194_v49 = vpop.f32.mrb[80].mxu0 }
 0x19e   : > { %v5258_v29 = vpop.f32.mrb[80].mxu1  ;;  %v5195_v0 = vpop.f32.mrb[81].mxu0 }
 0x19f   : > { %v5259_v36 = vpop.f32.mrb[81].mxu1  ;;  %v5196_v5 = vadd.f32 %v5195_v0, %v5194_v49  ;;  %v5197_v2 = vpop.f32.mrb[82].mxu0 }
 0x1a0   : > { %v5260_v59 = vadd.f32 %v5259_v36, %v5258_v29  ;;  %v5261_v26 = vpop.f32.mrb[82].mxu1  ;;  %v5198_v37 = vpop.f32.mrb[83].mxu0 }
 0x1a1   : > { %v5262_v14 = vpop.f32.mrb[83].mxu1  ;;  %v7577_v58 = vadd.f32 %v5196_v5, %v7481_v12  ;;  %v5199_v6 = vadd.f32 %v5198_v37, %v5197_v2 }
 0x1a2   : > { %v5263_v42 = vadd.f32 %v5262_v14, %v5261_v26  ;;  %v7580_v7 = vadd.f32 %v5260_v59, %v7484_v61 }
 0x1a3   : > { %v7583_v30 = vadd.f32 %v5199_v6, %v7487_v15 }
 0x1a4   : > { %v7586_v17 = vadd.f32 %v5263_v42, %v7490_v63 }
 0x1a5   : > { %v5200_v45 = vpop.f32.mrb[84].mxu0 }
 0x1a6   : > { %v5264_v54 = vpop.f32.mrb[84].mxu1  ;;  %v5201_v23 = vpop.f32.mrb[85].mxu0 }
 0x1a7   : > { %v5265_v32 = vpop.f32.mrb[85].mxu1  ;;  %v5202_v9 = vadd.f32 %v5201_v23, %v5200_v45  ;;  %v5203_v28 = vpop.f32.mrb[86].mxu0 }
 0x1a8   : > { %v5266_v40 = vadd.f32 %v5265_v32, %v5264_v54  ;;  %v5267_v12 = vpop.f32.mrb[86].mxu1  ;;  %v5204_v18 = vpop.f32.mrb[87].mxu0 }
 0x1a9   : > { %v5268_v38 = vpop.f32.mrb[87].mxu1  ;;  %v7589_v53 = vadd.f32 %v5202_v9, %v7493_v11  ;;  %v5205_v61 = vadd.f32 %v5204_v18, %v5203_v28 }
 0x1aa   : > { %v5269_v19 = vadd.f32 %v5268_v38, %v5267_v12  ;;  %v7592_v15 = vadd.f32 %v5266_v40, %v7496_v21 }
 0x1ab   : > { %v7595_v63 = vadd.f32 %v5205_v61, %v7499_v4 }
 0x1ac   : > { %v7598_v1 = vadd.f32 %v5269_v19, %v7502_v22 }
 0x1ad   : > { %v5206_v52 = vpop.f32.mrb[88].mxu0 }
 0x1ae   : > { %v5270_v13 = vpop.f32.mrb[88].mxu1  ;;  %v5207_v62 = vpop.f32.mrb[89].mxu0 }
 0x1af   : > { %v5271_v51 = vpop.f32.mrb[89].mxu1  ;;  %v5208_v49 = vadd.f32 %v5207_v62, %v5206_v52  ;;  %v5209_v0 = vpop.f32.mrb[90].mxu0 }
 0x1b0   : > { %v5272_v29 = vadd.f32 %v5271_v51, %v5270_v13  ;;  %v5273_v11 = vpop.f32.mrb[90].mxu1  ;;  %v5210_v36 = vpop.f32.mrb[91].mxu0 }
 0x1b1   : > { %v5274_v5 = vpop.f32.mrb[91].mxu1  ;;  %v7601_v59 = vadd.f32 %v5208_v49, %v7505_v31  ;;  %v5211_v21 = vadd.f32 %v5210_v36, %v5209_v0 }
 0x1b2   : > { %v5275_v2 = vadd.f32 %v5274_v5, %v5273_v11  ;;  %v7604_v4 = vadd.f32 %v5272_v29, %v7508_v34 }
 0x1b3   : > { %v7607_v22 = vadd.f32 %v5211_v21, %v7511_v46 }
 0x1b4   : > { %v7610_v26 = vadd.f32 %v5275_v2, %v7514_v8 }
 0x1b6   : > { %v5276_v37 = vpop.f32.mrb[92].mxu1 }
 0x1b7   : > { %v5212_v14 = vpop.f32.mrb[92].mxu0  ;;  %v5277_v6 = vpop.f32.mrb[93].mxu1 }
 0x1b8   : > { %v5213_v42 = vpop.f32.mrb[93].mxu0  ;;  %v5278_v45 = vadd.f32 %v5277_v6, %v5276_v37  ;;  %v5279_v54 = vpop.f32.mrb[94].mxu1 }
 0x1b9   : > { %v5214_v23 = vadd.f32 %v5213_v42, %v5212_v14  ;;  %v5215_v31 = vpop.f32.mrb[94].mxu0  ;;  %v5280_v32 = vpop.f32.mrb[95].mxu1 }
 0x1ba   : > { %v5216_v9 = vpop.f32.mrb[95].mxu0  ;;  %v5281_v40 = vadd.f32 %v5280_v32, %v5279_v54  ;;  %v7613_v34 = vadd.f32 %v5278_v45, %v7520_v20 }
 0x1bb   : > { %v7616_v46 = vadd.f32 %v5214_v23, %v7517_v50  ;;  %v5217_v28 = vadd.f32 %v5216_v9, %v5215_v31 }
 0x1bc   : > { %v7619_v8 = vadd.f32 %v5281_v40, %v7526_v60 }
 0x1bd   : > { %v7622_v12 = vadd.f32 %v5217_v28, %v7523_v27 }
 0x1bf   : > { %v5282_v18 = vpop.f32.mrb[96].mxu1 }
 0x1c0   : > { %v5283_v38 = vpop.f32.mrb[97].mxu1 }
 0x1c1   : > { %v5218_v61 = vpop.f32.mrb[96].mxu0  ;;  %v5284_v19 = vadd.f32 %v5283_v38, %v5282_v18  ;;  %v5285_v52 = vpop.f32.mrb[98].mxu1 }
 0x1c2   : > { %v5219_v13 = vpop.f32.mrb[97].mxu0  ;;  %v5286_v62 = vpop.f32.mrb[99].mxu1 }
 0x1c3   : > { %v5220_v51 = vadd.f32 %v5219_v13, %v5218_v61  ;;  %v5221_v20 = vpop.f32.mrb[98].mxu0  ;;  %v5287_v49 = vadd.f32 %v5286_v62, %v5285_v52  ;;  %v7625_v50 = vadd.f32 %v5284_v19, %v7532_v48 }
 0x1c4   : > { %v5222_v29 = vpop.f32.mrb[99].mxu0 }
 0x1c5   : > { %v7628_v60 = vadd.f32 %v5220_v51, %v7529_v47  ;;  %v5223_v0 = vadd.f32 %v5222_v29, %v5221_v20  ;;  %v7631_v27 = vadd.f32 %v5287_v49, %v7538_v25 }
 0x1c7   : > { %v7634_v11 = vadd.f32 %v5223_v0, %v7535_v41 }
 0x1c9   : > { %v5288_v36 = vpop.f32.mrb[100].mxu1 }
 0x1ca   : > { %v5289_v21 = vpop.f32.mrb[101].mxu1 }
 0x1cb   : > { %v5224_v5 = vpop.f32.mrb[100].mxu0  ;;  %v5290_v37 = vadd.f32 %v5289_v21, %v5288_v36  ;;  %v5291_v14 = vpop.f32.mrb[102].mxu1 }
 0x1cc   : > { %v5225_v2 = vpop.f32.mrb[101].mxu0  ;;  %v5292_v42 = vpop.f32.mrb[103].mxu1 }
 0x1cd   : > { %v5226_v6 = vadd.f32 %v5225_v2, %v5224_v5  ;;  %v5227_v48 = vpop.f32.mrb[102].mxu0  ;;  %v5293_v54 = vadd.f32 %v5292_v42, %v5291_v14  ;;  %v7637_v47 = vadd.f32 %v5290_v37, %v7544_v10 }
 0x1ce   : > { %v5228_v45 = vpop.f32.mrb[103].mxu0 }
 0x1cf   : > { %v7640_v25 = vadd.f32 %v5226_v6, %v7541_v43  ;;  %v5229_v23 = vadd.f32 %v5228_v45, %v5227_v48  ;;  %v7643_v41 = vadd.f32 %v5293_v54, %v7550_v33 }
 0x1d1   : > { %v7646_v31 = vadd.f32 %v5229_v23, %v7547_v44 }
 0x1d3   : > { %v5294_v32 = vpop.f32.mrb[104].mxu1 }
 0x1d4   : > { %v5295_v9 = vpop.f32.mrb[105].mxu1 }
 0x1d5   : > { %v5230_v40 = vpop.f32.mrb[104].mxu0  ;;  %v5296_v28 = vadd.f32 %v5295_v9, %v5294_v32  ;;  %v5297_v18 = vpop.f32.mrb[106].mxu1 }
 0x1d6   : > { %v5231_v38 = vpop.f32.mrb[105].mxu0  ;;  %v5298_v61 = vpop.f32.mrb[107].mxu1 }
 0x1d7   : > { %v5232_v19 = vadd.f32 %v5231_v38, %v5230_v40  ;;  %v5233_v10 = vpop.f32.mrb[106].mxu0  ;;  %v5299_v52 = vadd.f32 %v5298_v61, %v5297_v18  ;;  %v7649_v43 = vadd.f32 %v5296_v28, %v7556_v57 }
 0x1d8   : > { %v5234_v13 = vpop.f32.mrb[107].mxu0 }
 0x1d9   : > { %v7652_v33 = vadd.f32 %v5232_v19, %v7553_v24  ;;  %v5235_v62 = vadd.f32 %v5234_v13, %v5233_v10  ;;  %v7655_v44 = vadd.f32 %v5299_v52, %v7562_v56 }
 0x1db   : > { %v7658_v51 = vadd.f32 %v5235_v62, %v7559_v16 }
 0x1df   : > { %v5300_v20 = vpop.f32.mrb[108].mxu1 }
 0x1e0   : > { %v5301_v49 = vpop.f32.mrb[109].mxu1 }
 0x1e1   : > { %v5236_v29 = vpop.f32.mrb[108].mxu0  ;;  %v5302_v0 = vadd.f32 %v5301_v49, %v5300_v20  ;;  %v5303_v36 = vpop.f32.mrb[110].mxu1 }
 0x1e2   : > { %v5237_v5 = vpop.f32.mrb[109].mxu0  ;;  %v5304_v21 = vpop.f32.mrb[111].mxu1 }
 0x1e3   : > { %v5238_v57 = vadd.f32 %v5237_v5, %v5236_v29  ;;  %v5239_v2 = vpop.f32.mrb[110].mxu0  ;;  %v5305_v37 = vadd.f32 %v5304_v21, %v5303_v36  ;;  %v7661_v24 = vadd.f32 %v5302_v0, %v7568_v3 }
 0x1e4   : > { %v5240_v14 = vpop.f32.mrb[111].mxu0 }
 0x1e5   : > { %v7664_v56 = vadd.f32 %v5238_v57, %v7565_v35  ;;  %v5241_v6 = vadd.f32 %v5240_v14, %v5239_v2  ;;  %v7667_v16 = vadd.f32 %v5305_v37, %v7574_v55 }
 0x1e7   : > { %v7670_v48 = vadd.f32 %v5241_v6, %v7571_v39 }
 0x1e8   : > { %v5306_v42 = vpop.f32.mrb[112].mxu1 }
 0x1e9   : > { %v5307_v45 = vpop.f32.mrb[113].mxu1  ;;  %v5396_v54 = vpop.f32.mrb[112].mxu0 }
 0x1ea   : > { %v5308_v23 = vadd.f32 %v5307_v45, %v5306_v42  ;;  %v5309_v32 = vpop.f32.mrb[114].mxu1  ;;  %v7673_v9 = vadd.f32 %v5396_v54, %v7592_v15  ;;  %v4096_v3 = vpop.f32.mrb[113].mxu0 }
 0x1eb   : > { %v5310_v40 = vpop.f32.mrb[115].mxu1  ;;  %v7676_v35 = vadd.f32 %v4096_v3, %v7580_v7  ;;  %v5397_v28 = vpop.f32.mrb[114].mxu0 }
 0x1ec   : > { %v5311_v18 = vadd.f32 %v5310_v40, %v5309_v32  ;;  %v7679_v55 = vadd.f32 %v5308_v23, %v7577_v58  ;;  %v7682_v39 = vadd.f32 %v5397_v28, %v7598_v1  ;;  %v4099_v38 = vpop.f32.mrb[115].mxu0 }
 0x1ed   : > { %v7685_v61 = vadd.f32 %v4099_v38, %v7586_v17 }
 0x1ee   : > { %v7688_v15 = vadd.f32 %v5311_v18, %v7583_v30 }
 0x1ef   : > { %v4223_v19 = vadd.f32 %v7685_v61, %v7676_v35 }
 0x1f1   : > { %v4224_v7 = vadd.f32 %v4223_v19, %v7673_v9  ;;  %v5400_v52 = vpop.f32.mrb[116].mxu0 }
 0x1f2   : > { %v5312_v10 = vpop.f32.mrb[116].mxu1  ;;  %v7694_v58 = vadd.f32 %v5400_v52, %v7613_v34  ;;  %v4112_v1 = vpop.f32.mrb[117].mxu0 }
 0x1f3   : > { %v5313_v13 = vpop.f32.mrb[117].mxu1  ;;  %v7697_v20 = vadd.f32 %v4112_v1, %v7604_v4  ;;  %v4225_v17 = vadd.f32 %v4224_v7, %v7682_v39  ;;  %v5401_v49 = vpop.f32.mrb[118].mxu0 }
 0x1f4   : > { %v5314_v62 = vadd.f32 %v5313_v13, %v5312_v10  ;;  %v5315_v30 = vpop.f32.mrb[118].mxu1  ;;  %v7701_v29 = vadd.f32 %v5401_v49, %v7619_v8  ;;  %v4115_v36 = vpop.f32.mrb[119].mxu0 }
 0x1f5   : > { %v5316_v0 = vpop.f32.mrb[119].mxu1  ;;  %v4226_v5 = vadd.f32 %v4225_v17, %v7697_v20  ;;  %v7705_v34 = vadd.f32 %v4115_v36, %v7610_v26 }
 0x1f6   : > { %v5317_v21 = vadd.f32 %v5316_v0, %v5315_v30  ;;  %v4008_v57 = vadd.f32 %v5314_v62, %v7589_v53 }
 0x1f7   : > { %v4227_v4 = vadd.f32 %v4226_v5, %v7705_v34 }
 0x1f8   : > { %v4011_v2 = vadd.f32 %v5317_v21, %v7595_v63 }
 0x1f9   : > { %v4228_v37 = vadd.f32 %v4227_v4, %v7694_v58 }
 0x1fa   : > { %v5318_v14 = vpop.f32.mrb[120].mxu1  ;;  %v5404_v6 = vpop.f32.mrb[120].mxu0 }
 0x1fb   : > { %v5319_v8 = vpop.f32.mrb[121].mxu1  ;;  %v7712_v42 = vadd.f32 %v5404_v6, %v7637_v47  ;;  %v4128_v54 = vpop.f32.mrb[121].mxu0  ;;  %v4229_v23 = vadd.f32 %v4228_v37, %v7701_v29 }
 0x1fc   : > { %v5320_v45 = vadd.f32 %v5319_v8, %v5318_v14  ;;  %v5321_v26 = vpop.f32.mrb[122].mxu1  ;;  %v7716_v32 = vadd.f32 %v4128_v54, %v7625_v50  ;;  %v5405_v53 = vpop.f32.mrb[122].mxu0 }
 0x1fd   : > { %v5322_v3 = vpop.f32.mrb[123].mxu1  ;;  %v7719_v63 = vadd.f32 %v5405_v53, %v7643_v41  ;;  %v4131_v28 = vpop.f32.mrb[123].mxu0 }
 0x1fe   : > { %v5323_v40 = vadd.f32 %v5322_v3, %v5321_v26  ;;  %v4016_v18 = vadd.f32 %v5320_v45, %v7601_v59  ;;  %v4230_v47 = vadd.f32 %v4229_v23, %v7716_v32  ;;  %v7724_v38 = vadd.f32 %v4131_v28, %v7631_v27 }
 0x200   : > { %v4019_v19 = vadd.f32 %v5323_v40, %v7607_v22  ;;  %v4231_v7 = vadd.f32 %v4230_v47, %v7724_v38 }
 0x202   : > { %v4232_v50 = vadd.f32 %v4231_v7, %v7712_v42 }
 0x203   : > { %v5408_v10 = vpop.f32.mrb[124].mxu0 }
 0x204   : > { %v7730_v52 = vadd.f32 %v5408_v10, %v7661_v24  ;;  %v4144_v41 = vpop.f32.mrb[125].mxu0  ;;  %v5324_v13 = vpop.f32.mrb[124].mxu1  ;;  %v4233_v59 = vadd.f32 %v4232_v50, %v7719_v63 }
 0x205   : > { %v7733_v1 = vadd.f32 %v4144_v41, %v7649_v43  ;;  %v5409_v62 = vpop.f32.mrb[126].mxu0  ;;  %v5325_v27 = vpop.f32.mrb[125].mxu1 }
 0x206   : > { %v7737_v17 = vadd.f32 %v5409_v62, %v7667_v16  ;;  %v4147_v22 = vpop.f32.mrb[127].mxu0  ;;  %v5326_v30 = vadd.f32 %v5325_v27, %v5324_v13  ;;  %v5327_v0 = vpop.f32.mrb[126].mxu1 }
 0x207   : > { %v4234_v49 = vadd.f32 %v4233_v59, %v7733_v1  ;;  %v7741_v24 = vadd.f32 %v4147_v22, %v7655_v44  ;;  %v5328_v36 = vpop.f32.mrb[127].mxu1 }
 0x208   : > { %v5329_v5 = vadd.f32 %v5328_v36, %v5327_v0  ;;  %v4024_v21 = vadd.f32 %v5326_v30, %v7616_v46 }
 0x209   : > { %v4235_v43 = vadd.f32 %v4234_v49, %v7741_v24 }
 0x20a   : > { %v4027_v37 = vadd.f32 %v5329_v5, %v7622_v12 }
 0x20b   : > { %v4236_v4 = vadd.f32 %v4235_v43, %v7730_v52 }
 0x20c   : > { %v5412_v16 = vpop.f32.mrb[128].mxu0 }
 0x20d   : > { %v4237_v14 = vadd.f32 %v4236_v4, %v7737_v17  ;;  %v7748_v6 = vadd.f32 %v5412_v16, %v4008_v57  ;;  %v4160_v8 = vpop.f32.mrb[129].mxu0 }
 0x20e   : > { %v5330_v45 = vpop.f32.mrb[128].mxu1  ;;  %v7751_v44 = vadd.f32 %v4160_v8, %v7679_v55  ;;  %v5413_v54 = vpop.f32.mrb[130].mxu0 }
 0x20f   : > { %v5331_v23 = vpop.f32.mrb[129].mxu1  ;;  %v7753_v26 = vadd.f32 %v5413_v54, %v4011_v2  ;;  %v4163_v53 = vpop.f32.mrb[131].mxu0 }
 0x210   : > { %v5332_v46 = vadd.f32 %v5331_v23, %v5330_v45  ;;  %v4238_v3 = vadd.f32 %v4237_v14, %v7751_v44  ;;  %v5333_v40 = vpop.f32.mrb[130].mxu1  ;;  %v7757_v12 = vadd.f32 %v4163_v53, %v7688_v15 }
 0x211   : > { %v5334_v28 = vpop.f32.mrb[131].mxu1 }
 0x212   : > { %v5335_v57 = vadd.f32 %v5334_v28, %v5333_v40  ;;  %v4239_v47 = vadd.f32 %v4238_v3, %v7757_v12  ;;  %v4032_v7 = vadd.f32 %v5332_v46, %v7628_v60 }
 0x214   : > { %v4240_v55 = vadd.f32 %v4239_v47, %v7748_v6  ;;  %v4035_v50 = vadd.f32 %v5335_v57, %v7634_v11 }
 0x216   : > { %v4241_v2 = vadd.f32 %v4240_v55, %v7753_v26 }
 0x217   : > { %v5336_v10 = vpop.f32.mrb[132].mxu1  ;;  %v5416_v41 = vpop.f32.mrb[132].mxu0 }
 0x218   : > { %v7764_v13 = vadd.f32 %v5416_v41, %v4024_v21  ;;  %v5337_v59 = vpop.f32.mrb[133].mxu1  ;;  %v4176_v62 = vpop.f32.mrb[133].mxu0 }
 0x219   : > { %v5338_v15 = vadd.f32 %v5337_v59, %v5336_v10  ;;  %v7766_v27 = vadd.f32 %v4176_v62, %v4016_v18  ;;  %v5339_v22 = vpop.f32.mrb[134].mxu1  ;;  %v5417_v30 = vpop.f32.mrb[134].mxu0 }
 0x21a   : > { %v7768_v49 = vadd.f32 %v5417_v30, %v4027_v37  ;;  %v5340_v60 = vpop.f32.mrb[135].mxu1  ;;  %v4179_v0 = vpop.f32.mrb[135].mxu0 }
 0x21b   : > { %v4242_v36 = vadd.f32 %v4241_v2, %v7766_v27  ;;  %v5341_v11 = vadd.f32 %v5340_v60, %v5339_v22  ;;  %v4180_v5 = vadd.f32 %v4179_v0, %v4019_v19  ;;  %v4040_v43 = vadd.f32 %v5338_v15, %v7640_v25 }
 0x21d   : > { %v4243_v4 = vadd.f32 %v4242_v36, %v4180_v5  ;;  %v4043_v21 = vadd.f32 %v5341_v11, %v7646_v31 }
 0x21f   : > { %v4244_v16 = vadd.f32 %v4243_v4, %v7764_v13 }
 0x220   : > { %v5342_v14 = vpop.f32.mrb[136].mxu1  ;;  %v5420_v18 = vpop.f32.mrb[136].mxu0 }
 0x221   : > { %v4201_v8 = vadd.f32 %v5420_v18, %v4040_v43  ;;  %v5343_v45 = vpop.f32.mrb[137].mxu1  ;;  %v4192_v54 = vpop.f32.mrb[137].mxu0  ;;  %v4245_v53 = vadd.f32 %v4244_v16, %v7768_v49 }
 0x222   : > { %v5344_v37 = vadd.f32 %v5343_v45, %v5342_v14  ;;  %v4193_v23 = vadd.f32 %v4192_v54, %v4032_v7  ;;  %v5345_v46 = vpop.f32.mrb[138].mxu1  ;;  %v5421_v3 = vpop.f32.mrb[138].mxu0 }
 0x223   : > { %v4204_v40 = vadd.f32 %v5421_v3, %v4043_v21  ;;  %v5346_v19 = vpop.f32.mrb[139].mxu1  ;;  %v4195_v28 = vpop.f32.mrb[139].mxu0 }
 0x224   : > { %v4246_v25 = vadd.f32 %v4245_v53, %v4193_v23  ;;  %v5347_v57 = vadd.f32 %v5346_v19, %v5345_v46  ;;  %v4196_v47 = vadd.f32 %v4195_v28, %v4035_v50  ;;  %v4048_v31 = vadd.f32 %v5344_v37, %v7652_v33 }
 0x226   : > { %v4247_v55 = vadd.f32 %v4246_v25, %v4196_v47  ;;  %v4051_v2 = vadd.f32 %v5347_v57, %v7658_v51 }
 0x228   : > { %v4248_v10 = vadd.f32 %v4247_v55, %v4201_v8 }
 0x229   : > { %v5424_v41 = vpop.f32.mrb[140].mxu0 }
 0x22a   : > { %v4249_v59 = vadd.f32 %v4248_v10, %v4204_v40  ;;  %v5348_v62 = vpop.f32.mrb[140].mxu1  ;;  %v4208_v7 = vpop.f32.mrb[141].mxu0 }
 0x22b   : > { %v5349_v15 = vpop.f32.mrb[141].mxu1  ;;  %v4209_v22 = vadd.f32 %v4208_v7, %v4048_v31  ;;  %v5425_v30 = vpop.f32.mrb[142].mxu0 }
 0x22c   : > { %v5350_v60 = vadd.f32 %v5349_v15, %v5348_v62  ;;  %v5351_v0 = vpop.f32.mrb[142].mxu1  ;;  %v4211_v36 = vpop.f32.mrb[143].mxu0 }
 0x22d   : > { %v4250_v11 = vadd.f32 %v4249_v59, %v4209_v22  ;;  %v5352_v43 = vpop.f32.mrb[143].mxu1  ;;  %v4212_v4 = vadd.f32 %v4211_v36, %v4051_v2 }
 0x22e   : > { %v4056_v50 = vadd.f32 %v5350_v60, %v7664_v56  ;;  %v5353_v33 = vadd.f32 %v5352_v43, %v5351_v0 }
 0x22f   : > { %v4251_v21 = vadd.f32 %v4250_v11, %v4212_v4 }
 0x230   : > { %v4217_v16 = vadd.f32 %v5424_v41, %v4056_v50  ;;  %v4059_v51 = vadd.f32 %v5353_v33, %v7670_v48 }
 0x232   : > { %v4220_v14 = vadd.f32 %v5425_v30, %v4059_v51  ;;  %v4252_v18 = vadd.f32 %v4251_v21, %v4217_v16 }
 0x234   : > { %v4253_v45 = vadd.f32 %v4252_v18, %v4220_v14 }
 0x236   : > { %v4254_v54 = vrot.slane %v4253_v45, 4 }
 0x238   : > { %v4255_v37 = vadd.f32 %v4254_v54, %v4253_v45 }
 0x23a   : > { %v4256_v53 = vrot.slane %v4255_v37, 2 }
 0x23c   : > { %v4257_v46 = vadd.f32 %v4256_v53, %v4255_v37 }
 0x23e   : > { %v4258_v3 = vrot.slane %v4257_v46, 1 }
 0x240   : > { %v4259_v19 = vadd.f32 %v4258_v3, %v4257_v46 }
 0x242   : > { %v4260_v28 = vmul.f32 0.00390625, %v4259_v19 }
 0x244   : > { %v7780_v25 = vsub.f32 %v7741_v24, %v4260_v28  ;;  %v7783_v56 = vsub.f32 %v7730_v52, %v4260_v28  ;;  %v7786_v57 = vsub.f32 %v7737_v17, %v4260_v28  ;;  %v7789_v48 = vsub.f32 %v7751_v44, %v4260_v28 }
 0x245   : > { %v7792_v31 = vsub.f32 %v7757_v12, %v4260_v28  ;;  %v7795_v55 = vsub.f32 %v7748_v6, %v4260_v28  ;;  %v7798_v2 = vsub.f32 %v7753_v26, %v4260_v28  ;;  %v7801_v24 = vsub.f32 %v7766_v27, %v4260_v28 }
 0x246   : > { %v7803_v52 = vsub.f32 %v4180_v5, %v4260_v28  ;;  %v7806_v17 = vsub.f32 %v7764_v13, %v4260_v28  ;;  %v7809_v44 = vsub.f32 %v7768_v49, %v4260_v28  ;;  %v7811_v10 = vsub.f32 %v4193_v23, %v4260_v28 }
 0x247   : > { %v7813_v12 = vsub.f32 %v4196_v47, %v4260_v28  ;;  %v7815_v6 = vsub.f32 %v4201_v8, %v4260_v28  ;;  %v7817_v41 = vsub.f32 %v4204_v40, %v4260_v28  ;;  %v7819_v26 = vsub.f32 %v4209_v22, %v4260_v28 }
 0x248   : > { %v7821_v27 = vsub.f32 %v4212_v4, %v4260_v28  ;;  %v7823_v5 = vsub.f32 %v4217_v16, %v4260_v28  ;;  %v7825_v59 = vsub.f32 %v4220_v14, %v4260_v28  ;;  %v7828_v13 = vsub.f32 %v7676_v35, %v4260_v28 }
 0x249   : > { %v7831_v49 = vsub.f32 %v7685_v61, %v4260_v28  ;;  %v7834_v23 = vsub.f32 %v7673_v9, %v4260_v28  ;;  %v7841_v47 = vsub.f32 %v7682_v39, %v4260_v28  ;;  %v7844_v62 = vsub.f32 %v7697_v20, %v4260_v28 }
 0x24a   : > { %v4293_v8 = vmul.f32 %v7828_v13, %v7828_v13  ;;  %v7849_v7 = vsub.f32 %v7705_v34, %v4260_v28  ;;  %v7854_v22 = vsub.f32 %v7694_v58, %v4260_v28  ;;  %v7859_v20 = vsub.f32 %v7701_v29, %v4260_v28 }
 0x24b   : > { %v4294_v40 = vmul.f32 %v7831_v49, %v7831_v49  ;;  %v4295_v35 = vmul.f32 %v7834_v23, %v7834_v23  ;;  %v4296_v9 = vmul.f32 %v7841_v47, %v7841_v47  ;;  %v4297_v39 = vmul.f32 %v7844_v62, %v7844_v62 }
 0x24c   : > { %v4298_v60 = vmul.f32 %v7849_v7, %v7849_v7  ;;  %v7864_v34 = vsub.f32 %v7716_v32, %v4260_v28  ;;  %v4299_v36 = vmul.f32 %v7854_v22, %v7854_v22  ;;  %v7869_v58 = vsub.f32 %v7724_v38, %v4260_v28 }
 0x24d   : > { %v4325_v61 = vadd.f32 %v4294_v40, %v4293_v8  ;;  %v4300_v43 = vmul.f32 %v7859_v20, %v7859_v20  ;;  %v7874_v29 = vsub.f32 %v7712_v42, %v4260_v28  ;;  %v7879_v32 = vsub.f32 %v7719_v63, %v4260_v28 }
 0x24e   : > { %v4301_v50 = vmul.f32 %v7864_v34, %v7864_v34  ;;  %v4302_v21 = vmul.f32 %v7869_v58, %v7869_v58  ;;  %v7884_v38 = vsub.f32 %v7733_v1, %v4260_v28  ;;  %v4306_v54 = vmul.f32 %v7780_v25, %v7780_v25 }
 0x24f   : > { %v4326_v15 = vadd.f32 %v4325_v61, %v4295_v35  ;;  %v4303_v51 = vmul.f32 %v7874_v29, %v7874_v29  ;;  %v4304_v42 = vmul.f32 %v7879_v32, %v7879_v32  ;;  %v4307_v1 = vmul.f32 %v7783_v56, %v7783_v56 }
 0x250   : > { %v4305_v45 = vmul.f32 %v7884_v38, %v7884_v38  ;;  %v4308_v46 = vmul.f32 %v7786_v57, %v7786_v57  ;;  %v4309_v19 = vmul.f32 %v7789_v48, %v7789_v48  ;;  %v4310_v8 = vmul.f32 %v7792_v31, %v7792_v31 }
 0x251   : > { %v4327_v30 = vadd.f32 %v4326_v15, %v4296_v9  ;;  %v4311_v35 = vmul.f32 %v7795_v55, %v7795_v55  ;;  %v4312_v9 = vmul.f32 %v7798_v2, %v7798_v2 }
 0x253   : > { %v4328_v0 = vadd.f32 %v4327_v30, %v4297_v39  ;;  %v4313_v39 = vmul.f32 %v7801_v24, %v7801_v24 }
 0x255   : > { %v4329_v11 = vadd.f32 %v4328_v0, %v4298_v60  ;;  %v4314_v60 = vmul.f32 %v7803_v52, %v7803_v52 }
 0x257   : > { %v4330_v4 = vadd.f32 %v4329_v11, %v4299_v36  ;;  %v4315_v36 = vmul.f32 %v7806_v17, %v7806_v17 }
 0x259   : > { %v4331_v33 = vadd.f32 %v4330_v4, %v4300_v43  ;;  %v4316_v43 = vmul.f32 %v7809_v44, %v7809_v44 }
 0x25b   : > { %v4332_v16 = vadd.f32 %v4331_v33, %v4301_v50  ;;  %v4317_v50 = vmul.f32 %v7811_v10, %v7811_v10 }
 0x25d   : > { %v4333_v14 = vadd.f32 %v4332_v16, %v4302_v21  ;;  %v4318_v21 = vmul.f32 %v7813_v12, %v7813_v12 }
 0x25f   : > { %v4334_v18 = vadd.f32 %v4333_v14, %v4303_v51  ;;  %v4319_v51 = vmul.f32 %v7815_v6, %v7815_v6 }
 0x261   : > { %v4335_v63 = vadd.f32 %v4334_v18, %v4304_v42  ;;  %v4320_v42 = vmul.f32 %v7817_v41, %v7817_v41 }
 0x263   : > { %v4336_v37 = vadd.f32 %v4335_v63, %v4305_v45  ;;  %v4321_v45 = vmul.f32 %v7819_v26, %v7819_v26 }
 0x265   : > { %v4337_v53 = vadd.f32 %v4336_v37, %v4306_v54  ;;  %v4322_v54 = vmul.f32 %v7821_v27, %v7821_v27 }
 0x267   : > { %v4338_v3 = vadd.f32 %v4337_v53, %v4307_v1  ;;  %v4323_v1 = vmul.f32 %v7823_v5, %v7823_v5 }
 0x269   : > { %v4339_v28 = vadd.f32 %v4338_v3, %v4308_v46  ;;  %v4324_v46 = vmul.f32 %v7825_v59, %v7825_v59 }
 0x26b   : > { %v4340_v40 = vadd.f32 %v4339_v28, %v4309_v19 }
 0x26d   : > { %v4341_v61 = vadd.f32 %v4340_v40, %v4310_v8 }
 0x26f   : > { %v4342_v15 = vadd.f32 %v4341_v61, %v4311_v35 }
 0x271   : > { %v4343_v30 = vadd.f32 %v4342_v15, %v4312_v9 }
 0x273   : > { %v4344_v0 = vadd.f32 %v4343_v30, %v4313_v39 }
 0x275   : > { %v4345_v11 = vadd.f32 %v4344_v0, %v4314_v60 }
 0x277   : > { %v4346_v4 = vadd.f32 %v4345_v11, %v4315_v36 }
 0x279   : > { %v4347_v33 = vadd.f32 %v4346_v4, %v4316_v43 }
 0x27b   : > { %v4348_v16 = vadd.f32 %v4347_v33, %v4317_v50 }
 0x27d   : > { %v4349_v14 = vadd.f32 %v4348_v16, %v4318_v21 }
 0x27f   : > { %v4350_v18 = vadd.f32 %v4349_v14, %v4319_v51 }
 0x281   : > { %v4351_v63 = vadd.f32 %v4350_v18, %v4320_v42 }
 0x283   : > { %v4352_v37 = vadd.f32 %v4351_v63, %v4321_v45 }
 0x285   : > { %v4353_v53 = vadd.f32 %v4352_v37, %v4322_v54 }
 0x287   : > { %v4354_v3 = vadd.f32 %v4353_v53, %v4323_v1 }
 0x289   : > { %v4355_v19 = vadd.f32 %v4354_v3, %v4324_v46 }
 0x28b   : > { %v4356_v28 = vrot.slane %v4355_v19, 4 }
 0x28d   : > { %v4357_v8 = vadd.f32 %v4356_v28, %v4355_v19 }
 0x28f   : > { %v4358_v40 = vrot.slane %v4357_v8, 2 }
 0x291   : > { %v4359_v35 = vadd.f32 %v4358_v40, %v4357_v8 }
 0x293   : > { %v4360_v61 = vrot.slane %v4359_v35, 1 }
 0x295   : > { %v4361_v9 = vadd.f32 %v4360_v61, %v4359_v35 }
 0x297   : > { %v4362_v15 = vmul.f32 0.00390625, %v4361_v9 }
 0x299   : > { %v4363_v39 = vadd.f32 1e-05, %v4362_v15 }
 0x29b   : > { %5587 = vrsqrt.f32 %v4363_v39 }
 0x2a5   : > { %v5588_v30 = vpop.eup %5587 }
 0x2a6   : > { %v4365_v60 = vmul.f32 %v5588_v30, %v7828_v13  ;;  %v4366_v0 = vmul.f32 %v5588_v30, %v7831_v49  ;;  %v4367_v36 = vmul.f32 %v5588_v30, %v7834_v23  ;;  %v4368_v11 = vmul.f32 %v5588_v30, %v7841_v47 }
 0x2a7   : > { %v4369_v43 = vmul.f32 %v5588_v30, %v7844_v62  ;;  %v4370_v4 = vmul.f32 %v5588_v30, %v7849_v7  ;;  %v4371_v50 = vmul.f32 %v5588_v30, %v7854_v22  ;;  %v4372_v33 = vmul.f32 %v5588_v30, %v7859_v20 }
 0x2a8   : > { %v4373_v21 = vmul.f32 %v5588_v30, %v7864_v34  ;;  %v4374_v16 = vmul.f32 %v5588_v30, %v7869_v58  ;;  %v4375_v13 = vmul.f32 %v5588_v30, %v7874_v29  ;;  %v4376_v49 = vmul.f32 %v5588_v30, %v7879_v32 }
 0x2a9   : > { %v4377_v23 = vmul.f32 %v5588_v30, %v7884_v38  ;;  %v4378_v47 = vmul.f32 %v5588_v30, %v7780_v25  ;;  %v4379_v62 = vmul.f32 %v5588_v30, %v7783_v56  ;;  %v4380_v7 = vmul.f32 %v5588_v30, %v7786_v57 }
 0x2aa   : > { %v4381_v22 = vmul.f32 %v5588_v30, %v7789_v48  ;;  %v4382_v20 = vmul.f32 %v5588_v30, %v7792_v31  ;;  %v4383_v34 = vmul.f32 %v5588_v30, %v7795_v55  ;;  %v4384_v58 = vmul.f32 %v5588_v30, %v7798_v2 }
 0x2ab   : > { %v7952_v29 = vmul.f32 %v5588_v30, %v7801_v24  ;;  %v7955_v32 = vmul.f32 %v5588_v30, %v7803_v52  ;;  %v7958_v25 = vmul.f32 %v5588_v30, %v7806_v17  ;;  %v7961_v56 = vmul.f32 %v5588_v30, %v7809_v44 }
 0x2ac   : > { %v7964_v57 = vmul.f32 %v5588_v30, %v7811_v10  ;;  %v7967_v48 = vmul.f32 %v5588_v30, %v7813_v12  ;;  %v7970_v31 = vmul.f32 %v5588_v30, %v7815_v6  ;;  %v7973_v55 = vmul.f32 %v5588_v30, %v7817_v41 }
 0x2ad   : > { %v7981_v2 = vmul.f32 %v5588_v30, %v7819_v26  ;;  %v7984_v24 = vmul.f32 %v5588_v30, %v7821_v27  ;;  %v7987_v52 = vmul.f32 %v5588_v30, %v7823_v5  ;;  %v7990_v17 = vmul.f32 %v5588_v30, %v7825_v59 }
 0x2ae   : > { %v4397_v44 = vmax.f32 %v4365_v60, 0.0  ;;  %v4398_v10 = vmax.f32 %v4366_v0, 0.0  ;;  %v4399_v12 = vmax.f32 %v4367_v36, 0.0  ;;  %v4400_v6 = vmax.f32 %v4368_v11, 0.0 }
 0x2af   : > { %v4401_v41 = vmax.f32 %v4369_v43, 0.0  ;;  %v4402_v26 = vmax.f32 %v4370_v4, 0.0  ;;  %v4403_v38 = vmax.f32 %v4371_v50, 0.0  ;;  %v4404_v27 = vmax.f32 %v4372_v33, 0.0 }
 0x2b0   : > { %v4405_v51 = vmax.f32 %v4373_v21, 0.0  ;;  %v4406_v5 = vmax.f32 %v4374_v16, 0.0  ;;  %v4407_v14 = vmax.f32 %v4375_v13, 0.0  ;;  %v4408_v42 = vmax.f32 %v4376_v49, 0.0  ;;  %4430 = vst.msk [vmem:[%s7978_s25] sm:$0xff] %vm4429_vm6, %v4397_v44  ;;  %4431 = vst.msk [vmem:[%s7978_s25 + $0x8] sm:$0xff] %vm4429_vm6, %v4398_v10 }
 0x2b1   : > { %4432 = vst.msk [vmem:[%s7978_s25 + $0x10] sm:$0xff] %vm4429_vm6, %v4399_v12  ;;  %4433 = vst.msk [vmem:[%s7978_s25 + $0x18] sm:$0xff] %vm4429_vm6, %v4400_v6  ;;  %v4409_v59 = vmax.f32 %v4377_v23, 0.0  ;;  %v4410_v18 = vmax.f32 %v4378_v47, 0.0  ;;  %v4411_v45 = vmax.f32 %v4379_v62, 0.0  ;;  %v4412_v63 = vmax.f32 %v4380_v7, 0.0 }
 0x2b2   : > { %4434 = vst.msk [vmem:[%s7978_s25 + $0x20] sm:$0xff] %vm4429_vm6, %v4401_v41  ;;  %4435 = vst.msk [vmem:[%s7978_s25 + $0x28] sm:$0xff] %vm4429_vm6, %v4402_v26  ;;  %v4413_v54 = vmax.f32 %v4381_v22, 0.0  ;;  %v4414_v37 = vmax.f32 %v4382_v20, 0.0  ;;  %v4415_v1 = vmax.f32 %v4383_v34, 0.0  ;;  %v4416_v53 = vmax.f32 %v4384_v58, 0.0 }
 0x2b3   : > { %4436 = vst.msk [vmem:[%s7978_s25 + $0x30] sm:$0xff] %vm4429_vm6, %v4403_v38  ;;  %4437 = vst.msk [vmem:[%s7978_s25 + $0x38] sm:$0xff] %vm4429_vm6, %v4404_v27  ;;  %v4417_v46 = vmax.f32 %v7952_v29, 0.0  ;;  %v4418_v3 = vmax.f32 %v7955_v32, 0.0  ;;  %v4419_v19 = vmax.f32 %v7958_v25, 0.0  ;;  %v4420_v28 = vmax.f32 %v7961_v56, 0.0 }
 0x2b4   : > { %4438 = vst.msk [vmem:[%s7978_s25 + $0x40] sm:$0xff] %vm4429_vm6, %v4405_v51  ;;  %4439 = vst.msk [vmem:[%s7978_s25 + $0x48] sm:$0xff] %vm4429_vm6, %v4406_v5  ;;  %v4421_v8 = vmax.f32 %v7964_v57, 0.0  ;;  %v4422_v40 = vmax.f32 %v7967_v48, 0.0  ;;  %v4423_v35 = vmax.f32 %v7970_v31, 0.0  ;;  %v4424_v61 = vmax.f32 %v7973_v55, 0.0 }
 0x2b5   : > { %4440 = vst.msk [vmem:[%s7978_s25 + $0x50] sm:$0xff] %vm4429_vm6, %v4407_v14  ;;  %4441 = vst.msk [vmem:[%s7978_s25 + $0x58] sm:$0xff] %vm4429_vm6, %v4408_v42  ;;  %v4425_v9 = vmax.f32 %v7981_v2, 0.0  ;;  %v4426_v15 = vmax.f32 %v7984_v24, 0.0  ;;  %v4427_v39 = vmax.f32 %v7987_v52, 0.0  ;;  %v4428_v30 = vmax.f32 %v7990_v17, 0.0 }
 0x2b6   : > { %4442 = vst.msk [vmem:[%s7978_s25 + $0x60] sm:$0xff] %vm4429_vm6, %v4409_v59  ;;  %4443 = vst.msk [vmem:[%s7978_s25 + $0x68] sm:$0xff] %vm4429_vm6, %v4410_v18 }
 0x2b7   : > { %4444 = vst.msk [vmem:[%s7978_s25 + $0x70] sm:$0xff] %vm4429_vm6, %v4411_v45  ;;  %4445 = vst.msk [vmem:[%s7978_s25 + $0x78] sm:$0xff] %vm4429_vm6, %v4412_v63 }
 0x2b8   : > { %4446 = vst.msk [vmem:[%s7978_s25 + $0x80] sm:$0xff] %vm4429_vm6, %v4413_v54  ;;  %4447 = vst.msk [vmem:[%s7978_s25 + $0x88] sm:$0xff] %vm4429_vm6, %v4414_v37 }
 0x2b9   : > { %4448 = vst.msk [vmem:[%s7978_s25 + $0x90] sm:$0xff] %vm4429_vm6, %v4415_v1  ;;  %4449 = vst.msk [vmem:[%s7978_s25 + $0x98] sm:$0xff] %vm4429_vm6, %v4416_v53 }
 0x2ba   : > { %4450 = vst.msk [vmem:[%s7978_s25 + $0xa0] sm:$0xff] %vm4429_vm6, %v4417_v46  ;;  %4451 = vst.msk [vmem:[%s7978_s25 + $0xa8] sm:$0xff] %vm4429_vm6, %v4418_v3 }
 0x2bb   : > { %4452 = vst.msk [vmem:[%s7978_s25 + $0xb0] sm:$0xff] %vm4429_vm6, %v4419_v19  ;;  %4453 = vst.msk [vmem:[%s7978_s25 + $0xb8] sm:$0xff] %vm4429_vm6, %v4420_v28 }
 0x2bc   : > { %4454 = vst.msk [vmem:[%s7978_s25 + $0xc0] sm:$0xff] %vm4429_vm6, %v4421_v8  ;;  %4455 = vst.msk [vmem:[%s7978_s25 + $0xc8] sm:$0xff] %vm4429_vm6, %v4422_v40 }
 0x2bd   : > { %4456 = vst.msk [vmem:[%s7978_s25 + $0xd0] sm:$0xff] %vm4429_vm6, %v4423_v35  ;;  %4457 = vst.msk [vmem:[%s7978_s25 + $0xd8] sm:$0xff] %vm4429_vm6, %v4424_v61 }
 0x2be   : > { %4458 = vst.msk [vmem:[%s7978_s25 + $0xe0] sm:$0xff] %vm4429_vm6, %v4425_v9  ;;  %4459 = vst.msk [vmem:[%s7978_s25 + $0xe8] sm:$0xff] %vm4429_vm6, %v4426_v15 }
 0x2bf   : > { %4460 = vst.msk [vmem:[%s7978_s25 + $0xf0] sm:$0xff] %vm4429_vm6, %v4427_v39  ;;  %4461 = vst.msk [vmem:[%s7978_s25 + $0xf8] sm:$0xff] %vm4429_vm6, %v4428_v30 }
 0x2c0 PF: > { %s13_s14 = sadd.s32 1, %s5622_s14   ;;  %s8117_s12 = smov %s5618_s13 }
 0x2c1   : > { %p10_p5 = scmp.ge.s32.totalorder %s13_s14, 4   ;;  %s8118_s13 = smov %s8120_s2 }
 0x2c3   :  { %12 = sbr.rel (!%p10_p5) target bundleno = 2 (0x2), region = 65 }

</bundles_post_ra>
